<compile_context>
chip_gen: v6e
topology: v6e:2x2x1
jax: 0.10.0
libtpu: 0.0.40
codegen_flags: <defaults>
</compile_context>

<pallas_src>
import math
import numpy as np
import jax
import jax.numpy as jnp
from jax.experimental import pallas as pl
from jax.experimental.pallas import tpu as pltpu


# ----------------------------------------------------------------------------
# Static helpers (plain numpy glue)
# ----------------------------------------------------------------------------
def interp_matrix(Lin, Lout):
    """Matrix M (Lout, Lin) s.t. M @ x == F.interpolate(x, Lout, 'linear',
    align_corners=False) along the length axis."""
    M = np.zeros((Lout, Lin), np.float32)
    if Lin == 1:
        M[:, 0] = 1.0
        return M
    scale = Lin / Lout
    for i in range(Lout):
        src = (i + 0.5) * scale - 0.5
        src = max(src, 0.0)
        i0 = min(int(np.floor(src)), Lin - 1)
        i1 = min(i0 + 1, Lin - 1)
        lam = src - i0
        M[i, i0] += 1.0 - lam
        M[i, i1] += lam
    return M


# ----------------------------------------------------------------------------
# Fused FCNA kernel (one batch element per grid step)
# ----------------------------------------------------------------------------
def _build_fused_kernel(L, K1, K2, K3):
    # Static encoder sizes (MaxPool1d floor mode, no padding).
    Lc1 = L - K1 + 1
    P1 = (Lc1 - 4) // 4 + 1
    Lc2 = P1 - K2 + 1
    P2 = (Lc2 - 4) // 4 + 1
    Lc3 = P2 - K3 + 1
    P3 = (Lc3 - 2) // 2 + 1

    def kernel(xc_ref, x_ref,
               w1_ref, b1_ref, w2_ref, b2_ref, w3_ref, b3_ref,
               m32_ref, m21_ref, m10_ref,
               wb4_ref, s4_ref, t4_ref,
               wb3_ref, s3_ref, t3_ref,
               wb2_ref, s2_ref, t2_ref,
               wb1_ref, s1_ref, t1_ref,
               out_ref,
               c1, c2, c3, p1, p2, d4, d3, d2, d1):
        f32 = jnp.float32

        def valid_conv_taps(src_ref, Lout, w_ref, K):
            # sum_k src[k : k+Lout, :] @ w[k]   (contraction = Cin per tap)
            acc = jnp.dot(src_ref[pl.ds(0, Lout), :], w_ref[0],
                          preferred_element_type=f32)
            for k in range(1, K):
                acc = acc + jnp.dot(src_ref[pl.ds(k, Lout), :], w_ref[k],
                                    preferred_element_type=f32)
            return acc

        def strided_maxpool(src_ref, Lout, k):
            # MaxPool1d(kernel=k, stride=k): max of k sublane-strided reads.
            m = src_ref[pl.ds(0, Lout, stride=k), :]
            for j in range(1, k):
                m = jnp.maximum(m, src_ref[pl.ds(j, Lout, stride=k), :])
            return m

        def pad_store(dref, y, Lout):
            # write y into rows [1, Lout], keep zero edge rows for 'same' conv
            C = dref.shape[-1]
            z = jnp.zeros((1, C), f32)
            dref[pl.ds(0, 1), :] = z
            dref[pl.ds(Lout + 1, 1), :] = z
            dref[pl.ds(1, Lout), :] = y

        # ---------------- encoder ----------------
        # conv1: single wide matmul on wrapper-built im2col (contraction K1*4)
        a1 = jnp.dot(xc_ref[0], w1_ref[...], preferred_element_type=f32)
        c1[...] = jnp.maximum(a1 + b1_ref[...], 0.0)
        p1[...] = strided_maxpool(c1, P1, 4)                  # skip2 (P1, 64)

        a2 = valid_conv_taps(p1, Lc2, w2_ref, K2)
        c2[...] = jnp.maximum(a2 + b2_ref[...], 0.0)
        p2[...] = strided_maxpool(c2, P2, 4)                  # skip3 (P2, 64)

        a3 = valid_conv_taps(p2, Lc3, w3_ref, K3)
        c3[...] = jnp.maximum(a3 + b3_ref[...], 0.0)
        skip4 = strided_maxpool(c3, P3, 2)                    # (P3, 64)

        # ---------------- decoder ----------------
        # stage 4: AdaptiveAvgPool1d(1) + upsample-back == mean over length
        y4 = jnp.mean(skip4, axis=0, keepdims=True) + skip4
        y4 = jnp.maximum(y4 * s4_ref[...] + t4_ref[...], 0.0)
        pad_store(d4, y4, P3)
        up4 = valid_conv_taps(d4, P3, wb4_ref, 3)             # (P3, 64)

        # stage 3
        y3 = jnp.dot(m32_ref[...], up4, preferred_element_type=f32) + p2[...]
        y3 = jnp.maximum(y3 * s3_ref[...] + t3_ref[...], 0.0)
        pad_store(d3, y3, P2)
        up3 = valid_conv_taps(d3, P2, wb3_ref, 3)             # (P2, 64)

        # stage 2
        y2 = jnp.dot(m21_ref[...], up3, preferred_element_type=f32) + p1[...]
        y2 = jnp.maximum(y2 * s2_ref[...] + t2_ref[...], 0.0)
        pad_store(d2, y2, P1)
        up2 = valid_conv_taps(d2, P1, wb2_ref, 3)             # (P1, 4)

        # stage 1 (+ sigmoid)
        y1 = jnp.dot(m10_ref[...], up2, preferred_element_type=f32) + x_ref[0]
        y1 = jnp.maximum(y1 * s1_ref[...] + t1_ref[...], 0.0)
        pad_store(d1, y1, L)
        up1 = valid_conv_taps(d1, L, wb1_ref, 3)              # (L, 1)
        out_ref[0] = jax.nn.sigmoid(up1)

    sizes = dict(Lc1=Lc1, P1=P1, Lc2=Lc2, P2=P2, Lc3=Lc3, P3=P3)
    return kernel, sizes


def fcna_forward(data_ncl, p):
    """data_ncl: (B, 4, L) like the PyTorch module (NCL)."""
    B, Cin, L = data_ncl.shape
    x = jnp.transpose(data_ncl, (0, 2, 1)).astype(jnp.float32)    # (B, L, Cin)

    K1 = p['w1_k'].shape[0]
    K2 = p['w2_k'].shape[0]
    K3 = p['w3_k'].shape[0]
    kernel, sz = _build_fused_kernel(L, K1, K2, K3)
    Lc1, Lc2, Lc3 = sz['Lc1'], sz['Lc2'], sz['Lc3']
    P1, P2, P3 = sz['P1'], sz['P2'], sz['P3']
    C = p['b1'].shape[0]                                          # 64

    # conv1 im2col built once in the wrapper: (B, Lc1, K1*Cin), weight flat.
    xc = jnp.concatenate([x[:, k:k + Lc1, :] for k in range(K1)], axis=-1)
    w1f = p['w1_k'].reshape(K1 * Cin, C)

    # Linear-interp upsample matrices (align_corners=False semantics).
    M32 = jnp.asarray(interp_matrix(P3, P2))
    M21 = jnp.asarray(interp_matrix(P2, P1))
    M10 = jnp.asarray(interp_matrix(P1, L))

    args = (
        xc, x,
        w1f, p['b1'].reshape(1, -1),
        p['w2_k'], p['b2'].reshape(1, -1),
        p['w3_k'], p['b3'].reshape(1, -1),
        M32, M21, M10,
        p['wb4_k'], p['bn4_s'].reshape(1, -1), p['bn4_b'].reshape(1, -1),
        p['wb3_k'], p['bn3_s'].reshape(1, -1), p['bn3_b'].reshape(1, -1),
        p['wb2_k'], p['bn2_s'].reshape(1, -1), p['bn2_b'].reshape(1, -1),
        p['wb1_k'], p['bn1_s'].reshape(1, -1), p['bn1_b'].reshape(1, -1),
    )

    def const_spec(shape):
        nd = len(shape)
        return pl.BlockSpec(shape, lambda *_: (0,) * nd)

    in_specs = [
        pl.BlockSpec((1, Lc1, K1 * Cin), lambda i: (i, 0, 0)),    # im2col
        pl.BlockSpec((1, L, Cin), lambda i: (i, 0, 0)),           # skip1
    ] + [const_spec(a.shape) for a in args[2:]]

    f32 = jnp.float32
    scratch = [
        pltpu.VMEM((Lc1, C), f32),        # c1: conv1+relu (pre-pool)
        pltpu.VMEM((Lc2, C), f32),        # c2
        pltpu.VMEM((Lc3, C), f32),        # c3
        pltpu.VMEM((P1, C), f32),         # p1 / skip2
        pltpu.VMEM((P2, C), f32),         # p2 / skip3
        pltpu.VMEM((P3 + 2, C), f32),     # d4: padded decoder activation
        pltpu.VMEM((P2 + 2, C), f32),     # d3
        pltpu.VMEM((P1 + 2, C), f32),     # d2
        pltpu.VMEM((L + 2, Cin), f32),    # d1
    ]

    flops = 2 * B * (
        Lc1 * (K1 * Cin) * C + K2 * Lc2 * C * C + K3 * Lc3 * C * C
        + 3 * P3 * C * C + P2 * P3 * C + 3 * P2 * C * C
        + P1 * P2 * C + 3 * P1 * C * Cin + L * P1 * Cin + 3 * L * Cin)
    bytes_accessed = sum(int(np.prod(a.shape)) * 4 for a in args) + B * L * 4
    cost = pl.CostEstimate(flops=flops, transcendentals=B * L,
                           bytes_accessed=bytes_accessed)

    out = pl.pallas_call(
        kernel,
        out_shape=jax.ShapeDtypeStruct((B, L, 1), jnp.float32),
        grid=(B,),
        in_specs=in_specs,
        out_specs=pl.BlockSpec((1, L, 1), lambda i: (i, 0, 0)),
        scratch_shapes=scratch,
        compiler_params=pltpu.CompilerParams(
            dimension_semantics=("parallel",)),
        cost_estimate=cost,
    )(*args)
    return out.reshape(B, L)


# ----------------------------------------------------------------------------
# Deterministic parameter init (mirrors FCNA._init_weights)
# ----------------------------------------------------------------------------
def init_params(key):
    ks = jax.random.split(key, 7)

    def xavier(k, cout, cin, ksz):
        bound = math.sqrt(6.0 / ((cin + cout) * ksz))
        return jax.random.uniform(k, (cout, cin, ksz), jnp.float32,
                                  minval=-bound, maxval=bound)

    p = {}
    conv_specs = [('1', 64, 4, 13), ('2', 64, 64, 5), ('3', 64, 64, 3)]
    for (name, cout, cin, ksz), k in zip(conv_specs, ks[:3]):
        w = xavier(k, cout, cin, ksz)                 # torch layout (Cout,Cin,K)
        p['w' + name] = w
        p['w' + name + '_k'] = jnp.transpose(w, (2, 1, 0))   # (K,Cin,Cout)
        p['b' + name] = jnp.zeros((cout,), jnp.float32)      # init.constant_(0)

    blend_specs = [('b4', 64, 64), ('b3', 64, 64), ('b2', 4, 64), ('b1', 1, 4)]
    for (name, cout, cin), k in zip(blend_specs, ks[3:]):
        w = xavier(k, cout, cin, 3)
        p['w' + name] = w
        p['w' + name + '_k'] = jnp.transpose(w, (2, 1, 0))
        gamma = jnp.ones((cin,), jnp.float32)
        beta = jnp.zeros((cin,), jnp.float32)
        mean = jnp.zeros((cin,), jnp.float32)
        var = jnp.ones((cin,), jnp.float32)
        p['bn' + name[1]] = (gamma, beta, mean, var)
        scale = gamma / jnp.sqrt(var + 1e-5)
        p['bn' + name[1] + '_s'] = scale
        p['bn' + name[1] + '_b'] = beta - mean * scale
    return p


# ----------------------------------------------------------------------------
# Pure-JAX reference (independent of the Pallas kernel, NCL layout)
# ----------------------------------------------------------------------------
def ref_forward(data, p):
    PREC = jax.lax.Precision.HIGHEST

    def conv1d(x, w, b=None, pad=0):
        out = jax.lax.conv_general_dilated(
            x, w, (1,), [(pad, pad)],
            dimension_numbers=('NCH', 'OIH', 'NCH'), precision=PREC)
        if b is not None:
            out = out + b[None, :, None]
        return out

    def maxpool(x, k, s):
        return jax.lax.reduce_window(x, -jnp.inf, jax.lax.max,
                                     (1, 1, k), (1, 1, s), 'VALID')

    def bn_relu_conv(x, w, bn):
        gamma, beta, mean, var = bn
        y = (x - mean[None, :, None]) / jnp.sqrt(var[None, :, None] + 1e-5)
        y = y * gamma[None, :, None] + beta[None, :, None]
        y = jnp.maximum(y, 0.0)
        return conv1d(y, w, None, pad=1)

    def upsample(x, size):
        M = jnp.asarray(interp_matrix(x.shape[-1], size))
        return jnp.einsum('oi,bci->bco', M, x, precision=PREC)

    skip1 = data
    o = jnp.maximum(conv1d(data, p['w1'], p['b1']), 0.0); o = maxpool(o, 4, 4)
    skip2 = o
    o = jnp.maximum(conv1d(o, p['w2'], p['b2']), 0.0); o = maxpool(o, 4, 4)
    skip3 = o
    o = jnp.maximum(conv1d(o, p['w3'], p['b3']), 0.0); o = maxpool(o, 2, 2)
    skip4 = o
    up5 = jnp.mean(o, axis=-1, keepdims=True)
    u4 = upsample(up5, skip4.shape[-1]) + skip4
    u4 = bn_relu_conv(u4, p['wb4'], p['bn4'])
    u3 = upsample(u4, skip3.shape[-1]) + skip3
    u3 = bn_relu_conv(u3, p['wb3'], p['bn3'])
    u2 = upsample(u3, skip2.shape[-1]) + skip2
    u2 = bn_relu_conv(u2, p['wb2'], p['bn2'])
    u1 = upsample(u2, skip1.shape[-1]) + skip1
    u1 = bn_relu_conv(u1, p['wb1'], p['bn1'])
    return jax.nn.sigmoid(u1).reshape(data.shape[0], -1)


# ----------------------------------------------------------------------------
if __name__ == "__main__":
    key = jax.random.PRNGKey(0)
    kx, kp = jax.random.split(key)
    B, C, L = 2, 4, 128
    data = jax.random.normal(kx, (B, C, L), jnp.float32)   # NCL, like PyTorch
    params = init_params(kp)

    fwd = jax.jit(fcna_forward)
    out = jax.block_until_ready(fwd(data, params))
    assert out.shape == (B, L), out.shape

    ref = ref_forward(data, params)
    np.testing.assert_allclose(np.asarray(out), np.asarray(ref),
                               atol=5e-3, rtol=5e-3)
    print("KERNEL_OK")
</pallas_src>

<mosaic_0001>
module attributes {stable_mosaic.version = 11 : i64} {
  func.func @kernel(%arg0: i32, %arg1: memref<1x116x52xf32, #tpu.memory_space<vmem>>, %arg2: memref<1x128x4xf32, #tpu.memory_space<vmem>>, %arg3: memref<52x64xf32, #tpu.memory_space<vmem>>, %arg4: memref<1x64xf32, #tpu.memory_space<vmem>>, %arg5: memref<5x64x64xf32, #tpu.memory_space<vmem>>, %arg6: memref<1x64xf32, #tpu.memory_space<vmem>>, %arg7: memref<3x64x64xf32, #tpu.memory_space<vmem>>, %arg8: memref<1x64xf32, #tpu.memory_space<vmem>>, %arg9: memref<6x2xf32, #tpu.memory_space<vmem>>, %arg10: memref<29x6xf32, #tpu.memory_space<vmem>>, %arg11: memref<128x29xf32, #tpu.memory_space<vmem>>, %arg12: memref<3x64x64xf32, #tpu.memory_space<vmem>>, %arg13: memref<1x64xf32, #tpu.memory_space<vmem>>, %arg14: memref<1x64xf32, #tpu.memory_space<vmem>>, %arg15: memref<3x64x64xf32, #tpu.memory_space<vmem>>, %arg16: memref<1x64xf32, #tpu.memory_space<vmem>>, %arg17: memref<1x64xf32, #tpu.memory_space<vmem>>, %arg18: memref<3x64x4xf32, #tpu.memory_space<vmem>>, %arg19: memref<1x64xf32, #tpu.memory_space<vmem>>, %arg20: memref<1x64xf32, #tpu.memory_space<vmem>>, %arg21: memref<3x4x1xf32, #tpu.memory_space<vmem>>, %arg22: memref<1x4xf32, #tpu.memory_space<vmem>>, %arg23: memref<1x4xf32, #tpu.memory_space<vmem>>, %arg24: memref<1x128x1xf32, #tpu.memory_space<vmem>>, %arg25: memref<116x64xf32, #tpu.memory_space<vmem>>, %arg26: memref<25x64xf32, #tpu.memory_space<vmem>>, %arg27: memref<4x64xf32, #tpu.memory_space<vmem>>, %arg28: memref<29x64xf32, #tpu.memory_space<vmem>>, %arg29: memref<6x64xf32, #tpu.memory_space<vmem>>, %arg30: memref<4x64xf32, #tpu.memory_space<vmem>>, %arg31: memref<8x64xf32, #tpu.memory_space<vmem>>, %arg32: memref<31x64xf32, #tpu.memory_space<vmem>>, %arg33: memref<130x4xf32, #tpu.memory_space<vmem>>) attributes {dimension_semantics = [#tpu.dimension_semantics<parallel>], iteration_bounds = array<i64: 2>, scalar_prefetch = 0 : i64, scratch_operands = 9 : i64, tpu.core_type = #tpu.core_type<tc>, window_params = [{transform_indices = @transform_0, window_bounds = array<i64: 1, 116, 52>}, {transform_indices = @transform_1, window_bounds = array<i64: 1, 128, 4>}, {pipeline_mode = #tpu.pipeline_mode<synchronous>, transform_indices = @transform_2, window_bounds = array<i64: 52, 64>}, {pipeline_mode = #tpu.pipeline_mode<synchronous>, transform_indices = @transform_3, window_bounds = array<i64: 1, 64>}, {pipeline_mode = #tpu.pipeline_mode<synchronous>, transform_indices = @transform_4, window_bounds = array<i64: 5, 64, 64>}, {pipeline_mode = #tpu.pipeline_mode<synchronous>, transform_indices = @transform_5, window_bounds = array<i64: 1, 64>}, {pipeline_mode = #tpu.pipeline_mode<synchronous>, transform_indices = @transform_6, window_bounds = array<i64: 3, 64, 64>}, {pipeline_mode = #tpu.pipeline_mode<synchronous>, transform_indices = @transform_7, window_bounds = array<i64: 1, 64>}, {pipeline_mode = #tpu.pipeline_mode<synchronous>, transform_indices = @transform_8, window_bounds = array<i64: 6, 2>}, {pipeline_mode = #tpu.pipeline_mode<synchronous>, transform_indices = @transform_9, window_bounds = array<i64: 29, 6>}, {pipeline_mode = #tpu.pipeline_mode<synchronous>, transform_indices = @transform_10, window_bounds = array<i64: 128, 29>}, {pipeline_mode = #tpu.pipeline_mode<synchronous>, transform_indices = @transform_11, window_bounds = array<i64: 3, 64, 64>}, {pipeline_mode = #tpu.pipeline_mode<synchronous>, transform_indices = @transform_12, window_bounds = array<i64: 1, 64>}, {pipeline_mode = #tpu.pipeline_mode<synchronous>, transform_indices = @transform_13, window_bounds = array<i64: 1, 64>}, {pipeline_mode = #tpu.pipeline_mode<synchronous>, transform_indices = @transform_14, window_bounds = array<i64: 3, 64, 64>}, {pipeline_mode = #tpu.pipeline_mode<synchronous>, transform_indices = @transform_15, window_bounds = array<i64: 1, 64>}, {pipeline_mode = #tpu.pipeline_mode<synchronous>, transform_indices = @transform_16, window_bounds = array<i64: 1, 64>}, {pipeline_mode = #tpu.pipeline_mode<synchronous>, transform_indices = @transform_17, window_bounds = array<i64: 3, 64, 4>}, {pipeline_mode = #tpu.pipeline_mode<synchronous>, transform_indices = @transform_18, window_bounds = array<i64: 1, 64>}, {pipeline_mode = #tpu.pipeline_mode<synchronous>, transform_indices = @transform_19, window_bounds = array<i64: 1, 64>}, {pipeline_mode = #tpu.pipeline_mode<synchronous>, transform_indices = @transform_20, window_bounds = array<i64: 3, 4, 1>}, {pipeline_mode = #tpu.pipeline_mode<synchronous>, transform_indices = @transform_21, window_bounds = array<i64: 1, 4>}, {pipeline_mode = #tpu.pipeline_mode<synchronous>, transform_indices = @transform_22, window_bounds = array<i64: 1, 4>}, {transform_indices = @transform_23, window_bounds = array<i64: 1, 128, 1>}]} {
    %c0 = arith.constant 0 : index
    %c0_0 = arith.constant 0 : index
    %c0_1 = arith.constant 0 : index
    %0 = vector.load %arg1[%c0, %c0_0, %c0_1] : memref<1x116x52xf32, #tpu.memory_space<vmem>>, vector<1x116x52xf32>
    %1 = vector.shape_cast %0 : vector<1x116x52xf32> to vector<116x52xf32>
    %c0_2 = arith.constant 0 : index
    %c0_3 = arith.constant 0 : index
    %2 = vector.load %arg3[%c0_2, %c0_3] : memref<52x64xf32, #tpu.memory_space<vmem>>, vector<52x64xf32>
    %cst = arith.constant dense<0.000000e+00> : vector<116x64xf32>
    %3 = tpu.matmul %1, %2, %cst {dimension_numbers = #tpu.dot_dimension_numbers<[1], [0], [0], [1], [0, 0, 1, 1], [], []>} : vector<116x52xf32>, vector<52x64xf32>, vector<116x64xf32> -> vector<116x64xf32>
    %c0_4 = arith.constant 0 : index
    %c0_5 = arith.constant 0 : index
    %4 = vector.load %arg4[%c0_4, %c0_5] : memref<1x64xf32, #tpu.memory_space<vmem>>, vector<1x64xf32>
    %5 = vector.broadcast %4 : vector<1x64xf32> to vector<116x64xf32>
    %6 = arith.addf %3, %5 : vector<116x64xf32>
    %cst_6 = arith.constant 0.000000e+00 : f32
    %7 = vector.broadcast %cst_6 : f32 to vector<116x64xf32>
    %8 = arith.maximumf %6, %7 : vector<116x64xf32>
    %c0_7 = arith.constant 0 : index
    %c0_8 = arith.constant 0 : index
    %9 = vector.load %arg25[%c0_7, %c0_8] : memref<116x64xf32, #tpu.memory_space<vmem>>, vector<116x64xf32>
    tpu.vector_store %arg25[%c0_7, %c0_8], %8 {strides = array<i32>} : memref<116x64xf32, #tpu.memory_space<vmem>>, vector<116x64xf32>,
    %c0_9 = arith.constant 0 : index
    %c0_10 = arith.constant 0 : index
    %10 = tpu.strided_load %arg25[%c0_9, %c0_10] {strides = array<i32: 4, 1>} : memref<116x64xf32, #tpu.memory_space<vmem>>, vector<29x64xf32>
    %c1 = arith.constant 1 : index
    %c0_11 = arith.constant 0 : index
    %11 = tpu.strided_load %arg25[%c1, %c0_11] {strides = array<i32: 4, 1>} : memref<116x64xf32, #tpu.memory_space<vmem>>, vector<29x64xf32>
    %12 = arith.maximumf %10, %11 : vector<29x64xf32>
    %c2 = arith.constant 2 : index
    %c0_12 = arith.constant 0 : index
    %13 = tpu.strided_load %arg25[%c2, %c0_12] {strides = array<i32: 4, 1>} : memref<116x64xf32, #tpu.memory_space<vmem>>, vector<29x64xf32>
    %14 = arith.maximumf %12, %13 : vector<29x64xf32>
    %c3 = arith.constant 3 : index
    %c0_13 = arith.constant 0 : index
    %15 = tpu.strided_load %arg25[%c3, %c0_13] {strides = array<i32: 4, 1>} : memref<116x64xf32, #tpu.memory_space<vmem>>, vector<29x64xf32>
    %16 = arith.maximumf %14, %15 : vector<29x64xf32>
    %c0_14 = arith.constant 0 : index
    %c0_15 = arith.constant 0 : index
    %17 = vector.load %arg28[%c0_14, %c0_15] : memref<29x64xf32, #tpu.memory_space<vmem>>, vector<29x64xf32>
    tpu.vector_store %arg28[%c0_14, %c0_15], %16 {strides = array<i32>} : memref<29x64xf32, #tpu.memory_space<vmem>>, vector<29x64xf32>,
    %c0_16 = arith.constant 0 : index
    %c0_17 = arith.constant 0 : index
    %18 = vector.load %arg28[%c0_16, %c0_17] : memref<29x64xf32, #tpu.memory_space<vmem>>, vector<25x64xf32>
    %c0_18 = arith.constant 0 : index
    %c0_19 = arith.constant 0 : index
    %c0_20 = arith.constant 0 : index
    %19 = vector.load %arg5[%c0_18, %c0_19, %c0_20] : memref<5x64x64xf32, #tpu.memory_space<vmem>>, vector<1x64x64xf32>
    %20 = vector.shape_cast %19 : vector<1x64x64xf32> to vector<64x64xf32>
    %cst_21 = arith.constant dense<0.000000e+00> : vector<25x64xf32>
    %21 = tpu.matmul %18, %20, %cst_21 {dimension_numbers = #tpu.dot_dimension_numbers<[1], [0], [0], [1], [0, 0, 1, 1], [], []>} : vector<25x64xf32>, vector<64x64xf32>, vector<25x64xf32> -> vector<25x64xf32>
    %c1_22 = arith.constant 1 : index
    %c0_23 = arith.constant 0 : index
    %22 = vector.load %arg28[%c1_22, %c0_23] : memref<29x64xf32, #tpu.memory_space<vmem>>, vector<25x64xf32>
    %c1_24 = arith.constant 1 : index
    %c0_25 = arith.constant 0 : index
    %c0_26 = arith.constant 0 : index
    %23 = vector.load %arg5[%c1_24, %c0_25, %c0_26] : memref<5x64x64xf32, #tpu.memory_space<vmem>>, vector<1x64x64xf32>
    %24 = vector.shape_cast %23 : vector<1x64x64xf32> to vector<64x64xf32>
    %cst_27 = arith.constant dense<0.000000e+00> : vector<25x64xf32>
    %25 = tpu.matmul %22, %24, %cst_27 {dimension_numbers = #tpu.dot_dimension_numbers<[1], [0], [0], [1], [0, 0, 1, 1], [], []>} : vector<25x64xf32>, vector<64x64xf32>, vector<25x64xf32> -> vector<25x64xf32>
    %26 = arith.addf %21, %25 : vector<25x64xf32>
    %c2_28 = arith.constant 2 : index
    %c0_29 = arith.constant 0 : index
    %27 = vector.load %arg28[%c2_28, %c0_29] : memref<29x64xf32, #tpu.memory_space<vmem>>, vector<25x64xf32>
    %c2_30 = arith.constant 2 : index
    %c0_31 = arith.constant 0 : index
    %c0_32 = arith.constant 0 : index
    %28 = vector.load %arg5[%c2_30, %c0_31, %c0_32] : memref<5x64x64xf32, #tpu.memory_space<vmem>>, vector<1x64x64xf32>
    %29 = vector.shape_cast %28 : vector<1x64x64xf32> to vector<64x64xf32>
    %cst_33 = arith.constant dense<0.000000e+00> : vector<25x64xf32>
    %30 = tpu.matmul %27, %29, %cst_33 {dimension_numbers = #tpu.dot_dimension_numbers<[1], [0], [0], [1], [0, 0, 1, 1], [], []>} : vector<25x64xf32>, vector<64x64xf32>, vector<25x64xf32> -> vector<25x64xf32>
    %31 = arith.addf %26, %30 : vector<25x64xf32>
    %c3_34 = arith.constant 3 : index
    %c0_35 = arith.constant 0 : index
    %32 = vector.load %arg28[%c3_34, %c0_35] : memref<29x64xf32, #tpu.memory_space<vmem>>, vector<25x64xf32>
    %c3_36 = arith.constant 3 : index
    %c0_37 = arith.constant 0 : index
    %c0_38 = arith.constant 0 : index
    %33 = vector.load %arg5[%c3_36, %c0_37, %c0_38] : memref<5x64x64xf32, #tpu.memory_space<vmem>>, vector<1x64x64xf32>
    %34 = vector.shape_cast %33 : vector<1x64x64xf32> to vector<64x64xf32>
    %cst_39 = arith.constant dense<0.000000e+00> : vector<25x64xf32>
    %35 = tpu.matmul %32, %34, %cst_39 {dimension_numbers = #tpu.dot_dimension_numbers<[1], [0], [0], [1], [0, 0, 1, 1], [], []>} : vector<25x64xf32>, vector<64x64xf32>, vector<25x64xf32> -> vector<25x64xf32>
    %36 = arith.addf %31, %35 : vector<25x64xf32>
    %c4 = arith.constant 4 : index
    %c0_40 = arith.constant 0 : index
    %37 = vector.load %arg28[%c4, %c0_40] : memref<29x64xf32, #tpu.memory_space<vmem>>, vector<25x64xf32>
    %c4_41 = arith.constant 4 : index
    %c0_42 = arith.constant 0 : index
    %c0_43 = arith.constant 0 : index
    %38 = vector.load %arg5[%c4_41, %c0_42, %c0_43] : memref<5x64x64xf32, #tpu.memory_space<vmem>>, vector<1x64x64xf32>
    %39 = vector.shape_cast %38 : vector<1x64x64xf32> to vector<64x64xf32>
    %cst_44 = arith.constant dense<0.000000e+00> : vector<25x64xf32>
    %40 = tpu.matmul %37, %39, %cst_44 {dimension_numbers = #tpu.dot_dimension_numbers<[1], [0], [0], [1], [0, 0, 1, 1], [], []>} : vector<25x64xf32>, vector<64x64xf32>, vector<25x64xf32> -> vector<25x64xf32>
    %41 = arith.addf %36, %40 : vector<25x64xf32>
    %c0_45 = arith.constant 0 : index
    %c0_46 = arith.constant 0 : index
    %42 = vector.load %arg6[%c0_45, %c0_46] : memref<1x64xf32, #tpu.memory_space<vmem>>, vector<1x64xf32>
    %43 = vector.broadcast %42 : vector<1x64xf32> to vector<25x64xf32>
    %44 = arith.addf %41, %43 : vector<25x64xf32>
    %cst_47 = arith.constant 0.000000e+00 : f32
    %45 = vector.broadcast %cst_47 : f32 to vector<25x64xf32>
    %46 = arith.maximumf %44, %45 : vector<25x64xf32>
    %c0_48 = arith.constant 0 : index
    %c0_49 = arith.constant 0 : index
    %47 = vector.load %arg26[%c0_48, %c0_49] : memref<25x64xf32, #tpu.memory_space<vmem>>, vector<25x64xf32>
    tpu.vector_store %arg26[%c0_48, %c0_49], %46 {strides = array<i32>} : memref<25x64xf32, #tpu.memory_space<vmem>>, vector<25x64xf32>,
    %c0_50 = arith.constant 0 : index
    %c0_51 = arith.constant 0 : index
    %48 = tpu.strided_load %arg26[%c0_50, %c0_51] {strides = array<i32: 4, 1>} : memref<25x64xf32, #tpu.memory_space<vmem>>, vector<6x64xf32>
    %c1_52 = arith.constant 1 : index
    %c0_53 = arith.constant 0 : index
    %49 = tpu.strided_load %arg26[%c1_52, %c0_53] {strides = array<i32: 4, 1>} : memref<25x64xf32, #tpu.memory_space<vmem>>, vector<6x64xf32>
    %50 = arith.maximumf %48, %49 : vector<6x64xf32>
    %c2_54 = arith.constant 2 : index
    %c0_55 = arith.constant 0 : index
    %51 = tpu.strided_load %arg26[%c2_54, %c0_55] {strides = array<i32: 4, 1>} : memref<25x64xf32, #tpu.memory_space<vmem>>, vector<6x64xf32>
    %52 = arith.maximumf %50, %51 : vector<6x64xf32>
    %c3_56 = arith.constant 3 : index
    %c0_57 = arith.constant 0 : index
    %53 = tpu.strided_load %arg26[%c3_56, %c0_57] {strides = array<i32: 4, 1>} : memref<25x64xf32, #tpu.memory_space<vmem>>, vector<6x64xf32>
    %54 = arith.maximumf %52, %53 : vector<6x64xf32>
    %c0_58 = arith.constant 0 : index
    %c0_59 = arith.constant 0 : index
    %55 = vector.load %arg29[%c0_58, %c0_59] : memref<6x64xf32, #tpu.memory_space<vmem>>, vector<6x64xf32>
    tpu.vector_store %arg29[%c0_58, %c0_59], %54 {strides = array<i32>} : memref<6x64xf32, #tpu.memory_space<vmem>>, vector<6x64xf32>,
    %c0_60 = arith.constant 0 : index
    %c0_61 = arith.constant 0 : index
    %56 = vector.load %arg29[%c0_60, %c0_61] : memref<6x64xf32, #tpu.memory_space<vmem>>, vector<4x64xf32>
    %c0_62 = arith.constant 0 : index
    %c0_63 = arith.constant 0 : index
    %c0_64 = arith.constant 0 : index
    %57 = vector.load %arg7[%c0_62, %c0_63, %c0_64] : memref<3x64x64xf32, #tpu.memory_space<vmem>>, vector<1x64x64xf32>
    %58 = vector.shape_cast %57 : vector<1x64x64xf32> to vector<64x64xf32>
    %cst_65 = arith.constant dense<0.000000e+00> : vector<4x64xf32>
    %59 = tpu.matmul %56, %58, %cst_65 {dimension_numbers = #tpu.dot_dimension_numbers<[1], [0], [0], [1], [0, 0, 1, 1], [], []>} : vector<4x64xf32>, vector<64x64xf32>, vector<4x64xf32> -> vector<4x64xf32>
    %c1_66 = arith.constant 1 : index
    %c0_67 = arith.constant 0 : index
    %60 = vector.load %arg29[%c1_66, %c0_67] : memref<6x64xf32, #tpu.memory_space<vmem>>, vector<4x64xf32>
    %c1_68 = arith.constant 1 : index
    %c0_69 = arith.constant 0 : index
    %c0_70 = arith.constant 0 : index
    %61 = vector.load %arg7[%c1_68, %c0_69, %c0_70] : memref<3x64x64xf32, #tpu.memory_space<vmem>>, vector<1x64x64xf32>
    %62 = vector.shape_cast %61 : vector<1x64x64xf32> to vector<64x64xf32>
    %cst_71 = arith.constant dense<0.000000e+00> : vector<4x64xf32>
    %63 = tpu.matmul %60, %62, %cst_71 {dimension_numbers = #tpu.dot_dimension_numbers<[1], [0], [0], [1], [0, 0, 1, 1], [], []>} : vector<4x64xf32>, vector<64x64xf32>, vector<4x64xf32> -> vector<4x64xf32>
    %64 = arith.addf %59, %63 : vector<4x64xf32>
    %c2_72 = arith.constant 2 : index
    %c0_73 = arith.constant 0 : index
    %65 = vector.load %arg29[%c2_72, %c0_73] : memref<6x64xf32, #tpu.memory_space<vmem>>, vector<4x64xf32>
    %c2_74 = arith.constant 2 : index
    %c0_75 = arith.constant 0 : index
    %c0_76 = arith.constant 0 : index
    %66 = vector.load %arg7[%c2_74, %c0_75, %c0_76] : memref<3x64x64xf32, #tpu.memory_space<vmem>>, vector<1x64x64xf32>
    %67 = vector.shape_cast %66 : vector<1x64x64xf32> to vector<64x64xf32>
    %cst_77 = arith.constant dense<0.000000e+00> : vector<4x64xf32>
    %68 = tpu.matmul %65, %67, %cst_77 {dimension_numbers = #tpu.dot_dimension_numbers<[1], [0], [0], [1], [0, 0, 1, 1], [], []>} : vector<4x64xf32>, vector<64x64xf32>, vector<4x64xf32> -> vector<4x64xf32>
    %69 = arith.addf %64, %68 : vector<4x64xf32>
    %c0_78 = arith.constant 0 : index
    %c0_79 = arith.constant 0 : index
    %70 = vector.load %arg8[%c0_78, %c0_79] : memref<1x64xf32, #tpu.memory_space<vmem>>, vector<1x64xf32>
    %71 = vector.broadcast %70 : vector<1x64xf32> to vector<4x64xf32>
    %72 = arith.addf %69, %71 : vector<4x64xf32>
    %cst_80 = arith.constant 0.000000e+00 : f32
    %73 = vector.broadcast %cst_80 : f32 to vector<4x64xf32>
    %74 = arith.maximumf %72, %73 : vector<4x64xf32>
    %c0_81 = arith.constant 0 : index
    %c0_82 = arith.constant 0 : index
    %75 = vector.load %arg27[%c0_81, %c0_82] : memref<4x64xf32, #tpu.memory_space<vmem>>, vector<4x64xf32>
    tpu.vector_store %arg27[%c0_81, %c0_82], %74 {strides = array<i32>} : memref<4x64xf32, #tpu.memory_space<vmem>>, vector<4x64xf32>,
    %c0_83 = arith.constant 0 : index
    %c0_84 = arith.constant 0 : index
    %76 = tpu.strided_load %arg27[%c0_83, %c0_84] {strides = array<i32: 2, 1>} : memref<4x64xf32, #tpu.memory_space<vmem>>, vector<2x64xf32>
    %c1_85 = arith.constant 1 : index
    %c0_86 = arith.constant 0 : index
    %77 = tpu.strided_load %arg27[%c1_85, %c0_86] {strides = array<i32: 2, 1>} : memref<4x64xf32, #tpu.memory_space<vmem>>, vector<2x64xf32>
    %78 = arith.maximumf %76, %77 : vector<2x64xf32>
    %cst_87 = arith.constant dense<0.000000e+00> : vector<64xf32>
    %79 = vector.multi_reduction <add>, %78, %cst_87 [0] : vector<2x64xf32> to vector<64xf32>
    %80 = vector.shape_cast %79 : vector<64xf32> to vector<1x64xf32>
    %cst_88 = arith.constant 2.000000e+00 : f32
    %81 = vector.broadcast %cst_88 : f32 to vector<1x64xf32>
    %82 = arith.divf %80, %81 : vector<1x64xf32>
    %83 = vector.broadcast %82 : vector<1x64xf32> to vector<2x64xf32>
    %84 = arith.addf %83, %78 : vector<2x64xf32>
    %c0_89 = arith.constant 0 : index
    %c0_90 = arith.constant 0 : index
    %85 = vector.load %arg13[%c0_89, %c0_90] : memref<1x64xf32, #tpu.memory_space<vmem>>, vector<1x64xf32>
    %86 = vector.broadcast %85 : vector<1x64xf32> to vector<2x64xf32>
    %87 = arith.mulf %84, %86 : vector<2x64xf32>
    %c0_91 = arith.constant 0 : index
    %c0_92 = arith.constant 0 : index
    %88 = vector.load %arg14[%c0_91, %c0_92] : memref<1x64xf32, #tpu.memory_space<vmem>>, vector<1x64xf32>
    %89 = vector.broadcast %88 : vector<1x64xf32> to vector<2x64xf32>
    %90 = arith.addf %87, %89 : vector<2x64xf32>
    %cst_93 = arith.constant 0.000000e+00 : f32
    %91 = vector.broadcast %cst_93 : f32 to vector<2x64xf32>
    %92 = arith.maximumf %90, %91 : vector<2x64xf32>
    %cst_94 = arith.constant 0.000000e+00 : f32
    %93 = vector.broadcast %cst_94 : f32 to vector<1x64xf32>
    %c0_95 = arith.constant 0 : index
    %c0_96 = arith.constant 0 : index
    %94 = vector.load %arg30[%c0_95, %c0_96] : memref<4x64xf32, #tpu.memory_space<vmem>>, vector<1x64xf32>
    tpu.vector_store %arg30[%c0_95, %c0_96], %93 {strides = array<i32>} : memref<4x64xf32, #tpu.memory_space<vmem>>, vector<1x64xf32>,
    %c3_97 = arith.constant 3 : index
    %c0_98 = arith.constant 0 : index
    %95 = vector.load %arg30[%c3_97, %c0_98] : memref<4x64xf32, #tpu.memory_space<vmem>>, vector<1x64xf32>
    tpu.vector_store %arg30[%c3_97, %c0_98], %93 {strides = array<i32>} : memref<4x64xf32, #tpu.memory_space<vmem>>, vector<1x64xf32>,
    %c1_99 = arith.constant 1 : index
    %c0_100 = arith.constant 0 : index
    %96 = vector.load %arg30[%c1_99, %c0_100] : memref<4x64xf32, #tpu.memory_space<vmem>>, vector<2x64xf32>
    tpu.vector_store %arg30[%c1_99, %c0_100], %92 {strides = array<i32>} : memref<4x64xf32, #tpu.memory_space<vmem>>, vector<2x64xf32>,
    %c0_101 = arith.constant 0 : index
    %c0_102 = arith.constant 0 : index
    %97 = vector.load %arg30[%c0_101, %c0_102] : memref<4x64xf32, #tpu.memory_space<vmem>>, vector<2x64xf32>
    %c0_103 = arith.constant 0 : index
    %c0_104 = arith.constant 0 : index
    %c0_105 = arith.constant 0 : index
    %98 = vector.load %arg12[%c0_103, %c0_104, %c0_105] : memref<3x64x64xf32, #tpu.memory_space<vmem>>, vector<1x64x64xf32>
    %99 = vector.shape_cast %98 : vector<1x64x64xf32> to vector<64x64xf32>
    %cst_106 = arith.constant dense<0.000000e+00> : vector<2x64xf32>
    %100 = tpu.matmul %97, %99, %cst_106 {dimension_numbers = #tpu.dot_dimension_numbers<[1], [0], [0], [1], [0, 0, 1, 1], [], []>} : vector<2x64xf32>, vector<64x64xf32>, vector<2x64xf32> -> vector<2x64xf32>
    %c1_107 = arith.constant 1 : index
    %c0_108 = arith.constant 0 : index
    %101 = vector.load %arg30[%c1_107, %c0_108] : memref<4x64xf32, #tpu.memory_space<vmem>>, vector<2x64xf32>
    %c1_109 = arith.constant 1 : index
    %c0_110 = arith.constant 0 : index
    %c0_111 = arith.constant 0 : index
    %102 = vector.load %arg12[%c1_109, %c0_110, %c0_111] : memref<3x64x64xf32, #tpu.memory_space<vmem>>, vector<1x64x64xf32>
    %103 = vector.shape_cast %102 : vector<1x64x64xf32> to vector<64x64xf32>
    %cst_112 = arith.constant dense<0.000000e+00> : vector<2x64xf32>
    %104 = tpu.matmul %101, %103, %cst_112 {dimension_numbers = #tpu.dot_dimension_numbers<[1], [0], [0], [1], [0, 0, 1, 1], [], []>} : vector<2x64xf32>, vector<64x64xf32>, vector<2x64xf32> -> vector<2x64xf32>
    %105 = arith.addf %100, %104 : vector<2x64xf32>
    %c2_113 = arith.constant 2 : index
    %c0_114 = arith.constant 0 : index
    %106 = vector.load %arg30[%c2_113, %c0_114] : memref<4x64xf32, #tpu.memory_space<vmem>>, vector<2x64xf32>
    %c2_115 = arith.constant 2 : index
    %c0_116 = arith.constant 0 : index
    %c0_117 = arith.constant 0 : index
    %107 = vector.load %arg12[%c2_115, %c0_116, %c0_117] : memref<3x64x64xf32, #tpu.memory_space<vmem>>, vector<1x64x64xf32>
    %108 = vector.shape_cast %107 : vector<1x64x64xf32> to vector<64x64xf32>
    %cst_118 = arith.constant dense<0.000000e+00> : vector<2x64xf32>
    %109 = tpu.matmul %106, %108, %cst_118 {dimension_numbers = #tpu.dot_dimension_numbers<[1], [0], [0], [1], [0, 0, 1, 1], [], []>} : vector<2x64xf32>, vector<64x64xf32>, vector<2x64xf32> -> vector<2x64xf32>
    %110 = arith.addf %105, %109 : vector<2x64xf32>
    %c0_119 = arith.constant 0 : index
    %c0_120 = arith.constant 0 : index
    %111 = vector.load %arg9[%c0_119, %c0_120] : memref<6x2xf32, #tpu.memory_space<vmem>>, vector<6x2xf32>
    %cst_121 = arith.constant dense<0.000000e+00> : vector<6x64xf32>
    %112 = tpu.matmul %111, %110, %cst_121 {dimension_numbers = #tpu.dot_dimension_numbers<[1], [0], [0], [1], [0, 0, 1, 1], [], []>} : vector<6x2xf32>, vector<2x64xf32>, vector<6x64xf32> -> vector<6x64xf32>
    %c0_122 = arith.constant 0 : index
    %c0_123 = arith.constant 0 : index
    %113 = vector.load %arg29[%c0_122, %c0_123] : memref<6x64xf32, #tpu.memory_space<vmem>>, vector<6x64xf32>
    %114 = arith.addf %112, %113 : vector<6x64xf32>
    %c0_124 = arith.constant 0 : index
    %c0_125 = arith.constant 0 : index
    %115 = vector.load %arg16[%c0_124, %c0_125] : memref<1x64xf32, #tpu.memory_space<vmem>>, vector<1x64xf32>
    %116 = vector.broadcast %115 : vector<1x64xf32> to vector<6x64xf32>
    %117 = arith.mulf %114, %116 : vector<6x64xf32>
    %c0_126 = arith.constant 0 : index
    %c0_127 = arith.constant 0 : index
    %118 = vector.load %arg17[%c0_126, %c0_127] : memref<1x64xf32, #tpu.memory_space<vmem>>, vector<1x64xf32>
    %119 = vector.broadcast %118 : vector<1x64xf32> to vector<6x64xf32>
    %120 = arith.addf %117, %119 : vector<6x64xf32>
    %cst_128 = arith.constant 0.000000e+00 : f32
    %121 = vector.broadcast %cst_128 : f32 to vector<6x64xf32>
    %122 = arith.maximumf %120, %121 : vector<6x64xf32>
    %cst_129 = arith.constant 0.000000e+00 : f32
    %123 = vector.broadcast %cst_129 : f32 to vector<1x64xf32>
    %c0_130 = arith.constant 0 : index
    %c0_131 = arith.constant 0 : index
    %124 = vector.load %arg31[%c0_130, %c0_131] : memref<8x64xf32, #tpu.memory_space<vmem>>, vector<1x64xf32>
    tpu.vector_store %arg31[%c0_130, %c0_131], %123 {strides = array<i32>} : memref<8x64xf32, #tpu.memory_space<vmem>>, vector<1x64xf32>,
    %c7 = arith.constant 7 : index
    %c0_132 = arith.constant 0 : index
    %125 = vector.load %arg31[%c7, %c0_132] : memref<8x64xf32, #tpu.memory_space<vmem>>, vector<1x64xf32>
    tpu.vector_store %arg31[%c7, %c0_132], %123 {strides = array<i32>} : memref<8x64xf32, #tpu.memory_space<vmem>>, vector<1x64xf32>,
    %c1_133 = arith.constant 1 : index
    %c0_134 = arith.constant 0 : index
    %126 = vector.load %arg31[%c1_133, %c0_134] : memref<8x64xf32, #tpu.memory_space<vmem>>, vector<6x64xf32>
    tpu.vector_store %arg31[%c1_133, %c0_134], %122 {strides = array<i32>} : memref<8x64xf32, #tpu.memory_space<vmem>>, vector<6x64xf32>,
    %c0_135 = arith.constant 0 : index
    %c0_136 = arith.constant 0 : index
    %127 = vector.load %arg31[%c0_135, %c0_136] : memref<8x64xf32, #tpu.memory_space<vmem>>, vector<6x64xf32>
    %c0_137 = arith.constant 0 : index
    %c0_138 = arith.constant 0 : index
    %c0_139 = arith.constant 0 : index
    %128 = vector.load %arg15[%c0_137, %c0_138, %c0_139] : memref<3x64x64xf32, #tpu.memory_space<vmem>>, vector<1x64x64xf32>
    %129 = vector.shape_cast %128 : vector<1x64x64xf32> to vector<64x64xf32>
    %cst_140 = arith.constant dense<0.000000e+00> : vector<6x64xf32>
    %130 = tpu.matmul %127, %129, %cst_140 {dimension_numbers = #tpu.dot_dimension_numbers<[1], [0], [0], [1], [0, 0, 1, 1], [], []>} : vector<6x64xf32>, vector<64x64xf32>, vector<6x64xf32> -> vector<6x64xf32>
    %c1_141 = arith.constant 1 : index
    %c0_142 = arith.constant 0 : index
    %131 = vector.load %arg31[%c1_141, %c0_142] : memref<8x64xf32, #tpu.memory_space<vmem>>, vector<6x64xf32>
    %c1_143 = arith.constant 1 : index
    %c0_144 = arith.constant 0 : index
    %c0_145 = arith.constant 0 : index
    %132 = vector.load %arg15[%c1_143, %c0_144, %c0_145] : memref<3x64x64xf32, #tpu.memory_space<vmem>>, vector<1x64x64xf32>
    %133 = vector.shape_cast %132 : vector<1x64x64xf32> to vector<64x64xf32>
    %cst_146 = arith.constant dense<0.000000e+00> : vector<6x64xf32>
    %134 = tpu.matmul %131, %133, %cst_146 {dimension_numbers = #tpu.dot_dimension_numbers<[1], [0], [0], [1], [0, 0, 1, 1], [], []>} : vector<6x64xf32>, vector<64x64xf32>, vector<6x64xf32> -> vector<6x64xf32>
    %135 = arith.addf %130, %134 : vector<6x64xf32>
    %c2_147 = arith.constant 2 : index
    %c0_148 = arith.constant 0 : index
    %136 = vector.load %arg31[%c2_147, %c0_148] : memref<8x64xf32, #tpu.memory_space<vmem>>, vector<6x64xf32>
    %c2_149 = arith.constant 2 : index
    %c0_150 = arith.constant 0 : index
    %c0_151 = arith.constant 0 : index
    %137 = vector.load %arg15[%c2_149, %c0_150, %c0_151] : memref<3x64x64xf32, #tpu.memory_space<vmem>>, vector<1x64x64xf32>
    %138 = vector.shape_cast %137 : vector<1x64x64xf32> to vector<64x64xf32>
    %cst_152 = arith.constant dense<0.000000e+00> : vector<6x64xf32>
    %139 = tpu.matmul %136, %138, %cst_152 {dimension_numbers = #tpu.dot_dimension_numbers<[1], [0], [0], [1], [0, 0, 1, 1], [], []>} : vector<6x64xf32>, vector<64x64xf32>, vector<6x64xf32> -> vector<6x64xf32>
    %140 = arith.addf %135, %139 : vector<6x64xf32>
    %c0_153 = arith.constant 0 : index
    %c0_154 = arith.constant 0 : index
    %141 = vector.load %arg10[%c0_153, %c0_154] : memref<29x6xf32, #tpu.memory_space<vmem>>, vector<29x6xf32>
    %cst_155 = arith.constant dense<0.000000e+00> : vector<29x64xf32>
    %142 = tpu.matmul %141, %140, %cst_155 {dimension_numbers = #tpu.dot_dimension_numbers<[1], [0], [0], [1], [0, 0, 1, 1], [], []>} : vector<29x6xf32>, vector<6x64xf32>, vector<29x64xf32> -> vector<29x64xf32>
    %c0_156 = arith.constant 0 : index
    %c0_157 = arith.constant 0 : index
    %143 = vector.load %arg28[%c0_156, %c0_157] : memref<29x64xf32, #tpu.memory_space<vmem>>, vector<29x64xf32>
    %144 = arith.addf %142, %143 : vector<29x64xf32>
    %c0_158 = arith.constant 0 : index
    %c0_159 = arith.constant 0 : index
    %145 = vector.load %arg19[%c0_158, %c0_159] : memref<1x64xf32, #tpu.memory_space<vmem>>, vector<1x64xf32>
    %146 = vector.broadcast %145 : vector<1x64xf32> to vector<29x64xf32>
    %147 = arith.mulf %144, %146 : vector<29x64xf32>
    %c0_160 = arith.constant 0 : index
    %c0_161 = arith.constant 0 : index
    %148 = vector.load %arg20[%c0_160, %c0_161] : memref<1x64xf32, #tpu.memory_space<vmem>>, vector<1x64xf32>
    %149 = vector.broadcast %148 : vector<1x64xf32> to vector<29x64xf32>
    %150 = arith.addf %147, %149 : vector<29x64xf32>
    %cst_162 = arith.constant 0.000000e+00 : f32
    %151 = vector.broadcast %cst_162 : f32 to vector<29x64xf32>
    %152 = arith.maximumf %150, %151 : vector<29x64xf32>
    %cst_163 = arith.constant 0.000000e+00 : f32
    %153 = vector.broadcast %cst_163 : f32 to vector<1x64xf32>
    %c0_164 = arith.constant 0 : index
    %c0_165 = arith.constant 0 : index
    %154 = vector.load %arg32[%c0_164, %c0_165] : memref<31x64xf32, #tpu.memory_space<vmem>>, vector<1x64xf32>
    tpu.vector_store %arg32[%c0_164, %c0_165], %153 {strides = array<i32>} : memref<31x64xf32, #tpu.memory_space<vmem>>, vector<1x64xf32>,
    %c30 = arith.constant 30 : index
    %c0_166 = arith.constant 0 : index
    %155 = vector.load %arg32[%c30, %c0_166] : memref<31x64xf32, #tpu.memory_space<vmem>>, vector<1x64xf32>
    tpu.vector_store %arg32[%c30, %c0_166], %153 {strides = array<i32>} : memref<31x64xf32, #tpu.memory_space<vmem>>, vector<1x64xf32>,
    %c1_167 = arith.constant 1 : index
    %c0_168 = arith.constant 0 : index
    %156 = vector.load %arg32[%c1_167, %c0_168] : memref<31x64xf32, #tpu.memory_space<vmem>>, vector<29x64xf32>
    tpu.vector_store %arg32[%c1_167, %c0_168], %152 {strides = array<i32>} : memref<31x64xf32, #tpu.memory_space<vmem>>, vector<29x64xf32>,
    %c0_169 = arith.constant 0 : index
    %c0_170 = arith.constant 0 : index
    %157 = vector.load %arg32[%c0_169, %c0_170] : memref<31x64xf32, #tpu.memory_space<vmem>>, vector<29x64xf32>
    %c0_171 = arith.constant 0 : index
    %c0_172 = arith.constant 0 : index
    %c0_173 = arith.constant 0 : index
    %158 = vector.load %arg18[%c0_171, %c0_172, %c0_173] : memref<3x64x4xf32, #tpu.memory_space<vmem>>, vector<1x64x4xf32>
    %159 = vector.shape_cast %158 : vector<1x64x4xf32> to vector<64x4xf32>
    %cst_174 = arith.constant dense<0.000000e+00> : vector<29x4xf32>
    %160 = tpu.matmul %157, %159, %cst_174 {dimension_numbers = #tpu.dot_dimension_numbers<[1], [0], [0], [1], [0, 0, 1, 1], [], []>} : vector<29x64xf32>, vector<64x4xf32>, vector<29x4xf32> -> vector<29x4xf32>
    %c1_175 = arith.constant 1 : index
    %c0_176 = arith.constant 0 : index
    %161 = vector.load %arg32[%c1_175, %c0_176] : memref<31x64xf32, #tpu.memory_space<vmem>>, vector<29x64xf32>
    %c1_177 = arith.constant 1 : index
    %c0_178 = arith.constant 0 : index
    %c0_179 = arith.constant 0 : index
    %162 = vector.load %arg18[%c1_177, %c0_178, %c0_179] : memref<3x64x4xf32, #tpu.memory_space<vmem>>, vector<1x64x4xf32>
    %163 = vector.shape_cast %162 : vector<1x64x4xf32> to vector<64x4xf32>
    %cst_180 = arith.constant dense<0.000000e+00> : vector<29x4xf32>
    %164 = tpu.matmul %161, %163, %cst_180 {dimension_numbers = #tpu.dot_dimension_numbers<[1], [0], [0], [1], [0, 0, 1, 1], [], []>} : vector<29x64xf32>, vector<64x4xf32>, vector<29x4xf32> -> vector<29x4xf32>
    %165 = arith.addf %160, %164 : vector<29x4xf32>
    %c2_181 = arith.constant 2 : index
    %c0_182 = arith.constant 0 : index
    %166 = vector.load %arg32[%c2_181, %c0_182] : memref<31x64xf32, #tpu.memory_space<vmem>>, vector<29x64xf32>
    %c2_183 = arith.constant 2 : index
    %c0_184 = arith.constant 0 : index
    %c0_185 = arith.constant 0 : index
    %167 = vector.load %arg18[%c2_183, %c0_184, %c0_185] : memref<3x64x4xf32, #tpu.memory_space<vmem>>, vector<1x64x4xf32>
    %168 = vector.shape_cast %167 : vector<1x64x4xf32> to vector<64x4xf32>
    %cst_186 = arith.constant dense<0.000000e+00> : vector<29x4xf32>
    %169 = tpu.matmul %166, %168, %cst_186 {dimension_numbers = #tpu.dot_dimension_numbers<[1], [0], [0], [1], [0, 0, 1, 1], [], []>} : vector<29x64xf32>, vector<64x4xf32>, vector<29x4xf32> -> vector<29x4xf32>
    %170 = arith.addf %165, %169 : vector<29x4xf32>
    %c0_187 = arith.constant 0 : index
    %c0_188 = arith.constant 0 : index
    %171 = vector.load %arg11[%c0_187, %c0_188] : memref<128x29xf32, #tpu.memory_space<vmem>>, vector<128x29xf32>
    %cst_189 = arith.constant dense<0.000000e+00> : vector<128x4xf32>
    %172 = tpu.matmul %171, %170, %cst_189 {dimension_numbers = #tpu.dot_dimension_numbers<[1], [0], [0], [1], [0, 0, 1, 1], [], []>} : vector<128x29xf32>, vector<29x4xf32>, vector<128x4xf32> -> vector<128x4xf32>
    %c0_190 = arith.constant 0 : index
    %c0_191 = arith.constant 0 : index
    %c0_192 = arith.constant 0 : index
    %173 = vector.load %arg2[%c0_190, %c0_191, %c0_192] : memref<1x128x4xf32, #tpu.memory_space<vmem>>, vector<1x128x4xf32>
    %174 = vector.shape_cast %173 : vector<1x128x4xf32> to vector<128x4xf32>
    %175 = arith.addf %172, %174 : vector<128x4xf32>
    %c0_193 = arith.constant 0 : index
    %c0_194 = arith.constant 0 : index
    %176 = vector.load %arg22[%c0_193, %c0_194] : memref<1x4xf32, #tpu.memory_space<vmem>>, vector<1x4xf32>
    %177 = vector.broadcast %176 : vector<1x4xf32> to vector<128x4xf32>
    %178 = arith.mulf %175, %177 : vector<128x4xf32>
    %c0_195 = arith.constant 0 : index
    %c0_196 = arith.constant 0 : index
    %179 = vector.load %arg23[%c0_195, %c0_196] : memref<1x4xf32, #tpu.memory_space<vmem>>, vector<1x4xf32>
    %180 = vector.broadcast %179 : vector<1x4xf32> to vector<128x4xf32>
    %181 = arith.addf %178, %180 : vector<128x4xf32>
    %cst_197 = arith.constant 0.000000e+00 : f32
    %182 = vector.broadcast %cst_197 : f32 to vector<128x4xf32>
    %183 = arith.maximumf %181, %182 : vector<128x4xf32>
    %cst_198 = arith.constant 0.000000e+00 : f32
    %184 = vector.broadcast %cst_198 : f32 to vector<1x4xf32>
    %c0_199 = arith.constant 0 : index
    %c0_200 = arith.constant 0 : index
    %185 = vector.load %arg33[%c0_199, %c0_200] : memref<130x4xf32, #tpu.memory_space<vmem>>, vector<1x4xf32>
    tpu.vector_store %arg33[%c0_199, %c0_200], %184 {strides = array<i32>} : memref<130x4xf32, #tpu.memory_space<vmem>>, vector<1x4xf32>,
    %c129 = arith.constant 129 : index
    %c0_201 = arith.constant 0 : index
    %186 = vector.load %arg33[%c129, %c0_201] : memref<130x4xf32, #tpu.memory_space<vmem>>, vector<1x4xf32>
    tpu.vector_store %arg33[%c129, %c0_201], %184 {strides = array<i32>} : memref<130x4xf32, #tpu.memory_space<vmem>>, vector<1x4xf32>,
    %c1_202 = arith.constant 1 : index
    %c0_203 = arith.constant 0 : index
    %187 = vector.load %arg33[%c1_202, %c0_203] : memref<130x4xf32, #tpu.memory_space<vmem>>, vector<128x4xf32>
    tpu.vector_store %arg33[%c1_202, %c0_203], %183 {strides = array<i32>} : memref<130x4xf32, #tpu.memory_space<vmem>>, vector<128x4xf32>,
    %c0_204 = arith.constant 0 : index
    %c0_205 = arith.constant 0 : index
    %188 = vector.load %arg33[%c0_204, %c0_205] : memref<130x4xf32, #tpu.memory_space<vmem>>, vector<128x4xf32>
    %c0_206 = arith.constant 0 : index
    %c0_207 = arith.constant 0 : index
    %c0_208 = arith.constant 0 : index
    %189 = vector.load %arg21[%c0_206, %c0_207, %c0_208] : memref<3x4x1xf32, #tpu.memory_space<vmem>>, vector<1x4x1xf32>
    %190 = vector.shape_cast %189 : vector<1x4x1xf32> to vector<4x1xf32>
    %cst_209 = arith.constant dense<0.000000e+00> : vector<128x1xf32>
    %191 = tpu.matmul %188, %190, %cst_209 {dimension_numbers = #tpu.dot_dimension_numbers<[1], [0], [0], [1], [0, 0, 1, 1], [], []>} : vector<128x4xf32>, vector<4x1xf32>, vector<128x1xf32> -> vector<128x1xf32>
    %c1_210 = arith.constant 1 : index
    %c0_211 = arith.constant 0 : index
    %192 = vector.load %arg33[%c1_210, %c0_211] : memref<130x4xf32, #tpu.memory_space<vmem>>, vector<128x4xf32>
    %c1_212 = arith.constant 1 : index
    %c0_213 = arith.constant 0 : index
    %c0_214 = arith.constant 0 : index
    %193 = vector.load %arg21[%c1_212, %c0_213, %c0_214] : memref<3x4x1xf32, #tpu.memory_space<vmem>>, vector<1x4x1xf32>
    %194 = vector.shape_cast %193 : vector<1x4x1xf32> to vector<4x1xf32>
    %cst_215 = arith.constant dense<0.000000e+00> : vector<128x1xf32>
    %195 = tpu.matmul %192, %194, %cst_215 {dimension_numbers = #tpu.dot_dimension_numbers<[1], [0], [0], [1], [0, 0, 1, 1], [], []>} : vector<128x4xf32>, vector<4x1xf32>, vector<128x1xf32> -> vector<128x1xf32>
    %196 = arith.addf %191, %195 : vector<128x1xf32>
    %c2_216 = arith.constant 2 : index
    %c0_217 = arith.constant 0 : index
    %197 = vector.load %arg33[%c2_216, %c0_217] : memref<130x4xf32, #tpu.memory_space<vmem>>, vector<128x4xf32>
    %c2_218 = arith.constant 2 : index
    %c0_219 = arith.constant 0 : index
    %c0_220 = arith.constant 0 : index
    %198 = vector.load %arg21[%c2_218, %c0_219, %c0_220] : memref<3x4x1xf32, #tpu.memory_space<vmem>>, vector<1x4x1xf32>
    %199 = vector.shape_cast %198 : vector<1x4x1xf32> to vector<4x1xf32>
    %cst_221 = arith.constant dense<0.000000e+00> : vector<128x1xf32>
    %200 = tpu.matmul %197, %199, %cst_221 {dimension_numbers = #tpu.dot_dimension_numbers<[1], [0], [0], [1], [0, 0, 1, 1], [], []>} : vector<128x4xf32>, vector<4x1xf32>, vector<128x1xf32> -> vector<128x1xf32>
    %201 = arith.addf %196, %200 : vector<128x1xf32>
    %202 = arith.negf %201 : vector<128x1xf32>
    %203 = math.exp %202 : vector<128x1xf32>
    %cst_222 = arith.constant 1.000000e+00 : f32
    %204 = vector.broadcast %cst_222 : f32 to vector<128x1xf32>
    %205 = arith.addf %204, %203 : vector<128x1xf32>
    %206 = arith.divf %204, %205 : vector<128x1xf32>
    %c0_223 = arith.constant 0 : index
    %c0_224 = arith.constant 0 : index
    %c0_225 = arith.constant 0 : index
    %207 = vector.load %arg24[%c0_223, %c0_224, %c0_225] : memref<1x128x1xf32, #tpu.memory_space<vmem>>, vector<1x128x1xf32>
    %208 = vector.shape_cast %207 : vector<1x128x1xf32> to vector<128x1xf32>
    %209 = vector.shape_cast %206 : vector<128x1xf32> to vector<1x128x1xf32>
    tpu.vector_store %arg24[%c0_223, %c0_224, %c0_225], %209 {strides = array<i32>} : memref<1x128x1xf32, #tpu.memory_space<vmem>>, vector<1x128x1xf32>,
    return
  }
  func.func @transform_0(%arg0: i32) -> (i32, i32, i32) {
    %c0_i32 = arith.constant 0 : i32
    %c0_i32_0 = arith.constant 0 : i32
    %c0_i32_1 = arith.constant 0 : i32
    return %arg0, %c0_i32, %c0_i32_0 : i32, i32, i32
  }
  func.func @transform_1(%arg0: i32) -> (i32, i32, i32) {
    %c0_i32 = arith.constant 0 : i32
    %c0_i32_0 = arith.constant 0 : i32
    %c0_i32_1 = arith.constant 0 : i32
    return %arg0, %c0_i32, %c0_i32_0 : i32, i32, i32
  }
  func.func @transform_2(%arg0: i32) -> (i32, i32) {
    %c0_i32 = arith.constant 0 : i32
    %c0_i32_0 = arith.constant 0 : i32
    %c0_i32_1 = arith.constant 0 : i32
    return %c0_i32, %c0_i32_0 : i32, i32
  }
  func.func @transform_3(%arg0: i32) -> (i32, i32) {
    %c0_i32 = arith.constant 0 : i32
    %c0_i32_0 = arith.constant 0 : i32
    %c0_i32_1 = arith.constant 0 : i32
    return %c0_i32, %c0_i32_0 : i32, i32
  }
  func.func @transform_4(%arg0: i32) -> (i32, i32, i32) {
    %c0_i32 = arith.constant 0 : i32
    %c0_i32_0 = arith.constant 0 : i32
    %c0_i32_1 = arith.constant 0 : i32
    %c0_i32_2 = arith.constant 0 : i32
    return %c0_i32, %c0_i32_0, %c0_i32_1 : i32, i32, i32
  }
  func.func @transform_5(%arg0: i32) -> (i32, i32) {
    %c0_i32 = arith.constant 0 : i32
    %c0_i32_0 = arith.constant 0 : i32
    %c0_i32_1 = arith.constant 0 : i32
    return %c0_i32, %c0_i32_0 : i32, i32
  }
  func.func @transform_6(%arg0: i32) -> (i32, i32, i32) {
    %c0_i32 = arith.constant 0 : i32
    %c0_i32_0 = arith.constant 0 : i32
    %c0_i32_1 = arith.constant 0 : i32
    %c0_i32_2 = arith.constant 0 : i32
    return %c0_i32, %c0_i32_0, %c0_i32_1 : i32, i32, i32
  }
  func.func @transform_7(%arg0: i32) -> (i32, i32) {
    %c0_i32 = arith.constant 0 : i32
    %c0_i32_0 = arith.constant 0 : i32
    %c0_i32_1 = arith.constant 0 : i32
    return %c0_i32, %c0_i32_0 : i32, i32
  }
  func.func @transform_8(%arg0: i32) -> (i32, i32) {
    %c0_i32 = arith.constant 0 : i32
    %c0_i32_0 = arith.constant 0 : i32
    %c0_i32_1 = arith.constant 0 : i32
    return %c0_i32, %c0_i32_0 : i32, i32
  }
  func.func @transform_9(%arg0: i32) -> (i32, i32) {
    %c0_i32 = arith.constant 0 : i32
    %c0_i32_0 = arith.constant 0 : i32
    %c0_i32_1 = arith.constant 0 : i32
    return %c0_i32, %c0_i32_0 : i32, i32
  }
  func.func @transform_10(%arg0: i32) -> (i32, i32) {
    %c0_i32 = arith.constant 0 : i32
    %c0_i32_0 = arith.constant 0 : i32
    %c0_i32_1 = arith.constant 0 : i32
    return %c0_i32, %c0_i32_0 : i32, i32
  }
  func.func @transform_11(%arg0: i32) -> (i32, i32, i32) {
    %c0_i32 = arith.constant 0 : i32
    %c0_i32_0 = arith.constant 0 : i32
    %c0_i32_1 = arith.constant 0 : i32
    %c0_i32_2 = arith.constant 0 : i32
    return %c0_i32, %c0_i32_0, %c0_i32_1 : i32, i32, i32
  }
  func.func @transform_12(%arg0: i32) -> (i32, i32) {
    %c0_i32 = arith.constant 0 : i32
    %c0_i32_0 = arith.constant 0 : i32
    %c0_i32_1 = arith.constant 0 : i32
    return %c0_i32, %c0_i32_0 : i32, i32
  }
  func.func @transform_13(%arg0: i32) -> (i32, i32) {
    %c0_i32 = arith.constant 0 : i32
    %c0_i32_0 = arith.constant 0 : i32
    %c0_i32_1 = arith.constant 0 : i32
    return %c0_i32, %c0_i32_0 : i32, i32
  }
  func.func @transform_14(%arg0: i32) -> (i32, i32, i32) {
    %c0_i32 = arith.constant 0 : i32
    %c0_i32_0 = arith.constant 0 : i32
    %c0_i32_1 = arith.constant 0 : i32
    %c0_i32_2 = arith.constant 0 : i32
    return %c0_i32, %c0_i32_0, %c0_i32_1 : i32, i32, i32
  }
  func.func @transform_15(%arg0: i32) -> (i32, i32) {
    %c0_i32 = arith.constant 0 : i32
    %c0_i32_0 = arith.constant 0 : i32
    %c0_i32_1 = arith.constant 0 : i32
    return %c0_i32, %c0_i32_0 : i32, i32
  }
  func.func @transform_16(%arg0: i32) -> (i32, i32) {
    %c0_i32 = arith.constant 0 : i32
    %c0_i32_0 = arith.constant 0 : i32
    %c0_i32_1 = arith.constant 0 : i32
    return %c0_i32, %c0_i32_0 : i32, i32
  }
  func.func @transform_17(%arg0: i32) -> (i32, i32, i32) {
    %c0_i32 = arith.constant 0 : i32
    %c0_i32_0 = arith.constant 0 : i32
    %c0_i32_1 = arith.constant 0 : i32
    %c0_i32_2 = arith.constant 0 : i32
    return %c0_i32, %c0_i32_0, %c0_i32_1 : i32, i32, i32
  }
  func.func @transform_18(%arg0: i32) -> (i32, i32) {
    %c0_i32 = arith.constant 0 : i32
    %c0_i32_0 = arith.constant 0 : i32
    %c0_i32_1 = arith.constant 0 : i32
    return %c0_i32, %c0_i32_0 : i32, i32
  }
  func.func @transform_19(%arg0: i32) -> (i32, i32) {
    %c0_i32 = arith.constant 0 : i32
    %c0_i32_0 = arith.constant 0 : i32
    %c0_i32_1 = arith.constant 0 : i32
    return %c0_i32, %c0_i32_0 : i32, i32
  }
  func.func @transform_20(%arg0: i32) -> (i32, i32, i32) {
    %c0_i32 = arith.constant 0 : i32
    %c0_i32_0 = arith.constant 0 : i32
    %c0_i32_1 = arith.constant 0 : i32
    %c0_i32_2 = arith.constant 0 : i32
    return %c0_i32, %c0_i32_0, %c0_i32_1 : i32, i32, i32
  }
  func.func @transform_21(%arg0: i32) -> (i32, i32) {
    %c0_i32 = arith.constant 0 : i32
    %c0_i32_0 = arith.constant 0 : i32
    %c0_i32_1 = arith.constant 0 : i32
    return %c0_i32, %c0_i32_0 : i32, i32
  }
  func.func @transform_22(%arg0: i32) -> (i32, i32) {
    %c0_i32 = arith.constant 0 : i32
    %c0_i32_0 = arith.constant 0 : i32
    %c0_i32_1 = arith.constant 0 : i32
    return %c0_i32, %c0_i32_0 : i32, i32
  }
  func.func @transform_23(%arg0: i32) -> (i32, i32, i32) {
    %c0_i32 = arith.constant 0 : i32
    %c0_i32_0 = arith.constant 0 : i32
    %c0_i32_1 = arith.constant 0 : i32
    return %arg0, %c0_i32, %c0_i32_0 : i32, i32, i32
  }
}

</mosaic_0001>

<bundles_post_ra>
// kernel: fcna_forward.1
= control target key start
LH: loop header
LB: loop body
LE: loop exit
PB: predicated region body
PF: predicated region fallthrough
CT: control target
= control target key end

     0   :  { %s6450_s0 = inlined_call_operand.vmem [shape: f32[2,116,52], index: 0, kind: input, shape index: {}]   ;;  %s6451_s1 = inlined_call_operand.vmem [shape: f32[2,128,4], index: 1, kind: input, shape index: {}]   ;;  %s6452_s2 = inlined_call_operand.vmem [shape: f32[52,64], index: 2, kind: input, shape index: {}]   ;;  %s6453_s3 = inlined_call_operand.vmem [shape: f32[1,64], index: 3, kind: input, shape index: {}]   ;;  %s6454_s4 = inlined_call_operand.vmem [shape: f32[5,64,64], index: 4, kind: input, shape index: {}]   ;;  %s6455_s5 = inlined_call_operand.vmem [shape: f32[1,64], index: 5, kind: input, shape index: {}]   ;;  %s6456_s6 = inlined_call_operand.vmem [shape: f32[3,64,64], index: 6, kind: input, shape index: {}]   ;;  %s6457_s7 = inlined_call_operand.vmem [shape: f32[1,64], index: 7, kind: input, shape index: {}]   ;;  %s6458_s8 = inlined_call_operand.vmem [shape: f32[6,2], index: 8, kind: input, shape index: {}]   ;;  %s6459_s9 = inlined_call_operand.vmem [shape: f32[29,6], index: 9, kind: input, shape index: {}]   ;;  %s6460_s10 = inlined_call_operand.vmem [shape: f32[128,29], index: 10, kind: input, shape index: {}]   ;;  %s6461_s11 = inlined_call_operand.vmem [shape: f32[3,64,64], index: 11, kind: input, shape index: {}]   ;;  %s6462_s12 = inlined_call_operand.vmem [shape: f32[1,64], index: 12, kind: input, shape index: {}]   ;;  %s6463_s13 = inlined_call_operand.vmem [shape: f32[1,64], index: 13, kind: input, shape index: {}]   ;;  %s6464_s14 = inlined_call_operand.vmem [shape: f32[3,64,64], index: 14, kind: input, shape index: {}]   ;;  %s6465_s15 = inlined_call_operand.vmem [shape: f32[1,64], index: 15, kind: input, shape index: {}]   ;;  %s6466_s16 = inlined_call_operand.vmem [shape: f32[1,64], index: 16, kind: input, shape index: {}]   ;;  %s6467_s17 = inlined_call_operand.vmem [shape: f32[3,64,4], index: 17, kind: input, shape index: {}]   ;;  %s6468_s18 = inlined_call_operand.vmem [shape: f32[1,64], index: 18, kind: input, shape index: {}]   ;;  %s6469_s19 = inlined_call_operand.vmem [shape: f32[1,64], index: 19, kind: input, shape index: {}]   ;;  %s6470_s20 = inlined_call_operand.vmem [shape: f32[3,4,1], index: 20, kind: input, shape index: {}]   ;;  %s6471_s21 = inlined_call_operand.vmem [shape: f32[1,4], index: 21, kind: input, shape index: {}]   ;;  %s6472_s22 = inlined_call_operand.vmem [shape: f32[1,4], index: 22, kind: input, shape index: {}]   ;;  %s6473_s23 = inlined_call_operand.vmem [shape: f32[2,128,1], index: 23, kind: output, shape index: {}]  }
   0x1   :  { %6477 = sst [smem:[#allocation11_spill]] %s6450_s0 }
   0x2   :  { %6478 = sst [smem:[#allocation12_spill]] %s6451_s1 }
   0x3   :  { %6479 = sst [smem:[#allocation13_spill]] %s6452_s2 }
   0x4   :  { %6480 = sst [smem:[#allocation14_spill]] %s6453_s3 }
   0x5   :  { %6481 = sst [smem:[#allocation15_spill]] %s6454_s4  ;;  %s5423_s4 = smov 0  }
   0x6   :  { %6482 = sst [smem:[#allocation16_spill]] %s6455_s5 }
   0x7   :  { %6483 = sst [smem:[#allocation17_spill]] %s6456_s6 }
   0x8   :  { %6484 = sst [smem:[#allocation18_spill]] %s6457_s7 }
   0x9 LB: > { %s4139_s30 = sadd.s32 4294967295, %s5299_s4   ;;  %p4143_p0 = scmp.ge.s32.totalorder %s5299_s4, 1  ;;  %s5299_s4 = sphi %s5423_s4, %s33_s4  }
   0xa   : > { %p647_p1 = scmp.lt.s32.totalorder %s5299_s4, 3 }
   0xc   : > { %p648_p2 = pnand %p4143_p0, %p647_p1 }
   0xd   : > { %s6485_s5 = sld [smem:[#allocation13_spill]] (!%p648_p2)  ;;  %p716_p3 = scmp.lt.s32.totalorder (!%p648_p2), %s4139_s30, 1 }
   0xe   : > { %651 = sbr.rel (%p648_p2) target bundleno = 2404 (0x964), region = 112  ;;  %s6486_s26 = sld [smem:[#allocation11_spill]] (!%p648_p2) }
   0xf   : > { %s6487_s29 = sld [smem:[#allocation15_spill]] (!%p648_p2) }
  0x10   : > { %s6488_s0 = sld [smem:[#allocation14_spill]] (!%p648_p2) }
  0x11   : > { %s6490_s7 = sld [smem:[#allocation16_spill]] (!%p648_p2) }
  0x13   : > { %v752_v0 = vld [vmem:[%s6485_s5 + $0x30] sm:$0xf]  ;;  %vm806_vm0 = vcmask 1043456   ;;  %v5301_v1 = vmov 0.0   ;;  %v751_v2 = vld [vmem:[%s6485_s5 + $0x28] sm:$0xff]  ;;  %vm5302_vm1 = vmmov 0  }
  0x14   : > { %4687 = vmatprep.subr.mxu0 %v5301_v1  ;;  %4701 = vmatprep.mubr.msk.f32.mxu0 %vm5302_vm1, %v5301_v1  ;;  %v750_v3 = vld [vmem:[%s6485_s5 + $0x20] sm:$0xff]  ;;  %s6494_s30 = smov (!%p716_p3, %s4139_s30), 1  ;;  %v749_v4 = vld [vmem:[%s6485_s5 + $0x18] sm:$0xff]  ;;  %v748_v5 = vld [vmem:[%s6485_s5 + $0x10] sm:$0xff]  ;;  %vm760_vm2 = vcmask 424960   ;;  %vm965_vm3 = vcmask 523264  }
  0x15   : > { %4688 = vmatpush3.msk.msra.mxu0 %vm806_vm0, %v752_v0  ;;  %s5216_s28 = smul.u32 120, %s6494_s30  ;;  %v747_v6 = vld [vmem:[%s6485_s5 + $0x8] sm:$0xff]  ;;  %v746_v7 = vld [vmem:[%s6485_s5] sm:$0xff]  ;;  %v4173_v23 = vld [vmem:[%s6487_s29 + $0x78] sm:$0xff]  ;;  %vm980_vm4 = vcmask 519168   ;;  %vm1028_vm5 = vcmask 520192  }
  0x16   : > { %4689 = vmatprep.subr.mxu0 %v5301_v1  ;;  %v4213_v24 = vld [vmem:[%s6487_s29 + $0x138] sm:$0xff]  ;;  %4746 = vmatprep.subr.mxu1 %v4173_v23  ;;  %v4172_v25 = vld [vmem:[%s6487_s29 + $0x70] sm:$0xff]  ;;  %v4171_v27 = vld [vmem:[%s6487_s29 + $0x68] sm:$0xff]  ;;  %vm1609_vm6 = vcmask 516096   ;;  %vm1621_vm7 = vcmask 521216   ;;  %vm1886_vm8 = vcmask 517120  }
  0x17   : > { %4690 = vmatpush3.msra.mxu0 %v751_v2  ;;  %s5463_s2 = scalar_lea.vmem %s6486_s26, %s5216_s28  ;;  %4747 = vmatpush3.msra.mxu1 %v4173_v23  ;;  %v4212_v26 = vld [vmem:[%s6487_s29 + $0x130] sm:$0xff]  ;;  %v4211_v28 = vld [vmem:[%s6487_s29 + $0x128] sm:$0xff]  ;;  %v4170_v29 = vld [vmem:[%s6487_s29 + $0x60] sm:$0xff]  ;;  %1914 = vst.msk [vmem:[#allocation7] sm:$0x1] %vm1609_vm6, %v5301_v1  ;;  %s6491_s28 = sld [smem:[#allocation18_spill]] }
  0x18   : > { %4691 = vmatprep.subr.mxu0 %v5301_v1  ;;  %v731_v8 = vld [vmem:[%s5463_s2] sm:$0xff]  ;;  %v732_v9 = vld [vmem:[%s5463_s2 + $0x8] sm:$0xff]  ;;  %v733_v10 = vld [vmem:[%s5463_s2 + $0x10] sm:$0xff]  ;;  %4748 = vmatprep.subr.mxu1 %v4172_v25  ;;  %1915 = vst.msk [vmem:[#allocation7 + $0x3] sm:$0x1] %vm1609_vm6, %v5301_v1  ;;  %vm2172_vm9 = vcmask 1041408  }
  0x19   : > { %4692 = vmatpush3.msra.mxu0 %v750_v3  ;;  %v734_v11 = vld [vmem:[%s5463_s2 + $0x18] sm:$0xff]  ;;  %v735_v12 = vld [vmem:[%s5463_s2 + $0x20] sm:$0xff]  ;;  %v736_v13 = vld [vmem:[%s5463_s2 + $0x28] sm:$0xff]  ;;  %4749 = vmatpush3.msra.mxu1 %v4172_v25  ;;  %2263 = vst.msk [vmem:[#allocation8] sm:$0x1] %vm1609_vm6, %v5301_v1  ;;  %vm2168_vm10 = vcmask 15360  }
  0x1a   : > { %4693 = vmatprep.subr.mxu0 %v5301_v1  ;;  %v737_v14 = vld [vmem:[%s5463_s2 + $0x30] sm:$0xff]  ;;  %v738_v15 = vld [vmem:[%s5463_s2 + $0x38] sm:$0xff]  ;;  %v739_v16 = vld [vmem:[%s5463_s2 + $0x40] sm:$0xff]  ;;  %4750 = vmatprep.subr.mxu1 %v4171_v27  ;;  %2264 = vst.msk [vmem:[#allocation8 + $0x7] sm:$0x1] %vm1609_vm6, %v5301_v1  ;;  %vm2523_vm11 = vcmask 48128  }
  0x1b   : > { %4694 = vmatpush3.msra.mxu0 %v749_v4  ;;  %v740_v17 = vld [vmem:[%s5463_s2 + $0x48] sm:$0xff]  ;;  %v741_v18 = vld [vmem:[%s5463_s2 + $0x50] sm:$0xff]  ;;  %v742_v19 = vld [vmem:[%s5463_s2 + $0x58] sm:$0xff]  ;;  %4751 = vmatpush3.msra.mxu1 %v4171_v27  ;;  %2651 = vst.msk [vmem:[#allocation9] sm:$0x1] %vm1609_vm6, %v5301_v1  ;;  %vm2536_vm12 = vcmask 1045504  }
  0x1c   : > { %4695 = vmatprep.subr.mxu0 %v5301_v1  ;;  %v743_v20 = vld [vmem:[%s5463_s2 + $0x60] sm:$0xff]  ;;  %v744_v21 = vld [vmem:[%s5463_s2 + $0x68] sm:$0xff]  ;;  %v745_v22 = vld [vmem:[%s5463_s2 + $0x70] sm:$0xf]  ;;  %4752 = vmatprep.subr.mxu1 %v4170_v29  ;;  %2652 = vst.msk [vmem:[#allocation9 + $0x1e] sm:$0x1] %vm1609_vm6, %v5301_v1 }
  0x1d   : > { %4696 = vmatpush3.msra.mxu0 %v748_v5  ;;  %v4210_v30 = vld [vmem:[%s6487_s29 + $0x120] sm:$0xff]  ;;  %4753 = vmatpush3.msra.mxu1 %v4170_v29  ;;  %v4169_v31 = vld [vmem:[%s6487_s29 + $0x58] sm:$0xff]  ;;  %v4168_v33 = vld [vmem:[%s6487_s29 + $0x50] sm:$0xff]  ;;  %s6489_s2 = sld [smem:[#allocation17_spill]]  ;;  %vm3022_vm13 = vcmask 236544   ;;  %vm3071_vm14 = vcmask 1044480  }
  0x1e   : > { %4697 = vmatprep.subr.mxu0 %v5301_v1  ;;  %v4209_v32 = vld [vmem:[%s6487_s29 + $0x118] sm:$0xff]  ;;  %4754 = vmatprep.subr.mxu1 %v4169_v31  ;;  %v4208_v34 = vld [vmem:[%s6487_s29 + $0x110] sm:$0xff]  ;;  %v4167_v35 = vld [vmem:[%s6487_s29 + $0x48] sm:$0xff]  ;;  %vm3282_vm15 = vcmask 24576   ;;  %s4408_s24 = sshll.u32 %s6494_s30, 7  ;;  %s6492_s26 = sld [smem:[#allocation12_spill]] }
  0x1f   : > { %4698 = vmatpush3.msra.mxu0 %v747_v6  ;;  %4755 = vmatpush3.msra.mxu1 %v4169_v31  ;;  %v4207_v36 = vld [vmem:[%s6487_s29 + $0x108] sm:$0xff]  ;;  %v4166_v37 = vld [vmem:[%s6487_s29 + $0x40] sm:$0xff]  ;;  %v5579_v39 = vld [vmem:[%s6487_s29 + $0x38] sm:$0xff]  ;;  %3283 = vst.msk [vmem:[#allocation10] sm:$0x1] %vm3282_vm15, %v5301_v1  ;;  %s6413_s1 = scalar_lea.vmem %s6473_s23, %s4408_s24 }
  0x20   : > { %4699 = vmatprep.subr.mxu0 %v5301_v1  ;;  %4756 = vmatprep.subr.mxu1 %v4168_v33  ;;  %v4206_v38 = vld [vmem:[%s6487_s29 + $0x100] sm:$0xff]  ;;  %3284 = vst.msk [vmem:[#allocation10 + $0x81] sm:$0x1] %vm3282_vm15, %v5301_v1 }
  0x21   : > { %4700 = vmatpush3.msra.mxu0 %v746_v7  ;;  %4757 = vmatpush3.msra.mxu1 %v4168_v33  ;;  %v5586_v40 = vld [vmem:[%s6488_s0] ss:$0 sm:$0xff] }
  0x22   : > { %4702 = vmatmul.mubr.msk.f32.vlgmr.msra.gmra.mxu0 %vm760_vm2, %v731_v8  ;;  %4834 = vmatprep.subr.mxu0 %v4213_v24 }
  0x23   : > { %4704 = vmatprep.mubr.msk.f32.mxu0 %vm5302_vm1, %v5301_v1  ;;  %4835 = vmatpush3.msra.mxu0 %v4213_v24 }
  0x24   : > { %4836 = vmatprep.subr.mxu0 %v4212_v26  ;;  %4758 = vmatprep.subr.mxu1 %v4167_v35  ;;  %s6267_s6 = scalar_lea.vmem %s6492_s26, %s4408_s24 }
  0x25   : > { %4837 = vmatpush3.msra.mxu0 %v4212_v26  ;;  %4759 = vmatpush3.msra.mxu1 %v4167_v35 }
  0x26   : > { %4705 = vmatmul.mubr.msk.f32.gmra.mxu0 %vm760_vm2, %v732_v9  ;;  %4838 = vmatprep.subr.mxu0 %v4211_v28 }
  0x27   : > { %4707 = vmatprep.mubr.msk.f32.mxu0 %vm5302_vm1, %v5301_v1  ;;  %4839 = vmatpush3.msra.mxu0 %v4211_v28 }
  0x28   : > { %4840 = vmatprep.subr.mxu0 %v4210_v30  ;;  %4760 = vmatprep.subr.mxu1 %v4166_v37 }
  0x29   : > { %4841 = vmatpush3.msra.mxu0 %v4210_v30  ;;  %4761 = vmatpush3.msra.mxu1 %v4166_v37 }
  0x2a   : > { %4708 = vmatmul.mubr.msk.f32.gmra.mxu0 %vm760_vm2, %v733_v10  ;;  %4842 = vmatprep.subr.mxu0 %v4209_v32 }
  0x2b   : > { %4710 = vmatprep.mubr.msk.f32.mxu0 %vm5302_vm1, %v5301_v1  ;;  %4843 = vmatpush3.msra.mxu0 %v4209_v32 }
  0x2c   : > { %4844 = vmatprep.subr.mxu0 %v4208_v34  ;;  %4768 = vmatprep.subr.mxu1 %v5579_v39 }
  0x2d   : > { %4845 = vmatpush3.msra.mxu0 %v4208_v34 }
  0x2e   : > { %4711 = vmatmul.mubr.msk.f32.gmra.mxu0 %vm760_vm2, %v734_v11  ;;  %4846 = vmatprep.subr.mxu0 %v4207_v36 }
  0x2f   : > { %4713 = vmatprep.mubr.msk.f32.mxu0 %vm5302_vm1, %v5301_v1  ;;  %4847 = vmatpush3.msra.mxu0 %v4207_v36 }
  0x30   : > { %4848 = vmatprep.subr.mxu0 %v4206_v38 }
  0x31   : > { %4849 = vmatpush3.msra.mxu0 %v4206_v38 }
  0x32   : > { %4714 = vmatmul.mubr.msk.f32.gmra.mxu0 %vm760_vm2, %v735_v12  ;;  %4875 = vmatprep.subr.mxu0 %v5301_v1 }
  0x33   : > { %4716 = vmatprep.mubr.msk.f32.mxu0 %vm5302_vm1, %v5301_v1 }
  0x36   : > { %4717 = vmatmul.mubr.msk.f32.gmra.mxu0 %vm760_vm2, %v736_v13 }
  0x37   : > { %4719 = vmatprep.mubr.msk.f32.mxu0 %vm5302_vm1, %v5301_v1 }
  0x3a   : > { %4720 = vmatmul.mubr.msk.f32.gmra.mxu0 %vm760_vm2, %v737_v14 }
  0x3b   : > { %4722 = vmatprep.mubr.msk.f32.mxu0 %vm5302_vm1, %v5301_v1 }
  0x3e   : > { %4723 = vmatmul.mubr.msk.f32.gmra.mxu0 %vm760_vm2, %v738_v15 }
  0x3f   : > { %4725 = vmatprep.mubr.msk.f32.mxu0 %vm5302_vm1, %v5301_v1 }
  0x42   : > { %4726 = vmatmul.mubr.msk.f32.gmra.mxu0 %vm760_vm2, %v739_v16 }
  0x43   : > { %4728 = vmatprep.mubr.msk.f32.mxu0 %vm5302_vm1, %v5301_v1 }
  0x46   : > { %4729 = vmatmul.mubr.msk.f32.gmra.mxu0 %vm760_vm2, %v740_v17 }
  0x47   : > { %4731 = vmatprep.mubr.msk.f32.mxu0 %vm5302_vm1, %v5301_v1 }
  0x4a   : > { %4732 = vmatmul.mubr.msk.f32.gmra.mxu0 %vm760_vm2, %v741_v18 }
  0x4b   : > { %4734 = vmatprep.mubr.msk.f32.mxu0 %vm5302_vm1, %v5301_v1 }
  0x4e   : > { %4735 = vmatmul.mubr.msk.f32.gmra.mxu0 %vm760_vm2, %v742_v19 }
  0x4f   : > { %4737 = vmatprep.mubr.msk.f32.mxu0 %vm5302_vm1, %v5301_v1 }
  0x52   : > { %4738 = vmatmul.mubr.msk.f32.gmra.mxu0 %vm760_vm2, %v743_v20 }
  0x53   : > { %4740 = vmatprep.mubr.msk.f32.mxu0 %vm5302_vm1, %v5301_v1 }
  0x56   : > { %4741 = vmatmul.mubr.msk.f32.gmra.mxu0 %vm760_vm2, %v744_v21 }
  0x57   : > { %4743 = vmatprep.mubr.msk.f32.mxu0 %vm5302_vm1, %v5301_v1 }
  0x5a   : > { %4744 = vmatmul.mubr.msk.f32.gmra.mxu0 %vm760_vm2, %v745_v22 }
  0xe2   : > { %v876_v41 = vpop.f32.mrf.mxu0 }
  0xe3   : > { %v877_v42 = vadd.f32 %v5586_v40, %v876_v41 }
  0xe4   : > { %v4703_v43 = vpop.f32.mrf.mxu0 }
  0xe5   : > { %v950_v44 = vmax.f32 %v877_v42, 0.0 }
  0xe6   : > { %v881_v45 = vpop.f32.mrf.mxu0 }
  0xe7   : > { %966 = vst.msk [vmem:[#allocation2] sm:$0xff] %vm965_vm3, %v950_v44  ;;  %v882_v46 = vadd.f32 %v5586_v40, %v881_v45 }
  0xe8   : > { %v4706_v47 = vpop.f32.mrf.mxu0 }
  0xe9   : > { %v951_v48 = vmax.f32 %v882_v46, 0.0 }
  0xea   : > { %v886_v49 = vpop.f32.mrf.mxu0 }
  0xeb   : > { %967 = vst.msk [vmem:[#allocation2 + $0x8] sm:$0xff] %vm965_vm3, %v951_v48  ;;  %v887_v50 = vadd.f32 %v5586_v40, %v886_v49 }
  0xec   : > { %v4709_v51 = vpop.f32.mrf.mxu0 }
  0xed   : > { %v952_v52 = vmax.f32 %v887_v50, 0.0 }
  0xee   : > { %v891_v53 = vpop.f32.mrf.mxu0 }
  0xef   : > { %968 = vst.msk [vmem:[#allocation2 + $0x10] sm:$0xff] %vm965_vm3, %v952_v52  ;;  %v892_v54 = vadd.f32 %v5586_v40, %v891_v53 }
  0xf0   : > { %v4712_v55 = vpop.f32.mrf.mxu0 }
  0xf1   : > { %v953_v56 = vmax.f32 %v892_v54, 0.0 }
  0xf2   : > { %v896_v57 = vpop.f32.mrf.mxu0 }
  0xf3   : > { %969 = vst.msk [vmem:[#allocation2 + $0x18] sm:$0xff] %vm965_vm3, %v953_v56  ;;  %v897_v58 = vadd.f32 %v5586_v40, %v896_v57 }
  0xf4   : > { %v4715_v59 = vpop.f32.mrf.mxu0 }
  0xf5   : > { %v954_v60 = vmax.f32 %v897_v58, 0.0 }
  0xf6   : > { %v901_v61 = vpop.f32.mrf.mxu0 }
  0xf7   : > { %970 = vst.msk [vmem:[#allocation2 + $0x20] sm:$0xff] %vm965_vm3, %v954_v60  ;;  %v902_v62 = vadd.f32 %v5586_v40, %v901_v61 }
  0xf8   : > { %v4718_v63 = vpop.f32.mrf.mxu0 }
  0xf9   : > { %v955_v0 = vmax.f32 %v902_v62, 0.0 }
  0xfa   : > { %v982_v2 = vld [vmem:[#allocation2] ss:$4 sm:$0xff]  ;;  %v990_v3 = vld [vmem:[#allocation2 + $0x1] ss:$4 sm:$0xff]  ;;  %v906_v4 = vpop.f32.mrf.mxu0  ;;  %v1002_v7 = vld [vmem:[#allocation2 + $0x2] ss:$4 sm:$0xff] }
  0xfb   : > { %v997_v5 = vmax.f32 %v982_v2, %v990_v3  ;;  %971 = vst.msk [vmem:[#allocation2 + $0x28] sm:$0xff] %vm965_vm3, %v955_v0  ;;  %v907_v6 = vadd.f32 %v5586_v40, %v906_v4  ;;  %v1014_v11 = vld [vmem:[#allocation2 + $0x3] ss:$4 sm:$0xff] }
  0xfc   : > { %v4721_v8 = vpop.f32.mrf.mxu0  ;;  %v1040_v3 = vld [vmem:[%s6487_s29 + $0x30] sm:$0xff] }
  0xfd   : > { %v1009_v9 = vmax.f32 %v997_v5, %v1002_v7  ;;  %v956_v10 = vmax.f32 %v907_v6, 0.0  ;;  %v1039_v8 = vld [vmem:[%s6487_s29 + $0x28] sm:$0xff] }
  0xfe   : > { %v911_v12 = vpop.f32.mrf.mxu0 }
  0xff   : > { %972 = vst.msk [vmem:[#allocation2 + $0x30] sm:$0xff] %vm965_vm3, %v956_v10  ;;  %v912_v13 = vadd.f32 %v5586_v40, %v911_v12  ;;  %v1021_v14 = vmax.f32 %v1009_v9, %v1014_v11  ;;  %v1038_v10 = vld [vmem:[%s6487_s29 + $0x20] sm:$0xff]  ;;  %v1036_v11 = vld [vmem:[%s6487_s29 + $0x10] sm:$0xff]  ;;  %v1035_v12 = vld [vmem:[%s6487_s29 + $0x8] sm:$0xff] }
 0x100   : > { %v4724_v15 = vpop.f32.mrf.mxu0 }
 0x101   : > { %v957_v16 = vmax.f32 %v912_v13, 0.0  ;;  %1025 = vst.msk [vmem:[#allocation5] sm:$0xff] %vm965_vm3, %v1021_v14 }
 0x102   : > { %v916_v17 = vpop.f32.mrf.mxu0 }
 0x103   : > { %973 = vst.msk [vmem:[#allocation2 + $0x38] sm:$0xff] %vm965_vm3, %v957_v16  ;;  %v917_v18 = vadd.f32 %v5586_v40, %v916_v17  ;;  %v1034_v17 = vld [vmem:[%s6487_s29] sm:$0xff] }
 0x104   : > { %v4727_v19 = vpop.f32.mrf.mxu0 }
 0x105   : > { %v958_v20 = vmax.f32 %v917_v18, 0.0  ;;  %v4189_v19 = vld [vmem:[%s6487_s29 + $0xb8] sm:$0xff] }
 0x106   : > { %v921_v21 = vpop.f32.mrf.mxu0 }
 0x107   : > { %974 = vst.msk [vmem:[#allocation2 + $0x40] sm:$0xff] %vm965_vm3, %v958_v20  ;;  %v922_v22 = vadd.f32 %v5586_v40, %v921_v21  ;;  %v4188_v21 = vld [vmem:[%s6487_s29 + $0xb0] sm:$0xff] }
 0x108   : > { %v4730_v23 = vpop.f32.mrf.mxu0  ;;  %v1030_v18 = vld [vmem:[#allocation5] sm:$0xff] }
 0x109   : > { %v959_v24 = vmax.f32 %v922_v22, 0.0  ;;  %v4187_v23 = vld [vmem:[%s6487_s29 + $0xa8] sm:$0xff] }
 0x10a   : > { %v984_v25 = vld [vmem:[#allocation2 + $0x20] ss:$4 sm:$0xff]  ;;  %v992_v26 = vld [vmem:[#allocation2 + $0x21] ss:$4 sm:$0xff]  ;;  %v926_v27 = vpop.f32.mrf.mxu0  ;;  %v1004_v30 = vld [vmem:[#allocation2 + $0x22] ss:$4 sm:$0xff] }
 0x10b   : > { %v998_v28 = vmax.f32 %v984_v25, %v992_v26  ;;  %975 = vst.msk [vmem:[#allocation2 + $0x48] sm:$0xff] %vm965_vm3, %v959_v24  ;;  %v927_v29 = vadd.f32 %v5586_v40, %v926_v27  ;;  %v1016_v34 = vld [vmem:[#allocation2 + $0x23] ss:$4 sm:$0xff] }
 0x10c   : > { %v4733_v31 = vpop.f32.mrf.mxu0  ;;  %v4186_v25 = vld [vmem:[%s6487_s29 + $0xa0] sm:$0xff]  ;;  %v4185_v27 = vld [vmem:[%s6487_s29 + $0x98] sm:$0xff] }
 0x10d   : > { %v1010_v32 = vmax.f32 %v998_v28, %v1004_v30  ;;  %v960_v33 = vmax.f32 %v927_v29, 0.0  ;;  %v4184_v28 = vld [vmem:[%s6487_s29 + $0x90] sm:$0xff]  ;;  %v4183_v29 = vld [vmem:[%s6487_s29 + $0x88] sm:$0xff]  ;;  %v4182_v30 = vld [vmem:[%s6487_s29 + $0x80] sm:$0xff] }
 0x10e   : > { %v931_v35 = vpop.f32.mrf.mxu0  ;;  %v4201_v31 = vld [vmem:[%s6487_s29 + $0xf8] sm:$0xff] }
 0x10f   : > { %976 = vst.msk [vmem:[#allocation2 + $0x50] sm:$0xff] %vm965_vm3, %v960_v33  ;;  %v932_v36 = vadd.f32 %v5586_v40, %v931_v35  ;;  %v1022_v37 = vmax.f32 %v1010_v32, %v1016_v34  ;;  %v4200_v33 = vld [vmem:[%s6487_s29 + $0xf0] sm:$0xff]  ;;  %v4199_v35 = vld [vmem:[%s6487_s29 + $0xe8] sm:$0xff] }
 0x110   : > { %v4736_v38 = vpop.f32.mrf.mxu0 }
 0x111   : > { %v961_v41 = vmax.f32 %v932_v36, 0.0  ;;  %1026 = vst.msk [vmem:[#allocation5 + $0x8] sm:$0xff] %vm965_vm3, %v1022_v37  ;;  %v4198_v37 = vld [vmem:[%s6487_s29 + $0xe0] sm:$0xff] }
 0x112   : > { %v936_v42 = vpop.f32.mrf.mxu0 }
 0x113   : > { %977 = vst.msk [vmem:[#allocation2 + $0x58] sm:$0xff] %vm965_vm3, %v961_v41  ;;  %v937_v43 = vadd.f32 %v5586_v40, %v936_v42  ;;  %v4197_v41 = vld [vmem:[%s6487_s29 + $0xd8] sm:$0xff]  ;;  %v4196_v42 = vld [vmem:[%s6487_s29 + $0xd0] sm:$0xff] }
 0x114   : > { %v4739_v44 = vpop.f32.mrf.mxu0 }
 0x115   : > { %v962_v45 = vmax.f32 %v937_v43, 0.0  ;;  %v4195_v43 = vld [vmem:[%s6487_s29 + $0xc8] sm:$0xff]  ;;  %v4194_v44 = vld [vmem:[%s6487_s29 + $0xc0] sm:$0xff] }
 0x116   : > { %v941_v46 = vpop.f32.mrf.mxu0 }
 0x117   : > { %978 = vst.msk [vmem:[#allocation2 + $0x60] sm:$0xff] %vm965_vm3, %v962_v45  ;;  %v942_v47 = vadd.f32 %v5586_v40, %v941_v46 }
 0x118   : > { %v4742_v48 = vpop.f32.mrf.mxu0  ;;  %v1042_v49 = vld [vmem:[#allocation5 + $0x1] sm:$0xff] }
 0x119   : > { %v1477_v50 = vld [vmem:[#allocation5 + $0x4] sm:$0xff]  ;;  %v963_v51 = vmax.f32 %v942_v47, 0.0  ;;  %4762 = vmatprep.mubr.msk.f32.mxu1 %vm965_vm3, %v1042_v49  ;;  %v4226_v48 = vld [vmem:[%s6489_s2 + $0x78] sm:$0xff] }
 0x11a   : > { %4850 = vmatprep.mubr.msk.f32.mxu0 %vm965_vm3, %v1477_v50  ;;  %v986_v52 = vld [vmem:[#allocation2 + $0x40] ss:$4 sm:$0xff]  ;;  %v994_v53 = vld [vmem:[#allocation2 + $0x41] ss:$4 sm:$0xff]  ;;  %v946_v54 = vpop.f32.mrf.mxu0  ;;  %v1006_v57 = vld [vmem:[#allocation2 + $0x42] ss:$4 sm:$0xff] }
 0x11b   : > { %v999_v55 = vmax.f32 %v986_v52, %v994_v53  ;;  %979 = vst.msk [vmem:[#allocation2 + $0x68] sm:$0xff] %vm965_vm3, %v963_v51  ;;  %v947_v56 = vadd.f32 %v5586_v40, %v946_v54  ;;  %v1018_v61 = vld [vmem:[#allocation2 + $0x43] ss:$4 sm:$0xff] }
 0x11c   : > { %v4745_v58 = vpop.f32.mrf.mxu0  ;;  %v5656_v20 = vld [vmem:[#allocation5 + $0x8] sm:$0xff]  ;;  %v1631_v49 = vld [vmem:[%s6489_s2 + $0x38] sm:$0xff]  ;;  %v4225_v50 = vld [vmem:[%s6489_s2 + $0x70] sm:$0xff] }
 0x11d   : > { %v1011_v59 = vmax.f32 %v999_v55, %v1006_v57  ;;  %v964_v60 = vmax.f32 %v947_v56, 0.0  ;;  %v1249_v26 = vld [vmem:[#allocation5 + $0x2] sm:$0xff]  ;;  %v1630_v51 = vld [vmem:[%s6489_s2 + $0x30] sm:$0xff]  ;;  %v4224_v52 = vld [vmem:[%s6489_s2 + $0x68] sm:$0xff] }
 0x11e   : > { %v1363_v38 = vld [vmem:[#allocation5 + $0x3] sm:$0xff]  ;;  %v1629_v53 = vld [vmem:[%s6489_s2 + $0x28] sm:$0xff]  ;;  %v4221_v58 = vld [vmem:[%s6489_s2 + $0x50] sm:$0xff] }
 0x11f   : > { %v1023_v62 = vmax.f32 %v1011_v59, %v1018_v61  ;;  %981 = vst.msk [vmem:[#allocation2 + $0x70] sm:$0xf] %vm980_vm4, %v964_v60  ;;  %v4223_v54 = vld [vmem:[%s6489_s2 + $0x60] sm:$0xff]  ;;  %v4222_v56 = vld [vmem:[%s6489_s2 + $0x58] sm:$0xff]  ;;  %v1626_v59 = vld [vmem:[%s6489_s2 + $0x10] sm:$0xff] }
 0x120   : > { %v1628_v55 = vld [vmem:[%s6489_s2 + $0x20] sm:$0xff]  ;;  %v1627_v57 = vld [vmem:[%s6489_s2 + $0x18] sm:$0xff]  ;;  %v4220_v60 = vld [vmem:[%s6489_s2 + $0x48] sm:$0xff] }
 0x121   : > { %1027 = vst.msk [vmem:[#allocation5 + $0x10] sm:$0xff] %vm965_vm3, %v1023_v62  ;;  %v1625_v61 = vld [vmem:[%s6489_s2 + $0x8] sm:$0xff]  ;;  %v4219_v62 = vld [vmem:[%s6489_s2 + $0x40] sm:$0xff] }
 0x126   : > { %v988_v63 = vld [vmem:[#allocation2 + $0x60] ss:$4 sm:$0x1f]  ;;  %v996_v0 = vld [vmem:[#allocation2 + $0x61] ss:$4 sm:$0x1f] }
 0x127   : > { %v1000_v2 = vmax.f32 %v988_v63, %v996_v0  ;;  %v1008_v4 = vld [vmem:[#allocation2 + $0x62] ss:$4 sm:$0x1f]  ;;  %v1020_v7 = vld [vmem:[#allocation2 + $0x63] ss:$4 sm:$0x1f] }
 0x128   : > { %v1043_v40 = vld [vmem:[#allocation5 + $0x9] sm:$0xff] }
 0x129   : > { %v1478_v5 = vld [vmem:[#allocation5 + $0xc] sm:$0xff]  ;;  %v1012_v6 = vmax.f32 %v1000_v2, %v1008_v4  ;;  %4763 = vmatmul.mubr.msk.f32.vlgmr.msra.gmra.mxu1 %vm965_vm3, %v1043_v40  ;;  %v1624_v63 = vld [vmem:[%s6489_s2] sm:$0xff] }
 0x12a   : > { %4851 = vmatmul.mubr.msk.f32.vlgmr.msra.gmra.mxu0 %vm965_vm3, %v1478_v5  ;;  %4769 = vmatpush3.msra.mxu1 %v5579_v39  ;;  %v1037_v39 = vld [vmem:[%s6487_s29 + $0x18] sm:$0xff]  ;;  %v1032_v22 = vld [vmem:[#allocation5 + $0x10] sm:$0xff] }
 0x12b   : > { %v1024_v9 = vmax.f32 %v1012_v6, %v1020_v7  ;;  %4770 = vmatprep.subr.mxu1 %v1040_v3  ;;  %v1250_v32 = vld [vmem:[#allocation5 + $0xa] sm:$0xff]  ;;  %4876 = vmatpush3.msra.mxu0 %v1631_v49 }
 0x12c   : > { %4771 = vmatpush3.msra.mxu1 %v1040_v3  ;;  %v1364_v45 = vld [vmem:[#allocation5 + $0xb] sm:$0xff]  ;;  %4877 = vmatprep.subr.mxu0 %v5301_v1 }
 0x12d   : > { %4772 = vmatprep.subr.mxu1 %v1039_v8  ;;  %1029 = vst.msk [vmem:[#allocation5 + $0x18] sm:$0x1f] %vm1028_vm5, %v1024_v9  ;;  %4878 = vmatpush3.msra.mxu0 %v1630_v51  ;;  %v4235_v51 = vld [vmem:[%s6489_s2 + $0xb0] sm:$0xff] }
 0x12e   : > { %4773 = vmatpush3.msra.mxu1 %v1039_v8  ;;  %4879 = vmatprep.subr.mxu0 %v5301_v1 }
 0x12f   : > { %4774 = vmatprep.subr.mxu1 %v1038_v10  ;;  %4880 = vmatpush3.msra.mxu0 %v1629_v53  ;;  %v4233_v53 = vld [vmem:[%s6489_s2 + $0xa0] sm:$0xff] }
 0x130   : > { %4775 = vmatpush3.msra.mxu1 %v1038_v10  ;;  %4881 = vmatprep.subr.mxu0 %v5301_v1 }
 0x131   : > { %4776 = vmatprep.subr.mxu1 %v1037_v39  ;;  %4882 = vmatpush3.msra.mxu0 %v1628_v55  ;;  %v4231_v55 = vld [vmem:[%s6489_s2 + $0x90] sm:$0xff] }
 0x132   : > { %4777 = vmatpush3.msra.mxu1 %v1037_v39  ;;  %4883 = vmatprep.subr.mxu0 %v5301_v1 }
 0x133   : > { %4778 = vmatprep.subr.mxu1 %v1036_v11  ;;  %4884 = vmatpush3.msra.mxu0 %v1627_v57  ;;  %v4229_v57 = vld [vmem:[%s6489_s2 + $0x80] sm:$0xff] }
 0x134   : > { %4779 = vmatpush3.msra.mxu1 %v1036_v11  ;;  %v1044_v13 = vld [vmem:[#allocation5 + $0x11] sm:$0xff]  ;;  %v1045_v15 = vld [vmem:[#allocation5 + $0x19] sm:$0x1]  ;;  %v1480_v16 = vld [vmem:[#allocation5 + $0x1c] sm:$0x1]  ;;  %4885 = vmatprep.subr.mxu0 %v5301_v1 }
 0x135   : > { %v1479_v14 = vld [vmem:[#allocation5 + $0x14] sm:$0xff]  ;;  %4765 = vmatprep.mubr.msk.f32.mxu1 %vm965_vm3, %v1044_v13  ;;  %4780 = vmatprep.subr.mxu1 %v1035_v12 }
 0x136   : > { %4853 = vmatprep.mubr.msk.f32.mxu0 %vm965_vm3, %v1479_v14  ;;  %4766 = vmatmul.mubr.msk.f32.gmra.mxu1 %vm965_vm3, %v1045_v15  ;;  %v1033_v24 = vld [vmem:[#allocation5 + $0x18] sm:$0x1]  ;;  %v1252_v36 = vld [vmem:[#allocation5 + $0x1a] sm:$0x1]  ;;  %v1366_v47 = vld [vmem:[#allocation5 + $0x1b] sm:$0x1] }
 0x137   : > { %4781 = vmatpush3.msra.mxu1 %v1035_v12  ;;  %4854 = vmatmul.mubr.msk.f32.gmra.mxu0 %vm965_vm3, %v1480_v16  ;;  %v1251_v34 = vld [vmem:[#allocation5 + $0x12] sm:$0xff] }
 0x138   : > { %4782 = vmatprep.subr.mxu1 %v1034_v17  ;;  %4784 = vmatprep.mubr.msk.f32.mxu1 %vm965_vm3, %v1030_v18  ;;  %v1365_v46 = vld [vmem:[#allocation5 + $0x13] sm:$0xff] }
 0x139   : > { %4783 = vmatpush3.msra.mxu1 %v1034_v17  ;;  %4891 = vmatprep.mubr.msk.f32.mxu0 %vm5302_vm1, %v5301_v1 }
 0x13a   : > { %4790 = vmatprep.subr.mxu1 %v4189_v19  ;;  %4785 = vmatmul.mubr.msk.f32.vlgmr.msra.gmra.mxu1 %vm965_vm3, %v5656_v20 }
 0x13b   : > { %4791 = vmatpush3.msra.mxu1 %v4189_v19  ;;  %4787 = vmatprep.mubr.msk.f32.mxu1 %vm965_vm3, %v1032_v22  ;;  %v4218_v19 = vld [vmem:[%s6490_s7] ss:$0 sm:$0xff] }
 0x13c   : > { %4792 = vmatprep.subr.mxu1 %v4188_v21  ;;  %4886 = vmatpush3.msra.mxu0 %v1626_v59  ;;  %v4248_v59 = vld [vmem:[%s6461_s11 + $0x78] sm:$0xff] }
 0x13d   : > { %4793 = vmatpush3.msra.mxu1 %v4188_v21  ;;  %4887 = vmatprep.subr.mxu0 %v5301_v1 }
 0x13e   : > { %4794 = vmatprep.subr.mxu1 %v4187_v23  ;;  %4788 = vmatmul.mubr.msk.f32.gmra.mxu1 %vm965_vm3, %v1033_v24 }
 0x13f   : > { %4795 = vmatpush3.msra.mxu1 %v4187_v23  ;;  %4806 = vmatprep.mubr.msk.f32.mxu1 %vm965_vm3, %v1249_v26 }
 0x140   : > { %4796 = vmatprep.subr.mxu1 %v4186_v25  ;;  %4888 = vmatpush3.msra.mxu0 %v1625_v61  ;;  %v4247_v61 = vld [vmem:[%s6461_s11 + $0x70] sm:$0xff] }
 0x141   : > { %4797 = vmatpush3.msra.mxu1 %v4186_v25  ;;  %4889 = vmatprep.subr.mxu0 %v5301_v1 }
 0x142   : > { %4798 = vmatprep.subr.mxu1 %v4185_v27  ;;  %4890 = vmatpush3.msra.mxu0 %v1624_v63  ;;  %v4246_v63 = vld [vmem:[%s6461_s11 + $0x68] sm:$0xff] }
 0x143   : > { %4799 = vmatpush3.msra.mxu1 %v4185_v27  ;;  %4913 = vmatprep.subr.mxu0 %v5301_v1 }
 0x144   : > { %4800 = vmatprep.subr.mxu1 %v4184_v28 }
 0x145   : > { %4801 = vmatpush3.msra.mxu1 %v4184_v28 }
 0x146   : > { %4802 = vmatprep.subr.mxu1 %v4183_v29 }
 0x147   : > { %4803 = vmatpush3.msra.mxu1 %v4183_v29 }
 0x148   : > { %4804 = vmatprep.subr.mxu1 %v4182_v30 }
 0x149   : > { %4805 = vmatpush3.msra.mxu1 %v4182_v30 }
 0x14a   : > { %4807 = vmatmul.mubr.msk.f32.vlgmr.msra.gmra.mxu1 %vm965_vm3, %v1250_v32  ;;  %4812 = vmatprep.subr.mxu1 %v4201_v31 }
 0x14b   : > { %4809 = vmatprep.mubr.msk.f32.mxu1 %vm965_vm3, %v1251_v34  ;;  %4813 = vmatpush3.msra.mxu1 %v4201_v31 }
 0x14c   : > { %4814 = vmatprep.subr.mxu1 %v4200_v33 }
 0x14d   : > { %4815 = vmatpush3.msra.mxu1 %v4200_v33 }
 0x14e   : > { %4810 = vmatmul.mubr.msk.f32.gmra.mxu1 %vm965_vm3, %v1252_v36  ;;  %4816 = vmatprep.subr.mxu1 %v4199_v35 }
 0x14f   : > { %4817 = vmatpush3.msra.mxu1 %v4199_v35  ;;  %4828 = vmatprep.mubr.msk.f32.mxu1 %vm965_vm3, %v1363_v38 }
 0x150   : > { %4818 = vmatprep.subr.mxu1 %v4198_v37 }
 0x151   : > { %4819 = vmatpush3.msra.mxu1 %v4198_v37 }
 0x152   : > { %4820 = vmatprep.subr.mxu1 %v4197_v41 }
 0x153   : > { %4821 = vmatpush3.msra.mxu1 %v4197_v41 }
 0x154   : > { %4822 = vmatprep.subr.mxu1 %v4196_v42 }
 0x155   : > { %4823 = vmatpush3.msra.mxu1 %v4196_v42 }
 0x156   : > { %4824 = vmatprep.subr.mxu1 %v4195_v43 }
 0x157   : > { %4825 = vmatpush3.msra.mxu1 %v4195_v43 }
 0x158   : > { %4826 = vmatprep.subr.mxu1 %v4194_v44 }
 0x159   : > { %4827 = vmatpush3.msra.mxu1 %v4194_v44 }
 0x15a   : > { %4829 = vmatmul.mubr.msk.f32.vlgmr.msra.gmra.mxu1 %vm965_vm3, %v1364_v45  ;;  %4856 = vmatprep.subr.mxu1 %v5301_v1 }
 0x15b   : > { %4831 = vmatprep.mubr.msk.f32.mxu1 %vm965_vm3, %v1365_v46  ;;  %4857 = vmatpush3.msra.mxu1 %v4226_v48  ;;  %v4236_v48 = vld [vmem:[%s6489_s2 + $0xb8] sm:$0xff] }
 0x15c   : > { %4858 = vmatprep.subr.mxu1 %v5301_v1 }
 0x15d   : > { %4859 = vmatpush3.msra.mxu1 %v4225_v50 }
 0x15e   : > { %4832 = vmatmul.mubr.msk.f32.gmra.mxu1 %vm965_vm3, %v1366_v47  ;;  %4860 = vmatprep.subr.mxu1 %v5301_v1 }
 0x15f   : > { %4872 = vmatprep.mubr.msk.f32.mxu1 %vm5302_vm1, %v5301_v1  ;;  %4861 = vmatpush3.msra.mxu1 %v4224_v52  ;;  %v4234_v52 = vld [vmem:[%s6489_s2 + $0xa8] sm:$0xff] }
 0x160   : > { %4862 = vmatprep.subr.mxu1 %v5301_v1 }
 0x161   : > { %4863 = vmatpush3.msra.mxu1 %v4223_v54  ;;  %v4232_v54 = vld [vmem:[%s6489_s2 + $0x98] sm:$0xff] }
 0x162   : > { %4864 = vmatprep.subr.mxu1 %v5301_v1 }
 0x163   : > { %4865 = vmatpush3.msra.mxu1 %v4222_v56  ;;  %v4230_v56 = vld [vmem:[%s6489_s2 + $0x88] sm:$0xff] }
 0x164   : > { %4866 = vmatprep.subr.mxu1 %v5301_v1 }
 0x165   : > { %4867 = vmatpush3.msra.mxu1 %v4221_v58 }
 0x166   : > { %4868 = vmatprep.subr.mxu1 %v5301_v1 }
 0x167   : > { %4869 = vmatpush3.msra.mxu1 %v4220_v60  ;;  %v1925_v60 = vld [vmem:[%s6461_s11 + $0x38] sm:$0xff] }
 0x168   : > { %4870 = vmatprep.subr.mxu1 %v5301_v1 }
 0x169   : > { %4871 = vmatpush3.msra.mxu1 %v4219_v62  ;;  %v1924_v62 = vld [vmem:[%s6461_s11 + $0x30] sm:$0xff] }
 0x16a   : > { %4894 = vmatprep.subr.mxu1 %v5301_v1 }
 0x1e9   : > { %v4764_v0 = vpop.f32.mrf.mxu1 }
 0x1ea   : > { %v4852_v11 = vpop.f32.mrf.mxu0 }
 0x1eb   : > { %v1133_v2 = vpop.f32.mrf.mxu1 }
 0x1ec   : > { %v1568_v18 = vpop.f32.mrf.mxu0 }
 0x1f6   : > { %v4767_v3 = vpop.f32.mrf.mxu1 }
 0x1f7   : > { %v4855_v25 = vpop.f32.mrf.mxu0  ;;  %v1922_v3 = vld [vmem:[%s6461_s11 + $0x20] sm:$0xff] }
 0x1f8   : > { %v1143_v4 = vpop.f32.mrf.mxu1 }
 0x1f9   : > { %v1578_v34 = vpop.f32.mrf.mxu0 }
 0x1fa   : > { %v4786_v40 = vpop.f32.mrf.mxu1 }
 0x1fb   : > { %v1236_v39 = vadd.f32 %v4786_v40, %v4764_v0  ;;  %v1923_v0 = vld [vmem:[%s6461_s11 + $0x28] sm:$0xff]  ;;  %v1921_v40 = vld [vmem:[%s6461_s11 + $0x18] sm:$0xff] }
 0x1fc   : > { %v1230_v5 = vpop.f32.mrf.mxu1 }
 0x1fd   : > { %v1231_v13 = vadd.f32 %v1230_v5, %v1133_v2  ;;  %v4245_v2 = vld [vmem:[%s6461_s11 + $0x60] sm:$0xff]  ;;  %v4243_v5 = vld [vmem:[%s6461_s11 + $0x50] sm:$0xff] }
 0x1fe   : > { %v4789_v6 = vpop.f32.mrf.mxu1 }
 0x1ff   : > { %v1920_v6 = vld [vmem:[%s6461_s11 + $0x10] sm:$0xff] }
 0x200   : > { %v1240_v7 = vpop.f32.mrf.mxu1 }
 0x201   : > { %v1241_v22 = vadd.f32 %v1240_v7, %v1143_v4  ;;  %v4244_v4 = vld [vmem:[%s6461_s11 + $0x58] sm:$0xff]  ;;  %v4242_v7 = vld [vmem:[%s6461_s11 + $0x48] sm:$0xff] }
 0x20a   : > { %v4808_v8 = vpop.f32.mrf.mxu1 }
 0x20b   : > { %v1360_v14 = vadd.f32 %v4808_v8, %v1236_v39  ;;  %v1919_v8 = vld [vmem:[%s6461_s11 + $0x8] sm:$0xff] }
 0x20c   : > { %v1340_v9 = vpop.f32.mrf.mxu1 }
 0x20d   : > { %v1359_v16 = vadd.f32 %v1340_v9, %v1231_v13  ;;  %v4241_v9 = vld [vmem:[%s6461_s11 + $0x40] sm:$0xff] }
 0x20e   : > { %v4811_v10 = vpop.f32.mrf.mxu1 }
 0x20f   : > { %v1918_v10 = vld [vmem:[%s6461_s11] sm:$0xff] }
 0x210   : > { %v1350_v12 = vpop.f32.mrf.mxu1 }
 0x211   : > { %v1361_v27 = vadd.f32 %v1350_v12, %v1241_v22 }
 0x21a   : > { %v4830_v15 = vpop.f32.mrf.mxu1 }
 0x21b   : > { %v1474_v17 = vadd.f32 %v4830_v15, %v1360_v14 }
 0x21c   : > { %v1454_v21 = vpop.f32.mrf.mxu1 }
 0x21d   : > { %v1588_v23 = vadd.f32 %v4852_v11, %v1474_v17  ;;  %v1473_v24 = vadd.f32 %v1454_v21, %v1359_v16  ;;  %v4238_v16 = vld [vmem:[%s6491_s28] ss:$0 sm:$0xff] }
 0x21e   : > { %v4833_v26 = vpop.f32.mrf.mxu1 }
 0x21f   : > { %v1599_v28 = vadd.f32 %v4218_v19, %v1588_v23  ;;  %v1587_v29 = vadd.f32 %v1568_v18, %v1473_v24 }
 0x220   : > { %v1464_v30 = vpop.f32.mrf.mxu1 }
 0x221   : > { %v1603_v31 = vmax.f32 %v1599_v28, 0.0  ;;  %v1598_v32 = vadd.f32 %v4218_v19, %v1587_v29  ;;  %v1475_v33 = vadd.f32 %v1464_v30, %v1361_v27 }
 0x223   : > { %1607 = vst.msk [vmem:[#allocation3 + $0x8] sm:$0xff] %vm965_vm3, %v1603_v31  ;;  %v1602_v35 = vmax.f32 %v1598_v32, 0.0  ;;  %v1589_v36 = vadd.f32 %v1578_v34, %v1475_v33  ;;  %v4239_v33 = vld [vmem:[%s6462_s12] ss:$0 sm:$0xff] }
 0x225   : > { %1606 = vst.msk [vmem:[#allocation3] sm:$0xff] %vm965_vm3, %v1602_v35  ;;  %v1600_v37 = vadd.f32 %v4218_v19, %v1589_v36  ;;  %v4240_v35 = vld [vmem:[%s6463_s13] ss:$0 sm:$0xff] }
 0x227   : > { %v1604_v38 = vmax.f32 %v1600_v37, 0.0 }
 0x229   : > { %1608 = vst.msk [vmem:[#allocation3 + $0x10] sm:$0xff] %vm965_vm3, %v1604_v38 }
 0x230   : > { %v1611_v41 = vld [vmem:[#allocation3] ss:$4 sm:$0x3f]  ;;  %v1613_v42 = vld [vmem:[#allocation3 + $0x1] ss:$4 sm:$0x3f] }
 0x231   : > { %v1614_v43 = vmax.f32 %v1611_v41, %v1613_v42  ;;  %v1616_v44 = vld [vmem:[#allocation3 + $0x2] ss:$4 sm:$0x3f]  ;;  %v1619_v46 = vld [vmem:[#allocation3 + $0x3] ss:$4 sm:$0x3f] }
 0x232   : > { %v4258_v41 = vld [vmem:[%s6461_s11 + $0xb8] sm:$0xff] }
 0x233   : > { %v1617_v45 = vmax.f32 %v1614_v43, %v1616_v44  ;;  %v4257_v44 = vld [vmem:[%s6461_s11 + $0xb0] sm:$0xff] }
 0x235   : > { %v1620_v47 = vmax.f32 %v1617_v45, %v1619_v46  ;;  %v4256_v45 = vld [vmem:[%s6461_s11 + $0xa8] sm:$0xff]  ;;  %v4255_v46 = vld [vmem:[%s6461_s11 + $0xa0] sm:$0xff] }
 0x237   : > { %1622 = vst.msk [vmem:[#allocation6] sm:$0x3f] %vm1621_vm7, %v1620_v47  ;;  %v4254_v47 = vld [vmem:[%s6461_s11 + $0x98] sm:$0xff] }
 0x23e   : > { %v1632_v49 = vld [vmem:[#allocation6 + $0x1] sm:$0xf] }
 0x23f   : > { %v1623_v50 = vld [vmem:[#allocation6] sm:$0xf]  ;;  %4873 = vmatmul.mubr.msk.f32.vlgmr.msra.gmra.mxu1 %vm965_vm3, %v1632_v49  ;;  %v4252_v49 = vld [vmem:[%s6461_s11 + $0x88] sm:$0xff] }
 0x240   : > { %4892 = vmatmul.mubr.msk.f32.vlgmr.msra.gmra.mxu0 %vm965_vm3, %v1623_v50  ;;  %4895 = vmatpush3.msra.mxu1 %v4236_v48  ;;  %v1788_v58 = vld [vmem:[#allocation6 + $0x2] sm:$0xf]  ;;  %v4253_v48 = vld [vmem:[%s6461_s11 + $0x90] sm:$0xff] }
 0x241   : > { %4910 = vmatprep.mubr.msk.f32.mxu1 %vm5302_vm1, %v5301_v1  ;;  %4896 = vmatprep.subr.mxu1 %v5301_v1  ;;  %v4251_v50 = vld [vmem:[%s6461_s11 + $0x80] sm:$0xff] }
 0x242   : > { %4929 = vmatprep.mubr.msk.f32.mxu0 %vm5302_vm1, %v5301_v1  ;;  %4897 = vmatpush3.msra.mxu1 %v4235_v51 }
 0x243   : > { %4898 = vmatprep.subr.mxu1 %v5301_v1  ;;  %4914 = vmatpush3.msra.mxu0 %v4248_v59  ;;  %v2166_v59 = vld [vmem:[%s6458_s8] sm:$0x3f] }
 0x244   : > { %4899 = vmatpush3.msra.mxu1 %v4234_v52  ;;  %4915 = vmatprep.subr.mxu0 %v5301_v1 }
 0x245   : > { %4900 = vmatprep.subr.mxu1 %v5301_v1  ;;  %4916 = vmatpush3.msra.mxu0 %v4247_v61  ;;  %v4271_v61 = vld [vmem:[%s6464_s14 + $0x78] sm:$0xff] }
 0x246   : > { %4901 = vmatpush3.msra.mxu1 %v4233_v53  ;;  %4917 = vmatprep.subr.mxu0 %v5301_v1 }
 0x247   : > { %4902 = vmatprep.subr.mxu1 %v5301_v1  ;;  %4918 = vmatpush3.msra.mxu0 %v4246_v63  ;;  %v4270_v63 = vld [vmem:[%s6464_s14 + $0x70] sm:$0xff] }
 0x248   : > { %4903 = vmatpush3.msra.mxu1 %v4232_v54  ;;  %4919 = vmatprep.subr.mxu0 %v5301_v1 }
 0x249   : > { %4904 = vmatprep.subr.mxu1 %v5301_v1  ;;  %4920 = vmatpush3.msra.mxu0 %v4245_v2  ;;  %v4269_v2 = vld [vmem:[%s6464_s14 + $0x68] sm:$0xff] }
 0x24a   : > { %4905 = vmatpush3.msra.mxu1 %v4231_v55  ;;  %4921 = vmatprep.subr.mxu0 %v5301_v1 }
 0x24b   : > { %4906 = vmatprep.subr.mxu1 %v5301_v1  ;;  %4922 = vmatpush3.msra.mxu0 %v4244_v4  ;;  %v4268_v4 = vld [vmem:[%s6464_s14 + $0x60] sm:$0xff] }
 0x24c   : > { %4907 = vmatpush3.msra.mxu1 %v4230_v56  ;;  %4923 = vmatprep.subr.mxu0 %v5301_v1 }
 0x24d   : > { %4908 = vmatprep.subr.mxu1 %v5301_v1  ;;  %4924 = vmatpush3.msra.mxu0 %v4243_v5  ;;  %v4267_v5 = vld [vmem:[%s6464_s14 + $0x58] sm:$0xff] }
 0x24e   : > { %4909 = vmatpush3.msra.mxu1 %v4229_v57  ;;  %4925 = vmatprep.subr.mxu0 %v5301_v1 }
 0x24f   : > { %4911 = vmatmul.mubr.msk.f32.vlgmr.msra.gmra.mxu1 %vm965_vm3, %v1788_v58  ;;  %4932 = vmatprep.subr.mxu1 %v5301_v1 }
 0x250   : > { %4948 = vmatprep.mubr.msk.f32.mxu1 %vm5302_vm1, %v5301_v1  ;;  %4933 = vmatpush3.msra.mxu1 %v1925_v60 }
 0x251   : > { %4934 = vmatprep.subr.mxu1 %v5301_v1  ;;  %4926 = vmatpush3.msra.mxu0 %v4242_v7  ;;  %v4266_v7 = vld [vmem:[%s6464_s14 + $0x50] sm:$0xff] }
 0x252   : > { %4935 = vmatpush3.msra.mxu1 %v1924_v62  ;;  %4927 = vmatprep.subr.mxu0 %v5301_v1  ;;  %v2274_v62 = vld [vmem:[%s6464_s14 + $0x38] sm:$0xff] }
 0x253   : > { %4936 = vmatprep.subr.mxu1 %v5301_v1  ;;  %4928 = vmatpush3.msra.mxu0 %v4241_v9  ;;  %v4265_v9 = vld [vmem:[%s6464_s14 + $0x48] sm:$0xff] }
 0x254   : > { %4937 = vmatpush3.msra.mxu1 %v1923_v0  ;;  %4951 = vmatprep.subr.mxu0 %v5301_v1  ;;  %v2273_v0 = vld [vmem:[%s6464_s14 + $0x30] sm:$0xff] }
 0x255   : > { %4938 = vmatprep.subr.mxu1 %v5301_v1 }
 0x256   : > { %4939 = vmatpush3.msra.mxu1 %v1922_v3  ;;  %v2272_v3 = vld [vmem:[%s6464_s14 + $0x28] sm:$0xff] }
 0x257   : > { %4940 = vmatprep.subr.mxu1 %v5301_v1 }
 0x258   : > { %4941 = vmatpush3.msra.mxu1 %v1921_v40  ;;  %v2271_v40 = vld [vmem:[%s6464_s14 + $0x20] sm:$0xff] }
 0x259   : > { %4942 = vmatprep.subr.mxu1 %v5301_v1 }
 0x25a   : > { %4943 = vmatpush3.msra.mxu1 %v1920_v6  ;;  %v2270_v6 = vld [vmem:[%s6464_s14 + $0x18] sm:$0xff] }
 0x25b   : > { %4944 = vmatprep.subr.mxu1 %v5301_v1 }
 0x25c   : > { %4945 = vmatpush3.msra.mxu1 %v1919_v8  ;;  %v2269_v8 = vld [vmem:[%s6464_s14 + $0x10] sm:$0xff] }
 0x25d   : > { %4946 = vmatprep.subr.mxu1 %v5301_v1 }
 0x25e   : > { %4947 = vmatpush3.msra.mxu1 %v1918_v10  ;;  %v2268_v10 = vld [vmem:[%s6464_s14 + $0x8] sm:$0xff] }
 0x25f   : > { %4970 = vmatprep.subr.mxu1 %v5301_v1 }
 0x2ff   : > { %v1711_v39 = vpop.f32.mrf.mxu1 }
 0x300   : > { %v1784_v11 = vpop.f32.mrf.mxu0 }
 0x301   : > { %v4874_v12 = vpop.f32.mrf.mxu1  ;;  %v1785_v14 = vadd.f32 %v1784_v11, %v1711_v39  ;;  %v4264_v39 = vld [vmem:[%s6464_s14 + $0x40] sm:$0xff] }
 0x302   : > { %v4893_v13 = vpop.f32.mrf.mxu0  ;;  %v2267_v11 = vld [vmem:[%s6464_s14] sm:$0xff] }
 0x303   : > { %v2167_v12 = vld [vmem:[#allocation6] sm:$0x3f] }
 0x30f   : > { %v1867_v15 = vpop.f32.mrf.mxu1 }
 0x310   : > { %v1871_v17 = vadd.f32 %v1867_v15, %v1785_v14  ;;  %v4262_v14 = vld [vmem:[%s6465_s15] ss:$0 sm:$0xff] }
 0x311   : > { %v4912_v18 = vpop.f32.mrf.mxu1 }
 0x312   : > { %v1879_v19 = vadd.f32 %v4238_v16, %v1871_v17  ;;  %v4263_v16 = vld [vmem:[%s6466_s16] ss:$0 sm:$0xff] }
 0x314   : > { %v1880_v21 = vmax.f32 %v1879_v19, 0.0 }
 0x316   : > { %1881 = vst.msk [vmem:[#allocation4] sm:$0xf] %vm980_vm4, %v1880_v21 }
 0x31d   : > { %v1882_v22 = vld [vmem:[#allocation4] ss:$2 sm:$0x3]  ;;  %v1884_v23 = vld [vmem:[#allocation4 + $0x1] ss:$2 sm:$0x3] }
 0x31e   : > { %v1885_v24 = vmax.f32 %v1882_v22, %v1884_v23  ;;  %v4281_v22 = vld [vmem:[%s6464_s14 + $0xb8] sm:$0xff] }
 0x320   : > { %v1887_v25 = vsel %vm1886_vm8, %v1885_v24, 0.0 }
 0x321   : > { %v1888_v26 = vrot.slane %v1887_v25, 4 }
 0x323   : > { %v1889_v27 = vadd.f32 %v1888_v26, %v1887_v25  ;;  %v4280_v25 = vld [vmem:[%s6464_s14 + $0xb0] sm:$0xff]  ;;  %v4279_v26 = vld [vmem:[%s6464_s14 + $0xa8] sm:$0xff] }
 0x325   : > { %v1890_v28 = vrot.slane %v1889_v27, 2 }
 0x327   : > { %v1891_v29 = vadd.f32 %v1890_v28, %v1889_v27  ;;  %v4278_v27 = vld [vmem:[%s6464_s14 + $0xa0] sm:$0xff]  ;;  %v4277_v28 = vld [vmem:[%s6464_s14 + $0x98] sm:$0xff] }
 0x329   : > { %v1892_v30 = vrot.slane %v1891_v29, 1 }
 0x32b   : > { %v1893_v31 = vadd.f32 %v1892_v30, %v1891_v29  ;;  %v4276_v29 = vld [vmem:[%s6464_s14 + $0x90] sm:$0xff]  ;;  %v4275_v30 = vld [vmem:[%s6464_s14 + $0x88] sm:$0xff] }
 0x32d   : > { %v1895_v32 = vmul.f32 0.5, %v1893_v31  ;;  %v4274_v31 = vld [vmem:[%s6464_s14 + $0x80] sm:$0xff] }
 0x32f   : > { %v1896_v34 = vadd.f32 %v1895_v32, %v1885_v24 }
 0x331   : > { %v1904_v36 = vmul.f32 %v4239_v33, %v1896_v34  ;;  %v2515_v33 = vld [vmem:[%s6459_s9] sm:$0xff] }
 0x333   : > { %v1912_v37 = vadd.f32 %v4240_v35, %v1904_v36 }
 0x335   : > { %v1913_v38 = vmax.f32 %v1912_v37, 0.0 }
 0x337   : > { %1916 = vst.msk [vmem:[#allocation7 + $0x1] sm:$0x3] %vm1886_vm8, %v1913_v38 }
 0x33e   : > { %v1926_v42 = vld [vmem:[#allocation7 + $0x1] sm:$0x3] }
 0x33f   : > { %v1917_v43 = vld [vmem:[#allocation7] sm:$0x3]  ;;  %4930 = vmatmul.mubr.msk.f32.vlgmr.msra.gmra.mxu0 %vm965_vm3, %v1926_v42  ;;  %v2082_v51 = vld [vmem:[#allocation7 + $0x2] sm:$0x3] }
 0x340   : > { %4949 = vmatmul.mubr.msk.f32.vlgmr.msra.gmra.mxu1 %vm965_vm3, %v1917_v43  ;;  %4952 = vmatpush3.msra.mxu0 %v4258_v41 }
 0x341   : > { %4967 = vmatprep.mubr.msk.f32.mxu0 %vm5302_vm1, %v5301_v1  ;;  %4953 = vmatprep.subr.mxu0 %v5301_v1 }
 0x342   : > { %4972 = vmatprep.mubr.msk.f32.mxu1 %vm5302_vm1, %v5301_v1  ;;  %4954 = vmatpush3.msra.mxu0 %v4257_v44  ;;  %v2516_v44 = vld [vmem:[%s6459_s9 + $0x8] sm:$0xff] }
 0x343   : > { %4955 = vmatprep.subr.mxu0 %v5301_v1 }
 0x344   : > { %4956 = vmatpush3.msra.mxu0 %v4256_v45  ;;  %v2517_v45 = vld [vmem:[%s6459_s9 + $0x10] sm:$0xff] }
 0x345   : > { %4957 = vmatprep.subr.mxu0 %v5301_v1 }
 0x346   : > { %4958 = vmatpush3.msra.mxu0 %v4255_v46  ;;  %v2518_v46 = vld [vmem:[%s6459_s9 + $0x18] sm:$0x1f] }
 0x347   : > { %4959 = vmatprep.subr.mxu0 %v5301_v1 }
 0x348   : > { %4960 = vmatpush3.msra.mxu0 %v4254_v47  ;;  %v4297_v47 = vld [vmem:[%s6467_s17 + $0x78] sm:$0xff] }
 0x349   : > { %4961 = vmatprep.subr.mxu0 %v5301_v1 }
 0x34a   : > { %4962 = vmatpush3.msra.mxu0 %v4253_v48  ;;  %v2668_v48 = vld [vmem:[%s6467_s17 + $0x38] sm:$0xff] }
 0x34b   : > { %4963 = vmatprep.subr.mxu0 %v5301_v1 }
 0x34c   : > { %4964 = vmatpush3.msra.mxu0 %v4252_v49  ;;  %v4296_v49 = vld [vmem:[%s6467_s17 + $0x70] sm:$0xff] }
 0x34d   : > { %4965 = vmatprep.subr.mxu0 %v5301_v1 }
 0x34e   : > { %4966 = vmatpush3.msra.mxu0 %v4251_v50  ;;  %v2667_v50 = vld [vmem:[%s6467_s17 + $0x30] sm:$0xff] }
 0x34f   : > { %4968 = vmatmul.mubr.msk.f32.vlgmr.msra.gmra.mxu0 %vm965_vm3, %v2082_v51  ;;  %4994 = vmatprep.subr.mxu0 %v5301_v1  ;;  %v4295_v51 = vld [vmem:[%s6467_s17 + $0x68] sm:$0xff] }
 0x350   : > { %5010 = vmatprep.mubr.msk.f32.mxu0 %vm5302_vm1, %v5301_v1  ;;  %4995 = vmatpush3.msra.mxu0 %v2274_v62  ;;  %v2661_v62 = vld [vmem:[%s6467_s17] sm:$0xff] }
 0x351   : > { %4996 = vmatprep.subr.mxu0 %v5301_v1 }
 0x352   : > { %4997 = vmatpush3.msra.mxu0 %v2273_v0 }
 0x353   : > { %4998 = vmatprep.subr.mxu0 %v5301_v1 }
 0x354   : > { %4999 = vmatpush3.msra.mxu0 %v2272_v3 }
 0x355   : > { %5000 = vmatprep.subr.mxu0 %v5301_v1 }
 0x356   : > { %5001 = vmatpush3.msra.mxu0 %v2271_v40 }
 0x357   : > { %5002 = vmatprep.subr.mxu0 %v5301_v1 }
 0x358   : > { %5003 = vmatpush3.msra.mxu0 %v2270_v6  ;;  %v5291_v6 = vld [vmem:[#allocation5] sm:$0xff] }
 0x359   : > { %5004 = vmatprep.subr.mxu0 %v5301_v1 }
 0x35a   : > { %5005 = vmatpush3.msra.mxu0 %v2269_v8  ;;  %v2522_v8 = vld [vmem:[#allocation5 + $0x18] sm:$0x1f] }
 0x35b   : > { %5006 = vmatprep.subr.mxu0 %v5301_v1 }
 0x35c   : > { %5007 = vmatpush3.msra.mxu0 %v2268_v10 }
 0x35d   : > { %5008 = vmatprep.subr.mxu0 %v5301_v1 }
 0x35e   : > { %5009 = vmatpush3.msra.mxu0 %v2267_v11 }
 0x35f   : > { %5040 = vmatprep.subr.mxu0 %v4297_v47 }
 0x3ff   : > { %v2005_v52 = vpop.f32.mrf.mxu0 }
 0x400   : > { %v2078_v53 = vpop.f32.mrf.mxu1 }
 0x401   : > { %v4931_v54 = vpop.f32.mrf.mxu0  ;;  %v2079_v56 = vadd.f32 %v2078_v53, %v2005_v52  ;;  %v2666_v52 = vld [vmem:[%s6467_s17 + $0x28] sm:$0xff]  ;;  %v4294_v53 = vld [vmem:[%s6467_s17 + $0x60] sm:$0xff] }
 0x402   : > { %v4950_v55 = vpop.f32.mrf.mxu1  ;;  %v2665_v54 = vld [vmem:[%s6467_s17 + $0x20] sm:$0xff] }
 0x403   : > { %v4293_v55 = vld [vmem:[%s6467_s17 + $0x58] sm:$0xff] }
 0x40f   : > { %v2161_v57 = vpop.f32.mrf.mxu0 }
 0x410   : > { %v2165_v58 = vadd.f32 %v2161_v57, %v2079_v56  ;;  %v2664_v56 = vld [vmem:[%s6467_s17 + $0x18] sm:$0xff]  ;;  %v4292_v57 = vld [vmem:[%s6467_s17 + $0x50] sm:$0xff] }
 0x411   : > { %v4969_v60 = vpop.f32.mrf.mxu0 }
 0x412   : > { %4971 = vmatpush3.msk.msra.mxu1 %vm2172_vm9, %v2165_v58  ;;  %v2663_v58 = vld [vmem:[%s6467_s17 + $0x10] sm:$0xff]  ;;  %v2662_v60 = vld [vmem:[%s6467_s17 + $0x8] sm:$0xff] }
 0x413   : > { %4973 = vmatmul.mubr.msk.f32.vlgmr.msra.gmra.mxu1 %vm2168_vm10, %v2166_v59  ;;  %4975 = vmatprep.subr.mxu1 %v5301_v1  ;;  %v4291_v59 = vld [vmem:[%s6467_s17 + $0x48] sm:$0xff] }
 0x414   : > { %4991 = vmatprep.mubr.msk.f32.mxu1 %vm5302_vm1, %v5301_v1  ;;  %4976 = vmatpush3.msra.mxu1 %v4271_v61  ;;  %v4290_v61 = vld [vmem:[%s6467_s17 + $0x40] sm:$0xff] }
 0x415   : > { %4977 = vmatprep.subr.mxu1 %v5301_v1 }
 0x416   : > { %4978 = vmatpush3.msra.mxu1 %v4270_v63  ;;  %v4313_v63 = vld [vmem:[%s6467_s17 + $0xb8] sm:$0xff] }
 0x417   : > { %4979 = vmatprep.subr.mxu1 %v5301_v1 }
 0x418   : > { %4980 = vmatpush3.msra.mxu1 %v4269_v2  ;;  %v4288_v2 = vld [vmem:[%s6468_s18] ss:$0 sm:$0xff] }
 0x419   : > { %4981 = vmatprep.subr.mxu1 %v5301_v1 }
 0x41a   : > { %4982 = vmatpush3.msra.mxu1 %v4268_v4  ;;  %v4289_v4 = vld [vmem:[%s6469_s19] ss:$0 sm:$0xff] }
 0x41b   : > { %4983 = vmatprep.subr.mxu1 %v5301_v1 }
 0x41c   : > { %4984 = vmatpush3.msra.mxu1 %v4267_v5 }
 0x41d   : > { %4985 = vmatprep.subr.mxu1 %v5301_v1 }
 0x41e   : > { %4986 = vmatpush3.msra.mxu1 %v4266_v7 }
 0x41f   : > { %4987 = vmatprep.subr.mxu1 %v5301_v1 }
 0x420   : > { %4988 = vmatpush3.msra.mxu1 %v4265_v9 }
 0x421   : > { %4989 = vmatprep.subr.mxu1 %v5301_v1 }
 0x422   : > { %4990 = vmatpush3.msra.mxu1 %v4264_v39 }
 0x423   : > { %5013 = vmatprep.subr.mxu1 %v5301_v1 }
 0x4d3   : > { %v2242_v13 = vpop.f32.mrf.mxu1 }
 0x4d4   : > { %v2243_v15 = vadd.f32 %v2242_v13, %v2167_v12 }
 0x4d5   : > { %v4974_v17 = vpop.f32.mrf.mxu1 }
 0x4d6   : > { %v2253_v18 = vmul.f32 %v4262_v14, %v2243_v15 }
 0x4d8   : > { %v2261_v19 = vadd.f32 %v4263_v16, %v2253_v18  ;;  %v5292_v16 = vld [vmem:[#allocation5 + $0x10] sm:$0xff] }
 0x4da   : > { %v2262_v21 = vmax.f32 %v2261_v19, 0.0 }
 0x4dc   : > { %2265 = vst.msk [vmem:[#allocation8 + $0x1] sm:$0x3f] %vm1621_vm7, %v2262_v21 }
 0x4e3   : > { %v2275_v23 = vld [vmem:[#allocation8 + $0x1] sm:$0x3f] }
 0x4e4   : > { %v2266_v24 = vld [vmem:[#allocation8] sm:$0x3f]  ;;  %4992 = vmatmul.mubr.msk.f32.vlgmr.msra.gmra.mxu1 %vm965_vm3, %v2275_v23 }
 0x4e5   : > { %5011 = vmatmul.mubr.msk.f32.vlgmr.msra.gmra.mxu0 %vm965_vm3, %v2266_v24  ;;  %5014 = vmatpush3.msra.mxu1 %v4281_v22  ;;  %v2431_v32 = vld [vmem:[#allocation8 + $0x2] sm:$0x3f] }
 0x4e6   : > { %5029 = vmatprep.mubr.msk.f32.mxu1 %vm5302_vm1, %v5301_v1  ;;  %5015 = vmatprep.subr.mxu1 %v5301_v1  ;;  %vm3285_vm1 = vcmask 31744  }
 0x4e7   : > { %5016 = vmatpush3.msra.mxu1 %v4280_v25  ;;  %5041 = vmatpush3.msra.mxu0 %v4297_v47 }
 0x4e8   : > { %5017 = vmatprep.subr.mxu1 %v5301_v1  ;;  %5042 = vmatprep.subr.mxu0 %v4296_v49 }
 0x4e9   : > { %5018 = vmatpush3.msra.mxu1 %v4279_v26  ;;  %5043 = vmatpush3.msra.mxu0 %v4296_v49 }
 0x4ea   : > { %5019 = vmatprep.subr.mxu1 %v5301_v1  ;;  %5044 = vmatprep.subr.mxu0 %v4295_v51 }
 0x4eb   : > { %5020 = vmatpush3.msra.mxu1 %v4278_v27  ;;  %5045 = vmatpush3.msra.mxu0 %v4295_v51 }
 0x4ec   : > { %5021 = vmatprep.subr.mxu1 %v5301_v1  ;;  %5046 = vmatprep.subr.mxu0 %v4294_v53 }
 0x4ed   : > { %5022 = vmatpush3.msra.mxu1 %v4277_v28  ;;  %5047 = vmatpush3.msra.mxu0 %v4294_v53  ;;  %v4312_v28 = vld [vmem:[%s6467_s17 + $0xb0] sm:$0xff] }
 0x4ee   : > { %5023 = vmatprep.subr.mxu1 %v5301_v1  ;;  %5048 = vmatprep.subr.mxu0 %v4293_v55 }
 0x4ef   : > { %5024 = vmatpush3.msra.mxu1 %v4276_v29  ;;  %5049 = vmatpush3.msra.mxu0 %v4293_v55  ;;  %v4311_v29 = vld [vmem:[%s6467_s17 + $0xa8] sm:$0xff] }
 0x4f0   : > { %5025 = vmatprep.subr.mxu1 %v5301_v1  ;;  %5050 = vmatprep.subr.mxu0 %v4292_v57 }
 0x4f1   : > { %5026 = vmatpush3.msra.mxu1 %v4275_v30  ;;  %5051 = vmatpush3.msra.mxu0 %v4292_v57 }
 0x4f2   : > { %5027 = vmatprep.subr.mxu1 %v5301_v1  ;;  %5052 = vmatprep.subr.mxu0 %v4291_v59  ;;  %v6257_v1 = vld [vmem:[%s6470_s20 + $0x8] sm:$0xf] }
 0x4f3   : > { %5028 = vmatpush3.msra.mxu1 %v4274_v31  ;;  %5053 = vmatpush3.msra.mxu0 %v4291_v59 }
 0x4f4   : > { %5030 = vmatmul.mubr.msk.f32.vlgmr.msra.gmra.mxu1 %vm965_vm3, %v2431_v32  ;;  %5054 = vmatprep.subr.mxu0 %v4290_v61 }
 0x4f5   : > { %5034 = vmatprep.mubr.msk.f32.mxu1 %vm2523_vm11, %v2515_v33  ;;  %5055 = vmatpush3.msra.mxu0 %v4290_v61 }
 0x4f6   : > { %5084 = vmatprep.subr.mxu0 %v4313_v63 }
 0x5a4   : > { %v2354_v34 = vpop.f32.mrf.mxu1 }
 0x5a5   : > { %v2427_v35 = vpop.f32.mrf.mxu0 }
 0x5a6   : > { %v4993_v36 = vpop.f32.mrf.mxu1  ;;  %v2428_v38 = vadd.f32 %v2427_v35, %v2354_v34  ;;  %v4310_v34 = vld [vmem:[%s6467_s17 + $0xa0] sm:$0xff] }
 0x5a7   : > { %v5012_v37 = vpop.f32.mrf.mxu0  ;;  %v4309_v36 = vld [vmem:[%s6467_s17 + $0x98] sm:$0xff] }
 0x5a8   : > { %v4308_v37 = vld [vmem:[%s6467_s17 + $0x90] sm:$0xff] }
 0x5b4   : > { %v2510_v41 = vpop.f32.mrf.mxu1 }
 0x5b5   : > { %v2514_v42 = vadd.f32 %v2510_v41, %v2428_v38  ;;  %v4307_v38 = vld [vmem:[%s6467_s17 + $0x88] sm:$0xff]  ;;  %v4306_v41 = vld [vmem:[%s6467_s17 + $0x80] sm:$0xff] }
 0x5b6   : > { %v5031_v43 = vpop.f32.mrf.mxu1 }
 0x5b7   : > { %5032 = vmatprep.subr.msk.mxu1 %vm2536_vm12, %v2514_v42 }
 0x5b8   : > { %5033 = vmatpush3.msk.msra.mxu1 %vm2536_vm12, %v2514_v42 }
 0x5b9   : > { %5035 = vmatmul.mubr.msk.f32.vlgmr.msra.gmra.mxu1 %vm2523_vm11, %v2516_v44  ;;  %5062 = vmatprep.subr.mxu1 %v2668_v48 }
 0x5ba   : > { %5037 = vmatprep.mubr.msk.f32.mxu1 %vm2523_vm11, %v2517_v45  ;;  %5063 = vmatpush3.msra.mxu1 %v2668_v48  ;;  %v2990_v45 = vld [vmem:[%s6460_s10] sm:$0xff] }
 0x5bb   : > { %5064 = vmatprep.subr.mxu1 %v2667_v50 }
 0x5bc   : > { %5065 = vmatpush3.msra.mxu1 %v2667_v50 }
 0x5bd   : > { %5038 = vmatmul.mubr.msk.f32.gmra.mxu1 %vm2523_vm11, %v2518_v46  ;;  %5066 = vmatprep.subr.mxu1 %v2666_v52 }
 0x5be   : > { %5067 = vmatpush3.msra.mxu1 %v2666_v52 }
 0x5bf   : > { %5068 = vmatprep.subr.mxu1 %v2665_v54 }
 0x5c0   : > { %5069 = vmatpush3.msra.mxu1 %v2665_v54 }
 0x5c1   : > { %5070 = vmatprep.subr.mxu1 %v2664_v56 }
 0x5c2   : > { %5071 = vmatpush3.msra.mxu1 %v2664_v56 }
 0x5c3   : > { %5072 = vmatprep.subr.mxu1 %v2663_v58 }
 0x5c4   : > { %5073 = vmatpush3.msra.mxu1 %v2663_v58 }
 0x5c5   : > { %5074 = vmatprep.subr.mxu1 %v2662_v60 }
 0x5c6   : > { %5075 = vmatpush3.msra.mxu1 %v2662_v60 }
 0x5c7   : > { %5076 = vmatprep.subr.mxu1 %v2661_v62 }
 0x5c8   : > { %5077 = vmatpush3.msra.mxu1 %v2661_v62 }
 0x679   : > { %v5036_v0 = vpop.f32.mrf.mxu1 }
 0x67a   : > { %v2612_v3 = vadd.f32 %v5036_v0, %v5656_v20 }
 0x67b   : > { %v2606_v40 = vpop.f32.mrf.mxu1 }
 0x67c   : > { %v2633_v5 = vmul.f32 %v4288_v2, %v2612_v3  ;;  %v2607_v7 = vadd.f32 %v5291_v6, %v2606_v40  ;;  %v2991_v3 = vld [vmem:[%s6460_s10 + $0x8] sm:$0xff]  ;;  %v2993_v40 = vld [vmem:[%s6460_s10 + $0x18] sm:$0xff] }
 0x67d   : > { %v5039_v9 = vpop.f32.mrf.mxu1  ;;  %v2995_v6 = vld [vmem:[%s6460_s10 + $0x28] sm:$0xff] }
 0x67e   : > { %v2644_v10 = vadd.f32 %v4289_v4, %v2633_v5  ;;  %v2632_v39 = vmul.f32 %v4288_v2, %v2607_v7  ;;  %v2622_v11 = vadd.f32 %v5039_v9, %v2522_v8  ;;  %v2994_v5 = vld [vmem:[%s6460_s10 + $0x20] sm:$0xff]  ;;  %v2996_v7 = vld [vmem:[%s6460_s10 + $0x30] sm:$0xff]  ;;  %v2997_v8 = vld [vmem:[%s6460_s10 + $0x38] sm:$0xff] }
 0x67f   : > { %v2616_v12 = vpop.f32.mrf.mxu1  ;;  %v2998_v9 = vld [vmem:[%s6460_s10 + $0x40] sm:$0xff] }
 0x680   : > { %v2648_v13 = vmax.f32 %v2644_v10, 0.0  ;;  %v2643_v14 = vadd.f32 %v4289_v4, %v2632_v39  ;;  %v2635_v15 = vmul.f32 %v4288_v2, %v2622_v11  ;;  %v2617_v17 = vadd.f32 %v5292_v16, %v2616_v12  ;;  %v2999_v10 = vld [vmem:[%s6460_s10 + $0x48] sm:$0xff]  ;;  %v3000_v39 = vld [vmem:[%s6460_s10 + $0x50] sm:$0xff]  ;;  %v3001_v11 = vld [vmem:[%s6460_s10 + $0x58] sm:$0xff] }
 0x681   : > { %v3002_v12 = vld [vmem:[%s6460_s10 + $0x60] sm:$0xff] }
 0x682   : > { %2654 = vst.msk [vmem:[#allocation9 + $0x9] sm:$0xff] %vm965_vm3, %v2648_v13  ;;  %v2647_v20 = vmax.f32 %v2643_v14, 0.0  ;;  %v2646_v18 = vadd.f32 %v4289_v4, %v2635_v15  ;;  %v2634_v19 = vmul.f32 %v4288_v2, %v2617_v17  ;;  %v3003_v13 = vld [vmem:[%s6460_s10 + $0x68] sm:$0xff]  ;;  %v3004_v14 = vld [vmem:[%s6460_s10 + $0x70] sm:$0xff]  ;;  %v3005_v15 = vld [vmem:[%s6460_s10 + $0x78] sm:$0xff] }
 0x683   : > { %v4337_v16 = vld [vmem:[%s6470_s20 + $0x4] sm:$0xf]  ;;  %v3318_v17 = vld [vmem:[%s6470_s20] sm:$0xf] }
 0x684   : > { %2653 = vst.msk [vmem:[#allocation9 + $0x1] sm:$0xff] %vm965_vm3, %v2647_v20  ;;  %v2650_v21 = vmax.f32 %v2646_v18, 0.0  ;;  %v2645_v22 = vadd.f32 %v4289_v4, %v2634_v19  ;;  %v2992_v4 = vld [vmem:[%s6460_s10 + $0x10] sm:$0xff]  ;;  %v3007_v20 = vld [vmem:[%s6267_s6 + $0x8] sm:$0xff]  ;;  %v6273_v19 = vld [vmem:[%s6471_s21] ss:$0 sm:$0xff] }
 0x686   : > { %2656 = vst.msk [vmem:[#allocation9 + $0x19] sm:$0x1f] %vm1028_vm5, %v2650_v21  ;;  %v2649_v23 = vmax.f32 %v2645_v22, 0.0  ;;  %v3006_v21 = vld [vmem:[%s6267_s6] sm:$0xff] }
 0x688   : > { %2655 = vst.msk [vmem:[#allocation9 + $0x11] sm:$0xff] %vm965_vm3, %v2649_v23  ;;  %v6279_v23 = vld [vmem:[%s6472_s22] ss:$0 sm:$0xff] }
 0x689   : > { %v2670_v27 = vld [vmem:[#allocation9 + $0x9] sm:$0xff] }
 0x68b   : > { %v2669_v24 = vld [vmem:[#allocation9 + $0x1] sm:$0xff] }
 0x68c   : > { %v2657_v25 = vld [vmem:[#allocation9] sm:$0xff]  ;;  %v2658_v26 = vld [vmem:[#allocation9 + $0x8] sm:$0xff]  ;;  %5056 = vmatprep.mubr.msk.f32.mxu0 %vm965_vm3, %v2669_v24 }
 0x68d   : > { %5078 = vmatprep.mubr.msk.f32.mxu1 %vm965_vm3, %v2657_v25  ;;  %5057 = vmatmul.mubr.msk.f32.vlgmr.msra.gmra.mxu0 %vm965_vm3, %v2670_v27  ;;  %v2672_v33 = vld [vmem:[#allocation9 + $0x19] sm:$0x1f]  ;;  %v2876_v35 = vld [vmem:[#allocation9 + $0x2] sm:$0xff] }
 0x68e   : > { %5079 = vmatmul.mubr.msk.f32.vlgmr.msra.gmra.mxu1 %vm965_vm3, %v2658_v26  ;;  %5085 = vmatpush3.msra.mxu0 %v4313_v63  ;;  %v2879_v44 = vld [vmem:[#allocation9 + $0x1a] sm:$0x1f]  ;;  %v3009_v25 = vld [vmem:[%s6267_s6 + $0x18] sm:$0xff] }
 0x68f   : > { %5086 = vmatprep.subr.mxu0 %v4312_v28  ;;  %v2671_v30 = vld [vmem:[#allocation9 + $0x11] sm:$0xff] }
 0x690   : > { %v2659_v31 = vld [vmem:[#allocation9 + $0x10] sm:$0xff]  ;;  %v2660_v32 = vld [vmem:[#allocation9 + $0x18] sm:$0x1f]  ;;  %5087 = vmatpush3.msra.mxu0 %v4312_v28  ;;  %5059 = vmatprep.mubr.msk.f32.mxu0 %vm965_vm3, %v2671_v30 }
 0x691   : > { %5081 = vmatprep.mubr.msk.f32.mxu1 %vm965_vm3, %v2659_v31  ;;  %5088 = vmatprep.subr.mxu0 %v4311_v29  ;;  %v2877_v42 = vld [vmem:[#allocation9 + $0xa] sm:$0xff]  ;;  %v2878_v43 = vld [vmem:[#allocation9 + $0x12] sm:$0xff] }
 0x692   : > { %5060 = vmatmul.mubr.msk.f32.gmra.mxu0 %vm965_vm3, %v2672_v33  ;;  %5082 = vmatmul.mubr.msk.f32.gmra.mxu1 %vm965_vm3, %v2660_v32 }
 0x693   : > { %5089 = vmatpush3.msra.mxu0 %v4311_v29  ;;  %5100 = vmatprep.mubr.msk.f32.mxu0 %vm965_vm3, %v2876_v35  ;;  %v3008_v29 = vld [vmem:[%s6267_s6 + $0x10] sm:$0xff] }
 0x694   : > { %5090 = vmatprep.subr.mxu0 %v4310_v34  ;;  %5114 = vmatprep.mubr.msk.f32.mxu1 %vm3022_vm13, %v2990_v45 }
 0x695   : > { %5091 = vmatpush3.msra.mxu0 %v4310_v34  ;;  %v3011_v34 = vld [vmem:[%s6267_s6 + $0x28] sm:$0xff] }
 0x696   : > { %5092 = vmatprep.subr.mxu0 %v4309_v36 }
 0x697   : > { %5093 = vmatpush3.msra.mxu0 %v4309_v36 }
 0x698   : > { %5094 = vmatprep.subr.mxu0 %v4308_v37 }
 0x699   : > { %5095 = vmatpush3.msra.mxu0 %v4308_v37 }
 0x69a   : > { %5096 = vmatprep.subr.mxu0 %v4307_v38 }
 0x69b   : > { %5097 = vmatpush3.msra.mxu0 %v4307_v38 }
 0x69c   : > { %5098 = vmatprep.subr.mxu0 %v4306_v41 }
 0x69d   : > { %5099 = vmatpush3.msra.mxu0 %v4306_v41 }
 0x69e   : > { %5101 = vmatmul.mubr.msk.f32.vlgmr.msra.gmra.mxu0 %vm965_vm3, %v2877_v42  ;;  %5138 = vmatprep.subr.msk.mxu0 %vm806_vm0, %v4337_v16  ;;  %v3010_v42 = vld [vmem:[%s6267_s6 + $0x20] sm:$0xff] }
 0x69f   : > { %5103 = vmatprep.mubr.msk.f32.mxu0 %vm965_vm3, %v2878_v43  ;;  %5139 = vmatpush3.msk.msra.mxu0 %vm806_vm0, %v4337_v16 }
 0x6a0   : > { %5190 = vmatprep.subr.msk.mxu0 %vm806_vm0, %v6257_v1 }
 0x6a2   : > { %5104 = vmatmul.mubr.msk.f32.gmra.mxu0 %vm965_vm3, %v2879_v44 }
 0x74d   : > { %v5058_v46 = vpop.f32.mrf.mxu0 }
 0x74e   : > { %v5080_v47 = vpop.f32.mrf.mxu1 }
 0x74f   : > { %v2760_v48 = vpop.f32.mrf.mxu0  ;;  %v2863_v61 = vadd.f32 %v5080_v47, %v5058_v46 }
 0x750   : > { %v2857_v49 = vpop.f32.mrf.mxu1 }
 0x751   : > { %v2858_v63 = vadd.f32 %v2857_v49, %v2760_v48  ;;  %v3013_v48 = vld [vmem:[%s6267_s6 + $0x38] sm:$0xff] }
 0x752   : > { %v5061_v50 = vpop.f32.mrf.mxu0  ;;  %v5083_v51 = vpop.f32.mrf.mxu1 }
 0x753   : > { %v2873_v56 = vadd.f32 %v5083_v51, %v5061_v50 }
 0x754   : > { %v2770_v52 = vpop.f32.mrf.mxu0  ;;  %v2867_v54 = vpop.f32.mrf.mxu1 }
 0x755   : > { %v2868_v58 = vadd.f32 %v2867_v54, %v2770_v52  ;;  %v3012_v54 = vld [vmem:[%s6267_s6 + $0x30] sm:$0xff] }
 0x75e   : > { %v5102_v53 = vpop.f32.mrf.mxu0 }
 0x75f   : > { %v2987_v0 = vadd.f32 %v5102_v53, %v2863_v61 }
 0x760   : > { %v2967_v55 = vpop.f32.mrf.mxu0 }
 0x761   : > { %v2986_v2 = vadd.f32 %v2967_v55, %v2858_v63 }
 0x762   : > { %v5105_v57 = vpop.f32.mrf.mxu0 }
 0x763   : > { %v2989_v59 = vadd.f32 %v5105_v57, %v2873_v56 }
 0x764   : > { %v2977_v60 = vpop.f32.mrf.mxu0 }
 0x765   : > { %v2988_v62 = vadd.f32 %v2977_v60, %v2868_v58  ;;  %5106 = vmatprep.subr.msk.mxu1 %vm3071_vm14, %v2989_v59  ;;  %v3015_v60 = vld [vmem:[%s6267_s6 + $0x48] sm:$0xff] }
 0x766   : > { %5107 = vmatpush3.msk.msra.mxu1 %vm3071_vm14, %v2989_v59 }
 0x767   : > { %5108 = vmatprep.subr.mxu1 %v2988_v62 }
 0x768   : > { %5109 = vmatpush3.msra.mxu1 %v2988_v62 }
 0x769   : > { %5110 = vmatprep.subr.mxu1 %v2987_v0 }
 0x76a   : > { %5111 = vmatpush3.msra.mxu1 %v2987_v0 }
 0x76b   : > { %5112 = vmatprep.subr.mxu1 %v2986_v2 }
 0x76c   : > { %5113 = vmatpush3.msra.mxu1 %v2986_v2 }
 0x76d   : > { %5115 = vmatmul.mubr.msk.f32.vlgmr.msra.gmra.mxu1 %vm3022_vm13, %v2991_v3  ;;  %5164 = vmatprep.subr.msk.mxu1 %vm806_vm0, %v3318_v17  ;;  %v3014_v3 = vld [vmem:[%s6267_s6 + $0x40] sm:$0xff] }
 0x76e   : > { %5117 = vmatprep.mubr.msk.f32.mxu1 %vm3022_vm13, %v2992_v4  ;;  %5165 = vmatpush3.msk.msra.mxu1 %vm806_vm0, %v3318_v17  ;;  %v3016_v17 = vld [vmem:[%s6267_s6 + $0x50] sm:$0xff] }
 0x771   : > { %5118 = vmatmul.mubr.msk.f32.gmra.mxu1 %vm3022_vm13, %v2993_v40 }
 0x772   : > { %5120 = vmatprep.mubr.msk.f32.mxu1 %vm3022_vm13, %v2994_v5 }
 0x775   : > { %5121 = vmatmul.mubr.msk.f32.gmra.mxu1 %vm3022_vm13, %v2995_v6 }
 0x776   : > { %5123 = vmatprep.mubr.msk.f32.mxu1 %vm3022_vm13, %v2996_v7  ;;  %v3017_v7 = vld [vmem:[%s6267_s6 + $0x58] sm:$0xff] }
 0x779   : > { %5124 = vmatmul.mubr.msk.f32.gmra.mxu1 %vm3022_vm13, %v2997_v8 }
 0x77a   : > { %5126 = vmatprep.mubr.msk.f32.mxu1 %vm3022_vm13, %v2998_v9 }
 0x77d   : > { %5127 = vmatmul.mubr.msk.f32.gmra.mxu1 %vm3022_vm13, %v2999_v10 }
 0x77e   : > { %5129 = vmatprep.mubr.msk.f32.mxu1 %vm3022_vm13, %v3000_v39 }
 0x781   : > { %5130 = vmatmul.mubr.msk.f32.gmra.mxu1 %vm3022_vm13, %v3001_v11 }
 0x782   : > { %5132 = vmatprep.mubr.msk.f32.mxu1 %vm3022_vm13, %v3002_v12 }
 0x785   : > { %5133 = vmatmul.mubr.msk.f32.gmra.mxu1 %vm3022_vm13, %v3003_v13 }
 0x786   : > { %5135 = vmatprep.mubr.msk.f32.mxu1 %vm3022_vm13, %v3004_v14 }
 0x789   : > { %5136 = vmatmul.mubr.msk.f32.gmra.mxu1 %vm3022_vm13, %v3005_v15 }
 0x82d   : > { %v5116_v18 = vpop.f32.mrf.mxu1 }
 0x82e   : > { %v3147_v22 = vadd.f32 %v5116_v18, %v3007_v20 }
 0x82f   : > { %v3141_v24 = vpop.f32.mrf.mxu1 }
 0x830   : > { %v3228_v26 = vmul.f32 %v6273_v19, %v3147_v22  ;;  %v3142_v27 = vadd.f32 %v3141_v24, %v3006_v21  ;;  %v3019_v24 = vld [vmem:[%s6267_s6 + $0x68] sm:$0xff] }
 0x831   : > { %v5119_v28 = vpop.f32.mrf.mxu1 }
 0x832   : > { %v3251_v30 = vadd.f32 %v6279_v23, %v3228_v26  ;;  %v3227_v31 = vmul.f32 %v6273_v19, %v3142_v27  ;;  %v3157_v32 = vadd.f32 %v5119_v28, %v3009_v25 }
 0x833   : > { %v3151_v33 = vpop.f32.mrf.mxu1 }
 0x834   : > { %v3267_v35 = vmax.f32 %v3251_v30, 0.0  ;;  %v3250_v36 = vadd.f32 %v6279_v23, %v3227_v31  ;;  %v3230_v37 = vmul.f32 %v6273_v19, %v3157_v32  ;;  %v3152_v38 = vadd.f32 %v3151_v33, %v3008_v29 }
 0x835   : > { %v5122_v41 = vpop.f32.mrf.mxu1 }
 0x836   : > { %3287 = vst.msk [vmem:[#allocation10 + $0x9] sm:$0xff] %vm3285_vm1, %v3267_v35  ;;  %v3266_v43 = vmax.f32 %v3250_v36, 0.0  ;;  %v3253_v44 = vadd.f32 %v6279_v23, %v3230_v37  ;;  %v3229_v45 = vmul.f32 %v6273_v19, %v3152_v38  ;;  %v3167_v46 = vadd.f32 %v5122_v41, %v3011_v34  ;;  %v3018_v34 = vld [vmem:[%s6267_s6 + $0x60] sm:$0xff]  ;;  %v3021_v41 = vld [vmem:[%s6267_s6 + $0x78] sm:$0xff] }
 0x837   : > { %v3161_v47 = vpop.f32.mrf.mxu1 }
 0x838   : > { %3286 = vst.msk [vmem:[#allocation10 + $0x1] sm:$0xff] %vm3285_vm1, %v3266_v43  ;;  %v3269_v49 = vmax.f32 %v3253_v44, 0.0  ;;  %v3252_v50 = vadd.f32 %v6279_v23, %v3229_v45  ;;  %v3232_v51 = vmul.f32 %v6273_v19, %v3167_v46  ;;  %v3162_v52 = vadd.f32 %v3161_v47, %v3010_v42 }
 0x839   : > { %v5125_v53 = vpop.f32.mrf.mxu1 }
 0x83a   : > { %3289 = vst.msk [vmem:[#allocation10 + $0x19] sm:$0xff] %vm3285_vm1, %v3269_v49  ;;  %v3268_v55 = vmax.f32 %v3252_v50, 0.0  ;;  %v3255_v56 = vadd.f32 %v6279_v23, %v3232_v51  ;;  %v3231_v57 = vmul.f32 %v6273_v19, %v3162_v52  ;;  %v3177_v58 = vadd.f32 %v5125_v53, %v3013_v48  ;;  %v3020_v52 = vld [vmem:[%s6267_s6 + $0x70] sm:$0xff] }
 0x83b   : > { %v3171_v59 = vpop.f32.mrf.mxu1 }
 0x83c   : > { %3288 = vst.msk [vmem:[#allocation10 + $0x11] sm:$0xff] %vm3285_vm1, %v3268_v55  ;;  %v3271_v61 = vmax.f32 %v3255_v56, 0.0  ;;  %v3254_v62 = vadd.f32 %v6279_v23, %v3231_v57  ;;  %v3234_v63 = vmul.f32 %v6273_v19, %v3177_v58  ;;  %v3172_v0 = vadd.f32 %v3171_v59, %v3012_v54 }
 0x83d   : > { %v5128_v2 = vpop.f32.mrf.mxu1  ;;  %v3320_v15 = vld [vmem:[#allocation10 + $0x9] sm:$0xff] }
 0x83e   : > { %3291 = vst.msk [vmem:[#allocation10 + $0x29] sm:$0xff] %vm3285_vm1, %v3271_v61  ;;  %v3270_v4 = vmax.f32 %v3254_v62, 0.0  ;;  %v3257_v40 = vadd.f32 %v6279_v23, %v3234_v63  ;;  %v3233_v5 = vmul.f32 %v6273_v19, %v3172_v0  ;;  %v3187_v6 = vadd.f32 %v5128_v2, %v3015_v60 }
 0x83f   : > { %v3181_v8 = vpop.f32.mrf.mxu1  ;;  %v3319_v9 = vld [vmem:[#allocation10 + $0x1] sm:$0xff] }
 0x840   : > { %v3302_v10 = vld [vmem:[#allocation10] sm:$0xff]  ;;  %v3303_v39 = vld [vmem:[#allocation10 + $0x8] sm:$0xff]  ;;  %3290 = vst.msk [vmem:[#allocation10 + $0x21] sm:$0xff] %vm3285_vm1, %v3270_v4  ;;  %v3273_v11 = vmax.f32 %v3257_v40, 0.0  ;;  %v3256_v12 = vadd.f32 %v6279_v23, %v3233_v5  ;;  %v3236_v13 = vmul.f32 %v6273_v19, %v3187_v6  ;;  %v3182_v14 = vadd.f32 %v3181_v8, %v3014_v3  ;;  %5140 = vmatprep.mubr.msk.f32.mxu0 %vm3285_vm1, %v3319_v9 }
 0x841   : > { %5166 = vmatprep.mubr.msk.f32.mxu1 %vm3285_vm1, %v3302_v10  ;;  %v5131_v16 = vpop.f32.mrf.mxu1  ;;  %5141 = vmatmul.mubr.msk.f32.vlgmr.msra.gmra.mxu0 %vm3285_vm1, %v3320_v15 }
 0x842   : > { %5167 = vmatmul.mubr.msk.f32.vlgmr.msra.gmra.mxu1 %vm3285_vm1, %v3303_v39  ;;  %3293 = vst.msk [vmem:[#allocation10 + $0x39] sm:$0xff] %vm3285_vm1, %v3273_v11  ;;  %v3272_v20 = vmax.f32 %v3256_v12, 0.0  ;;  %v3259_v18 = vadd.f32 %v6279_v23, %v3236_v13  ;;  %v3235_v21 = vmul.f32 %v6273_v19, %v3182_v14  ;;  %v3197_v22 = vadd.f32 %v5131_v16, %v3017_v7 }
 0x843   : > { %5191 = vmatpush3.msk.msra.mxu0 %vm806_vm0, %v6257_v1  ;;  %v3191_v25 = vpop.f32.mrf.mxu1  ;;  %v3321_v26 = vld [vmem:[#allocation10 + $0x11] sm:$0xff]  ;;  %v3322_v1 = vld [vmem:[#allocation10 + $0x19] sm:$0xff]  ;;  %vm4055_vm0 = vcmask 7168  }
 0x844   : > { %v3304_v27 = vld [vmem:[#allocation10 + $0x10] sm:$0xff]  ;;  %v3305_v28 = vld [vmem:[#allocation10 + $0x18] sm:$0xff]  ;;  %3292 = vst.msk [vmem:[#allocation10 + $0x31] sm:$0xff] %vm3285_vm1, %v3272_v20  ;;  %v3275_v29 = vmax.f32 %v3259_v18, 0.0  ;;  %v3258_v30 = vadd.f32 %v6279_v23, %v3235_v21  ;;  %v3238_v31 = vmul.f32 %v6273_v19, %v3197_v22  ;;  %v3192_v32 = vadd.f32 %v3191_v25, %v3016_v17  ;;  %5143 = vmatprep.mubr.msk.f32.mxu0 %vm3285_vm1, %v3321_v26  ;;  %v3729_v22 = vld [vmem:[#allocation10 + $0x2] sm:$0xff] }
 0x845   : > { %5169 = vmatprep.mubr.msk.f32.mxu1 %vm3285_vm1, %v3304_v27  ;;  %v5134_v33 = vpop.f32.mrf.mxu1  ;;  %5144 = vmatmul.mubr.msk.f32.gmra.mxu0 %vm3285_vm1, %v3322_v1  ;;  %v3324_v50 = vld [vmem:[#allocation10 + $0x29] sm:$0xff]  ;;  %v3731_v25 = vld [vmem:[#allocation10 + $0x12] sm:$0xff] }
 0x846   : > { %5170 = vmatmul.mubr.msk.f32.gmra.mxu1 %vm3285_vm1, %v3305_v28  ;;  %3295 = vst.msk [vmem:[#allocation10 + $0x49] sm:$0xff] %vm3285_vm1, %v3275_v29  ;;  %v3274_v35 = vmax.f32 %v3258_v30, 0.0  ;;  %v3261_v36 = vadd.f32 %v6279_v23, %v3238_v31  ;;  %v3237_v37 = vmul.f32 %v6273_v19, %v3192_v32  ;;  %v3207_v38 = vadd.f32 %v5134_v33, %v3019_v24  ;;  %v3730_v24 = vld [vmem:[#allocation10 + $0xa] sm:$0xff] }
 0x847   : > { %v3201_v42 = vpop.f32.mrf.mxu1  ;;  %v3323_v43 = vld [vmem:[#allocation10 + $0x21] sm:$0xff] }
 0x848   : > { %v3306_v44 = vld [vmem:[#allocation10 + $0x20] sm:$0xff]  ;;  %v3307_v45 = vld [vmem:[#allocation10 + $0x28] sm:$0xff]  ;;  %3294 = vst.msk [vmem:[#allocation10 + $0x41] sm:$0xff] %vm3285_vm1, %v3274_v35  ;;  %v3277_v46 = vmax.f32 %v3261_v36, 0.0  ;;  %v3260_v47 = vadd.f32 %v6279_v23, %v3237_v37  ;;  %v3240_v48 = vmul.f32 %v6273_v19, %v3207_v38  ;;  %v3202_v49 = vadd.f32 %v3201_v42, %v3018_v34  ;;  %5146 = vmatprep.mubr.msk.f32.mxu0 %vm3285_vm1, %v3323_v43 }
 0x849   : > { %5172 = vmatprep.mubr.msk.f32.mxu1 %vm3285_vm1, %v3306_v44  ;;  %v5137_v51 = vpop.f32.mrf.mxu1  ;;  %5147 = vmatmul.mubr.msk.f32.gmra.mxu0 %vm3285_vm1, %v3324_v50  ;;  %v3326_v2 = vld [vmem:[#allocation10 + $0x39] sm:$0xff]  ;;  %v3733_v27 = vld [vmem:[#allocation10 + $0x22] sm:$0xff] }
 0x84a   : > { %5173 = vmatmul.mubr.msk.f32.gmra.mxu1 %vm3285_vm1, %v3307_v45  ;;  %3297 = vst.msk [vmem:[#allocation10 + $0x59] sm:$0xff] %vm3285_vm1, %v3277_v46  ;;  %v3276_v53 = vmax.f32 %v3260_v47, 0.0  ;;  %v3263_v54 = vadd.f32 %v6279_v23, %v3240_v48  ;;  %v3239_v55 = vmul.f32 %v6273_v19, %v3202_v49  ;;  %v3217_v56 = vadd.f32 %v5137_v51, %v3021_v41  ;;  %v3732_v26 = vld [vmem:[#allocation10 + $0x1a] sm:$0xff] }
 0x84b   : > { %v3211_v57 = vpop.f32.mrf.mxu1  ;;  %v3325_v58 = vld [vmem:[#allocation10 + $0x31] sm:$0xff] }
 0x84c   : > { %v3308_v59 = vld [vmem:[#allocation10 + $0x30] sm:$0xff]  ;;  %v3309_v60 = vld [vmem:[#allocation10 + $0x38] sm:$0xff]  ;;  %3296 = vst.msk [vmem:[#allocation10 + $0x51] sm:$0xff] %vm3285_vm1, %v3276_v53  ;;  %v3279_v61 = vmax.f32 %v3263_v54, 0.0  ;;  %v3262_v62 = vadd.f32 %v6279_v23, %v3239_v55  ;;  %v3242_v63 = vmul.f32 %v6273_v19, %v3217_v56  ;;  %v3212_v0 = vadd.f32 %v3211_v57, %v3020_v52  ;;  %5149 = vmatprep.mubr.msk.f32.mxu0 %vm3285_vm1, %v3325_v58 }
 0x84d   : > { %5175 = vmatprep.mubr.msk.f32.mxu1 %vm3285_vm1, %v3308_v59  ;;  %5150 = vmatmul.mubr.msk.f32.gmra.mxu0 %vm3285_vm1, %v3326_v2  ;;  %v3328_v10 = vld [vmem:[#allocation10 + $0x49] sm:$0xff]  ;;  %v3735_v29 = vld [vmem:[#allocation10 + $0x32] sm:$0xff] }
 0x84e   : > { %5176 = vmatmul.mubr.msk.f32.gmra.mxu1 %vm3285_vm1, %v3309_v60  ;;  %3299 = vst.msk [vmem:[#allocation10 + $0x69] sm:$0xff] %vm3285_vm1, %v3279_v61  ;;  %v3278_v3 = vmax.f32 %v3262_v62, 0.0  ;;  %v3265_v4 = vadd.f32 %v6279_v23, %v3242_v63  ;;  %v3241_v40 = vmul.f32 %v6273_v19, %v3212_v0  ;;  %v3734_v28 = vld [vmem:[#allocation10 + $0x2a] sm:$0xff] }
 0x84f   : > { %v3327_v5 = vld [vmem:[#allocation10 + $0x41] sm:$0xff] }
 0x850   : > { %v3310_v6 = vld [vmem:[#allocation10 + $0x40] sm:$0xff]  ;;  %v3311_v7 = vld [vmem:[#allocation10 + $0x48] sm:$0xff]  ;;  %3298 = vst.msk [vmem:[#allocation10 + $0x61] sm:$0xff] %vm3285_vm1, %v3278_v3  ;;  %v3281_v8 = vmax.f32 %v3265_v4, 0.0  ;;  %v3264_v9 = vadd.f32 %v6279_v23, %v3241_v40  ;;  %5152 = vmatprep.mubr.msk.f32.mxu0 %vm3285_vm1, %v3327_v5 }
 0x851   : > { %5178 = vmatprep.mubr.msk.f32.mxu1 %vm3285_vm1, %v3310_v6  ;;  %5153 = vmatmul.mubr.msk.f32.gmra.mxu0 %vm3285_vm1, %v3328_v10  ;;  %v3330_v23 = vld [vmem:[#allocation10 + $0x59] sm:$0xff]  ;;  %v3737_v31 = vld [vmem:[#allocation10 + $0x42] sm:$0xff] }
 0x852   : > { %5179 = vmatmul.mubr.msk.f32.gmra.mxu1 %vm3285_vm1, %v3311_v7  ;;  %3301 = vst.msk [vmem:[#allocation10 + $0x79] sm:$0xff] %vm3285_vm1, %v3281_v8  ;;  %v3280_v19 = vmax.f32 %v3264_v9, 0.0  ;;  %v3736_v30 = vld [vmem:[#allocation10 + $0x3a] sm:$0xff] }
 0x853   : > { %v3329_v39 = vld [vmem:[#allocation10 + $0x51] sm:$0xff] }
 0x854   : > { %v3312_v11 = vld [vmem:[#allocation10 + $0x50] sm:$0xff]  ;;  %v3313_v12 = vld [vmem:[#allocation10 + $0x58] sm:$0xff]  ;;  %3300 = vst.msk [vmem:[#allocation10 + $0x71] sm:$0xff] %vm3285_vm1, %v3280_v19  ;;  %5155 = vmatprep.mubr.msk.f32.mxu0 %vm3285_vm1, %v3329_v39 }
 0x855   : > { %5181 = vmatprep.mubr.msk.f32.mxu1 %vm3285_vm1, %v3312_v11  ;;  %5156 = vmatmul.mubr.msk.f32.gmra.mxu0 %vm3285_vm1, %v3330_v23  ;;  %v3332_v16 = vld [vmem:[#allocation10 + $0x69] sm:$0xff]  ;;  %v3739_v1 = vld [vmem:[#allocation10 + $0x52] sm:$0xff] }
 0x856   : > { %5182 = vmatmul.mubr.msk.f32.gmra.mxu1 %vm3285_vm1, %v3313_v12  ;;  %v3738_v32 = vld [vmem:[#allocation10 + $0x4a] sm:$0xff] }
 0x857   : > { %v3331_v13 = vld [vmem:[#allocation10 + $0x61] sm:$0xff] }
 0x858   : > { %v3314_v14 = vld [vmem:[#allocation10 + $0x60] sm:$0xff]  ;;  %v3315_v15 = vld [vmem:[#allocation10 + $0x68] sm:$0xff]  ;;  %5158 = vmatprep.mubr.msk.f32.mxu0 %vm3285_vm1, %v3331_v13 }
 0x859   : > { %5184 = vmatprep.mubr.msk.f32.mxu1 %vm3285_vm1, %v3314_v14  ;;  %5159 = vmatmul.mubr.msk.f32.gmra.mxu0 %vm3285_vm1, %v3332_v16  ;;  %v3334_v21 = vld [vmem:[#allocation10 + $0x79] sm:$0xff]  ;;  %v3741_v34 = vld [vmem:[#allocation10 + $0x62] sm:$0xff] }
 0x85a   : > { %5185 = vmatmul.mubr.msk.f32.gmra.mxu1 %vm3285_vm1, %v3315_v15  ;;  %v3740_v33 = vld [vmem:[#allocation10 + $0x5a] sm:$0xff] }
 0x85b   : > { %v3333_v17 = vld [vmem:[#allocation10 + $0x71] sm:$0xff]  ;;  %v3744_v37 = vld [vmem:[#allocation10 + $0x7a] sm:$0xff] }
 0x85c   : > { %v3316_v20 = vld [vmem:[#allocation10 + $0x70] sm:$0xff]  ;;  %v3317_v18 = vld [vmem:[#allocation10 + $0x78] sm:$0xff]  ;;  %5161 = vmatprep.mubr.msk.f32.mxu0 %vm3285_vm1, %v3333_v17 }
 0x85d   : > { %5187 = vmatprep.mubr.msk.f32.mxu1 %vm3285_vm1, %v3316_v20  ;;  %5162 = vmatmul.mubr.msk.f32.gmra.mxu0 %vm3285_vm1, %v3334_v21  ;;  %v3742_v35 = vld [vmem:[#allocation10 + $0x6a] sm:$0xff]  ;;  %v3743_v36 = vld [vmem:[#allocation10 + $0x72] sm:$0xff] }
 0x85e   : > { %5188 = vmatmul.mubr.msk.f32.gmra.mxu1 %vm3285_vm1, %v3317_v18  ;;  %5192 = vmatprep.mubr.msk.f32.mxu0 %vm3285_vm1, %v3729_v22 }
 0x861   : > { %5193 = vmatmul.mubr.msk.f32.vlgmr.msra.gmra.mxu0 %vm3285_vm1, %v3730_v24 }
 0x862   : > { %5195 = vmatprep.mubr.msk.f32.mxu0 %vm3285_vm1, %v3731_v25 }
 0x865   : > { %5196 = vmatmul.mubr.msk.f32.gmra.mxu0 %vm3285_vm1, %v3732_v26 }
 0x866   : > { %5198 = vmatprep.mubr.msk.f32.mxu0 %vm3285_vm1, %v3733_v27 }
 0x869   : > { %5199 = vmatmul.mubr.msk.f32.gmra.mxu0 %vm3285_vm1, %v3734_v28 }
 0x86a   : > { %5201 = vmatprep.mubr.msk.f32.mxu0 %vm3285_vm1, %v3735_v29 }
 0x86d   : > { %5202 = vmatmul.mubr.msk.f32.gmra.mxu0 %vm3285_vm1, %v3736_v30 }
 0x86e   : > { %5204 = vmatprep.mubr.msk.f32.mxu0 %vm3285_vm1, %v3737_v31 }
 0x871   : > { %5205 = vmatmul.mubr.msk.f32.gmra.mxu0 %vm3285_vm1, %v3738_v32 }
 0x872   : > { %5207 = vmatprep.mubr.msk.f32.mxu0 %vm3285_vm1, %v3739_v1 }
 0x875   : > { %5208 = vmatmul.mubr.msk.f32.gmra.mxu0 %vm3285_vm1, %v3740_v33 }
 0x876   : > { %5210 = vmatprep.mubr.msk.f32.mxu0 %vm3285_vm1, %v3741_v34 }
 0x879   : > { %5211 = vmatmul.mubr.msk.f32.gmra.mxu0 %vm3285_vm1, %v3742_v35 }
 0x87a   : > { %5213 = vmatprep.mubr.msk.f32.mxu0 %vm3285_vm1, %v3743_v36 }
 0x87d   : > { %5214 = vmatmul.mubr.msk.f32.gmra.mxu0 %vm3285_vm1, %v3744_v37 }
 0x901   : > { %v5142_v38 = vpop.f32.mrf.mxu0 }
 0x902   : > { %v5168_v41 = vpop.f32.mrf.mxu1 }
 0x903   : > { %v3454_v42 = vpop.f32.mrf.mxu0  ;;  %v3656_v2 = vadd.f32 %v5168_v41, %v5142_v38 }
 0x904   : > { %v3650_v43 = vpop.f32.mrf.mxu1 }
 0x905   : > { %v5145_v44 = vpop.f32.mrf.mxu0  ;;  %v3651_v4 = vadd.f32 %v3650_v43, %v3454_v42 }
 0x906   : > { %v5171_v45 = vpop.f32.mrf.mxu1 }
 0x907   : > { %v3464_v46 = vpop.f32.mrf.mxu0  ;;  %v3666_v7 = vadd.f32 %v5171_v45, %v5145_v44 }
 0x908   : > { %v3660_v48 = vpop.f32.mrf.mxu1 }
 0x909   : > { %v5148_v47 = vpop.f32.mrf.mxu0  ;;  %v3661_v19 = vadd.f32 %v3660_v48, %v3464_v46 }
 0x90a   : > { %v5174_v51 = vpop.f32.mrf.mxu1 }
 0x90b   : > { %v3474_v49 = vpop.f32.mrf.mxu0  ;;  %v3676_v13 = vadd.f32 %v5174_v51, %v5148_v47 }
 0x90c   : > { %v3670_v54 = vpop.f32.mrf.mxu1 }
 0x90d   : > { %v5151_v50 = vpop.f32.mrf.mxu0  ;;  %v3671_v17 = vadd.f32 %v3670_v54, %v3474_v49 }
 0x90e   : > { %v5177_v57 = vpop.f32.mrf.mxu1 }
 0x90f   : > { %v3484_v52 = vpop.f32.mrf.mxu0  ;;  %v3686_v24 = vadd.f32 %v5177_v57, %v5151_v50 }
 0x910   : > { %v3680_v60 = vpop.f32.mrf.mxu1 }
 0x911   : > { %v5154_v53 = vpop.f32.mrf.mxu0  ;;  %v3681_v28 = vadd.f32 %v3680_v60, %v3484_v52 }
 0x912   : > { %v5180_v63 = vpop.f32.mrf.mxu1 }
 0x913   : > { %v3494_v55 = vpop.f32.mrf.mxu0  ;;  %v3696_v1 = vadd.f32 %v5180_v63, %v5154_v53 }
 0x914   : > { %v3690_v40 = vpop.f32.mrf.mxu1 }
 0x915   : > { %v5157_v56 = vpop.f32.mrf.mxu0  ;;  %v3691_v36 = vadd.f32 %v3690_v40, %v3494_v55 }
 0x916   : > { %v5183_v39 = vpop.f32.mrf.mxu1 }
 0x917   : > { %v6393_v58 = vpop.f32.mrf.mxu0  ;;  %v3706_v43 = vadd.f32 %v5183_v39, %v5157_v56 }
 0x918   : > { %v3700_v20 = vpop.f32.mrf.mxu1 }
 0x919   : > { %v6395_v59 = vpop.f32.mrf.mxu0  ;;  %v3701_v49 = vadd.f32 %v3700_v20, %v6393_v58 }
 0x91a   : > { %v5186_v29 = vpop.f32.mrf.mxu1 }
 0x91b   : > { %v6397_v61 = vpop.f32.mrf.mxu0  ;;  %v3716_v57 = vadd.f32 %v5186_v29, %v6395_v59 }
 0x91c   : > { %v3710_v37 = vpop.f32.mrf.mxu1 }
 0x91d   : > { %v6399_v62 = vpop.f32.mrf.mxu0 }
 0x91e   : > { %v5189_v51 = vpop.f32.mrf.mxu1 }
 0x91f   : > { %v6401_v0 = vpop.f32.mrf.mxu0 }
 0x920   : > { %v3720_v40 = vpop.f32.mrf.mxu1 }
 0x921   : > { %v5194_v3 = vpop.f32.mrf.mxu0 }
 0x922   : > { %v3944_v5 = vadd.f32 %v5194_v3, %v3656_v2 }
 0x923   : > { %v3864_v6 = vpop.f32.mrf.mxu0 }
 0x924   : > { %v4391_v8 = vmul.f32 -1.442695, %v3944_v5  ;;  %v3943_v9 = vadd.f32 %v3864_v6, %v3651_v4  ;;  %v3711_v4 = vadd.f32 %v3710_v37, %v6397_v61  ;;  %v3721_v61 = vadd.f32 %v3720_v40, %v6401_v0 }
 0x925   : > { %v5197_v10 = vpop.f32.mrf.mxu0 }
 0x926   : > { %5227 = vpow2.f32 %v4391_v8  ;;  %v4390_v11 = vmul.f32 -1.442695, %v3943_v9  ;;  %v3946_v12 = vadd.f32 %v5197_v10, %v3666_v7  ;;  %v3726_v9 = vadd.f32 %v5189_v51, %v6399_v62 }
 0x927   : > { %v3874_v23 = vpop.f32.mrf.mxu0 }
 0x928   : > { %5229 = vpow2.f32 %v4390_v11  ;;  %v4393_v14 = vmul.f32 -1.442695, %v3946_v12  ;;  %v3945_v15 = vadd.f32 %v3874_v23, %v3661_v19 }
 0x929   : > { %v5200_v16 = vpop.f32.mrf.mxu0 }
 0x92a   : > { %5231 = vpow2.f32 %v4393_v14  ;;  %v4392_v18 = vmul.f32 -1.442695, %v3945_v15  ;;  %v3948_v21 = vadd.f32 %v5200_v16, %v3676_v13 }
 0x92b   : > { %v3884_v22 = vpop.f32.mrf.mxu0 }
 0x92c   : > { %5233 = vpow2.f32 %v4392_v18  ;;  %v4395_v25 = vmul.f32 -1.442695, %v3948_v21  ;;  %v3947_v26 = vadd.f32 %v3884_v22, %v3671_v17 }
 0x92d   : > { %v5203_v27 = vpop.f32.mrf.mxu0 }
 0x92e   : > { %5235 = vpow2.f32 %v4395_v25  ;;  %v4394_v30 = vmul.f32 -1.442695, %v3947_v26  ;;  %v3950_v31 = vadd.f32 %v5203_v27, %v3686_v24 }
 0x92f   : > { %v3894_v32 = vpop.f32.mrf.mxu0 }
 0x930   : > { %5237 = vpow2.f32 %v4394_v30  ;;  %v4397_v33 = vmul.f32 -1.442695, %v3950_v31  ;;  %v3949_v34 = vadd.f32 %v3894_v32, %v3681_v28 }
 0x931   : > { %v5206_v35 = vpop.f32.mrf.mxu0 }
 0x932   : > { %5239 = vpow2.f32 %v4397_v33  ;;  %v4396_v38 = vmul.f32 -1.442695, %v3949_v34  ;;  %v3952_v41 = vadd.f32 %v5206_v35, %v3696_v1 }
 0x933   : > { %v5228_v42 = vpop.eup %5227  ;;  %v3904_v44 = vpop.f32.mrf.mxu0 }
 0x934   : > { %v4008_v45 = vadd.f32 1.0, %v5228_v42  ;;  %5241 = vpow2.f32 %v4396_v38  ;;  %v4399_v46 = vmul.f32 -1.442695, %v3952_v41  ;;  %v3951_v47 = vadd.f32 %v3904_v44, %v3691_v36 }
 0x935   : > { %v5230_v48 = vpop.eup %5229  ;;  %v5209_v50 = vpop.f32.mrf.mxu0 }
 0x936   : > { %5243 = vrcp.f32 %v4008_v45  ;;  %v4007_v52 = vadd.f32 1.0, %v5230_v48  ;;  %v4398_v53 = vmul.f32 -1.442695, %v3951_v47  ;;  %v3954_v54 = vadd.f32 %v5209_v50, %v3706_v43 }
 0x937   : > { %v5232_v55 = vpop.eup %5231  ;;  %5245 = vpow2.f32 %v4399_v46  ;;  %v3914_v60 = vpop.f32.mrf.mxu0 }
 0x938   : > { %5247 = vrcp.f32 %v4007_v52  ;;  %v4010_v56 = vadd.f32 1.0, %v5232_v55  ;;  %v4401_v63 = vmul.f32 -1.442695, %v3954_v54  ;;  %v3953_v2 = vadd.f32 %v3914_v60, %v3701_v49 }
 0x939   : > { %v5234_v3 = vpop.eup %5233  ;;  %5249 = vpow2.f32 %v4398_v53  ;;  %v5212_v58 = vpop.f32.mrf.mxu0 }
 0x93a   : > { %5251 = vrcp.f32 %v4010_v56  ;;  %v4009_v5 = vadd.f32 1.0, %v5234_v3  ;;  %v4400_v6 = vmul.f32 -1.442695, %v3953_v2  ;;  %v3956_v7 = vadd.f32 %v5212_v58, %v3716_v57 }
 0x93b   : > { %v5236_v8 = vpop.eup %5235  ;;  %5253 = vpow2.f32 %v4401_v63  ;;  %v3924_v59 = vpop.f32.mrf.mxu0 }
 0x93c   : > { %5255 = vrcp.f32 %v4009_v5  ;;  %v4012_v10 = vadd.f32 1.0, %v5236_v8  ;;  %v4403_v19 = vmul.f32 -1.442695, %v3956_v7  ;;  %v3955_v39 = vadd.f32 %v3924_v59, %v3711_v4 }
 0x93d   : > { %v5238_v11 = vpop.eup %5237  ;;  %5257 = vpow2.f32 %v4400_v6  ;;  %v5215_v12 = vpop.f32.mrf.mxu0 }
 0x93e   : > { %5259 = vrcp.f32 %v4012_v10  ;;  %v4011_v23 = vadd.f32 1.0, %v5238_v11  ;;  %v4402_v13 = vmul.f32 -1.442695, %v3955_v39  ;;  %v3958_v14 = vadd.f32 %v5215_v12, %v3726_v9 }
 0x93f   : > { %v5240_v15 = vpop.eup %5239  ;;  %5261 = vpow2.f32 %v4403_v19  ;;  %v3934_v16 = vpop.f32.mrf.mxu0 }
 0x940   : > { %5263 = vrcp.f32 %v4011_v23  ;;  %v4014_v62 = vadd.f32 1.0, %v5240_v15  ;;  %v4405_v17 = vmul.f32 -1.442695, %v3958_v14  ;;  %v3957_v20 = vadd.f32 %v3934_v16, %v3721_v61 }
 0x941   : > { %v5242_v18 = vpop.eup %5241  ;;  %5265 = vpow2.f32 %v4402_v13 }
 0x942   : > { %5267 = vrcp.f32 %v4014_v62  ;;  %v4013_v0 = vadd.f32 1.0, %v5242_v18  ;;  %v4404_v21 = vmul.f32 -1.442695, %v3957_v20 }
 0x943   : > { %v5244_v22 = vpop.eup %5243  ;;  %5269 = vpow2.f32 %v4405_v17 }
 0x944   : > { %v5246_v24 = vpop.eup %5245  ;;  %4057 = vst.msk [vmem:[%s6413_s1 + $0x8] sm:$0xff] %vm4055_vm0, %v5244_v22  ;;  %5271 = vrcp.f32 %v4013_v0 }
 0x945   : > { %v5248_v25 = vpop.eup %5247  ;;  %v4016_v26 = vadd.f32 1.0, %v5246_v24  ;;  %5273 = vpow2.f32 %v4404_v21 }
 0x946   : > { %v5250_v27 = vpop.eup %5249  ;;  %4056 = vst.msk [vmem:[%s6413_s1] sm:$0xff] %vm4055_vm0, %v5248_v25 }
 0x947   : > { %v5252_v28 = vpop.eup %5251  ;;  %5275 = vrcp.f32 %v4016_v26  ;;  %v4015_v29 = vadd.f32 1.0, %v5250_v27 }
 0x948   : > { %v5254_v30 = vpop.eup %5253  ;;  %4059 = vst.msk [vmem:[%s6413_s1 + $0x18] sm:$0xff] %vm4055_vm0, %v5252_v28 }
 0x949   : > { %v5256_v31 = vpop.eup %5255  ;;  %5277 = vrcp.f32 %v4015_v29  ;;  %v4018_v32 = vadd.f32 1.0, %v5254_v30 }
 0x94a   : > { %v5258_v1 = vpop.eup %5257  ;;  %4058 = vst.msk [vmem:[%s6413_s1 + $0x10] sm:$0xff] %vm4055_vm0, %v5256_v31 }
 0x94b   : > { %v5260_v33 = vpop.eup %5259  ;;  %5279 = vrcp.f32 %v4018_v32  ;;  %v4017_v34 = vadd.f32 1.0, %v5258_v1 }
 0x94c   : > { %v5262_v35 = vpop.eup %5261  ;;  %4061 = vst.msk [vmem:[%s6413_s1 + $0x28] sm:$0xff] %vm4055_vm0, %v5260_v33 }
 0x94d   : > { %v5264_v36 = vpop.eup %5263  ;;  %5281 = vrcp.f32 %v4017_v34  ;;  %v4020_v37 = vadd.f32 1.0, %v5262_v35 }
 0x94e   : > { %v5266_v38 = vpop.eup %5265  ;;  %4060 = vst.msk [vmem:[%s6413_s1 + $0x20] sm:$0xff] %vm4055_vm0, %v5264_v36 }
 0x94f   : > { %v5268_v41 = vpop.eup %5267  ;;  %5283 = vrcp.f32 %v4020_v37  ;;  %v4019_v42 = vadd.f32 1.0, %v5266_v38 }
 0x950   : > { %v5270_v43 = vpop.eup %5269  ;;  %4063 = vst.msk [vmem:[%s6413_s1 + $0x38] sm:$0xff] %vm4055_vm0, %v5268_v41 }
 0x951   : > { %v5272_v44 = vpop.eup %5271  ;;  %5285 = vrcp.f32 %v4019_v42  ;;  %v4022_v45 = vadd.f32 1.0, %v5270_v43 }
 0x952   : > { %v5274_v46 = vpop.eup %5273  ;;  %4062 = vst.msk [vmem:[%s6413_s1 + $0x30] sm:$0xff] %vm4055_vm0, %v5272_v44 }
 0x953   : > { %5287 = vrcp.f32 %v4022_v45  ;;  %v4021_v47 = vadd.f32 1.0, %v5274_v46 }
 0x954   : > { %v5276_v48 = vpop.eup %5275 }
 0x955   : > { %4065 = vst.msk [vmem:[%s6413_s1 + $0x48] sm:$0xff] %vm4055_vm0, %v5276_v48  ;;  %5289 = vrcp.f32 %v4021_v47 }
 0x956   : > { %v5278_v49 = vpop.eup %5277 }
 0x957   : > { %4064 = vst.msk [vmem:[%s6413_s1 + $0x40] sm:$0xff] %vm4055_vm0, %v5278_v49 }
 0x958   : > { %v5280_v50 = vpop.eup %5279 }
 0x959   : > { %4067 = vst.msk [vmem:[%s6413_s1 + $0x58] sm:$0xff] %vm4055_vm0, %v5280_v50 }
 0x95a   : > { %v5282_v51 = vpop.eup %5281 }
 0x95b   : > { %4066 = vst.msk [vmem:[%s6413_s1 + $0x50] sm:$0xff] %vm4055_vm0, %v5282_v51 }
 0x95c   : > { %v5284_v52 = vpop.eup %5283 }
 0x95d   : > { %4069 = vst.msk [vmem:[%s6413_s1 + $0x68] sm:$0xff] %vm4055_vm0, %v5284_v52 }
 0x95e   : > { %v5286_v53 = vpop.eup %5285 }
 0x95f   : > { %4068 = vst.msk [vmem:[%s6413_s1 + $0x60] sm:$0xff] %vm4055_vm0, %v5286_v53 }
 0x960   : > { %v5288_v54 = vpop.eup %5287 }
 0x961   : > { %4071 = vst.msk [vmem:[%s6413_s1 + $0x78] sm:$0xff] %vm4055_vm0, %v5288_v54 }
 0x962   : > { %v5290_v55 = vpop.eup %5289 }
 0x963   : > { %4070 = vst.msk [vmem:[%s6413_s1 + $0x70] sm:$0xff] %vm4055_vm0, %v5290_v55 }
 0x964 PF: > { %s33_s4 = sadd.s32 1, %s5299_s4  }
 0x965   : > { %p30_p4 = scmp.ge.s32.totalorder %s33_s4, 4  }
 0x967   :  { %32 = sbr.rel (!%p30_p4) target bundleno = 9 (0x9), region = 178 }

</bundles_post_ra>
